<compile_context>
chip_gen: v7x
topology: tpu7x:2x2x1
jax: 0.10.0
libtpu: 0.0.40
codegen_flags: <defaults>
</compile_context>

<pallas_src>
import functools

import jax
import jax.numpy as jnp
from jax.experimental import pallas as pl
from jax.experimental.pallas import tpu as pltpu

KERNEL_SIZE = 7
PAD = 3 if KERNEL_SIZE == 7 else 1


def _round_up(x, m):
    return ((x + m - 1) // m) * m


def _vmem_capacity_bytes():
    """Physical VMEM per TensorCore; conservative (v7x, 64 MiB) fallback."""
    try:
        cap = getattr(pltpu.get_tpu_info(), "vmem_capacity_bytes", None)
        if cap:
            return int(cap)
    except Exception:
        pass
    return 64 * 1024 * 1024


def _pick_batch_tile(n):
    """Batch elements per grid step: largest of 8/4/2/1 dividing N (sublane
    fill on single-TC v5e/v6e); drop 8 -> 4 when that is the only way to give
    v7x's two TensorCores >= 2 parallel batch steps."""
    bt = 1
    for cand in (8, 4, 2):
        if n % cand == 0:
            bt = cand
            break
    if bt == 8 and n // bt < 2:
        bt = 4
    # TODO(synk): for N == 1 inference on v7x, add a second parallel grid axis
    # over spatial row tiles (with 3-row halos) so both TensorCores get work.
    return bt


def _pick_channel_chunk(c, max_cc):
    """(chunk size, possibly padded channel count).

    Chunks smaller than C must be a multiple of 8 (sublane tiling).  If no
    divisor of C fits the budget, C is padded up to a multiple of the chunk
    (padded channels are masked in-kernel) instead of falling back to an
    over-budget full-C block."""
    if c <= max_cc:
        return c, c
    cc = max(8, (max_cc // 8) * 8)
    for cand in range(cc, 7, -8):
        if c % cand == 0:
            return cand, c
    return cc, _round_up(c, cc)


def _spatial_attention_kernel(w_ref, col_ref, x_ref, o_ref, cm_ref, *,
                              bt, H, W, HW, HWp, C, cc, grp, mask_pad):
    """One (batch-tile, channel-chunk) grid step.

    w_ref  : (2, K*K) f32 SMEM  conv weights (row 0 = avg * 1/C, row 1 = max)
    col_ref: (1, HWp) i32       spatial column of each lane
    x_ref  : (bt, cc, HW)       input chunk
    o_ref  : (bt, 1, HWp)       sigmoid(conv) output (pad lanes sliced off)
    cm_ref : (2*bt, HWp) f32    rows [0,bt): running channel sum
                                rows [bt,2bt): running channel max
                                pad lanes stay exactly 0 (roll-wrap target)
    """
    K = KERNEL_SIZE
    P = PAD

    c_idx = pl.program_id(1)
    num_c = pl.num_programs(1)

    @pl.when(c_idx == 0)
    def _init():
        lane_b = jax.lax.broadcasted_iota(jnp.int32, (bt, HWp), 1)
        cm_ref[0:bt, :] = jnp.zeros((bt, HWp), jnp.float32)
        cm_ref[bt:2 * bt, :] = jnp.where(
            lane_b < HW, jnp.float32(-jnp.inf), jnp.float32(0.0))

    # ---- stream this channel chunk in sublane groups (one pass: sum & max) --
    n_grp = cc // grp

    def group_body(g, carry):
        run_sum, run_max = carry
        start = g * grp
        if not isinstance(start, int):
            start = pl.multiple_of(start, grp)
        xg = x_ref[:, pl.ds(start, grp), :].astype(jnp.float32)   # (bt,grp,HW)
        if mask_pad:
            ch = (c_idx * cc + start
                  + jax.lax.broadcasted_iota(jnp.int32, (1, grp, 1), 1))
            xg_max = jnp.where(ch < C, xg, jnp.float32(-jnp.inf))
        else:
            xg_max = xg
        run_sum = run_sum + jnp.sum(xg, axis=1)
        run_max = jnp.maximum(run_max, jnp.max(xg_max, axis=1))
        return run_sum, run_max

    init = (jnp.zeros((bt, HW), jnp.float32),
            jnp.full((bt, HW), -jnp.inf, jnp.float32))
    if n_grp == 1:
        part_sum, part_max = group_body(0, init)
    else:
        part_sum, part_max = jax.lax.fori_loop(0, n_grp, group_body, init)

    cm_ref[0:bt, 0:HW] = cm_ref[0:bt, 0:HW] + part_sum
    cm_ref[bt:2 * bt, 0:HW] = jnp.maximum(cm_ref[bt:2 * bt, 0:HW], part_max)

    @pl.when(c_idx == num_c - 1)
    def _finalize():
        slab = cm_ref[...]                                  # (2*bt, HWp)
        lane = jax.lax.broadcasted_iota(jnp.int32, (1, HWp), 1)
        col = col_ref[...]                                  # (1, HWp)
        half = jax.lax.broadcasted_iota(jnp.int32, (2 * bt, 1), 0) < bt

        acc0 = jnp.zeros((2 * bt, HWp), jnp.float32)
        acc1 = jnp.zeros((2 * bt, HWp), jnp.float32)
        tap = 0
        for ki in range(K):
            di = ki - P
            # Source-side row mask (vertical zero pad / roll-wrap guard),
            # as lane thresholds:  row >= di  <=>  lane >= di*W, etc.
            if di > 0:
                src = jnp.where(lane >= di * W, slab, 0.0)
            elif di < 0:
                src = jnp.where(lane < (H + di) * W, slab, 0.0)
            else:
                src = slab
            for kj in range(K):
                dj = kj - P
                shift = (-(di * W + dj)) % HWp       # out[p] <- src[p+di*W+dj]
                rolled = pltpu.roll(src, shift, 1) if shift else src
                # Output-side column mask (horizontal zero pad).
                if dj > 0:
                    rolled = jnp.where(col < (W - dj), rolled, 0.0)
                elif dj < 0:
                    rolled = jnp.where(col >= (-dj), rolled, 0.0)
                wv = jnp.where(half, w_ref[0, ki * K + kj],
                               w_ref[1, ki * K + kj])        # (2*bt, 1)
                if tap & 1:
                    acc1 = acc1 + rolled * wv
                else:
                    acc0 = acc0 + rolled * wv
                tap += 1

        total = acc0 + acc1
        y = total[0:bt, :] + total[bt:2 * bt, :]             # avg-half + max-half
        o_ref[:, 0, :] = jax.nn.sigmoid(y).astype(o_ref.dtype)


def spatial_attention(x, weight):
    """x: (N, C, H, W); weight: (1, 2, K, K), no bias  ->  (N, 1, H, W)."""
    N, C, H, W = x.shape
    K = KERNEL_SIZE
    assert weight.shape == (1, 2, K, K), weight.shape

    HW = H * W
    HWp = _round_up(HW, 128)                # lane-dense slab / output width
    bt = _pick_batch_tile(N)
    x_item = jnp.dtype(x.dtype).itemsize

    # ---- generation-aware VMEM budget for the x channel chunk -------------
    vmem_cap = _vmem_capacity_bytes()       # 64 MiB v7x, 128 MiB v5e/v6e
    vmem_budget = (vmem_cap * 3) // 4       # ~48 / ~96 MiB usable
    fixed = 2 * bt * HWp * 4                # cm scratch slab
    fixed += 2 * bt * HWp * x_item          # double-buffered output block
    fixed += 2 * HWp * 4                    # double-buffered col-idx block
    fixed += 2 * 1024 * 1024                # compiler scratch headroom
    per_buf = max((vmem_budget - fixed) // 2, bt * 8 * HW * x_item)
    max_cc = max(8, per_buf // (bt * HW * x_item))

    cc, c_pad = _pick_channel_chunk(C, max_cc)
    grp = 8 if cc % 8 == 0 else cc          # in-chunk streaming sublane group

    xf = x.reshape(N, C, HW)
    if c_pad != C:
        xf = jnp.pad(xf, ((0, 0), (0, c_pad - C), (0, 0)))

    # Fold the 1/C of the channel mean into the avg-half conv weights.
    wf = weight.reshape(2, K * K).astype(jnp.float32)
    wf = wf * jnp.array([[1.0 / C], [1.0]], jnp.float32)

    col_idx = (jnp.arange(HWp, dtype=jnp.int32) % W).reshape(1, HWp)

    kernel = functools.partial(
        _spatial_attention_kernel, bt=bt, H=H, W=W, HW=HW, HWp=HWp, C=C,
        cc=cc, grp=grp, mask_pad=(c_pad != C))

    out = pl.pallas_call(
        kernel,
        out_shape=jax.ShapeDtypeStruct((N, 1, HWp), x.dtype),
        grid=(N // bt, c_pad // cc),
        in_specs=[
            pl.BlockSpec(memory_space=pltpu.MemorySpace.SMEM),       # weights
            pl.BlockSpec((1, HWp), lambda n, c: (0, 0)),             # col idx
            pl.BlockSpec((bt, cc, HW), lambda n, c: (n, c, 0)),      # x chunk
        ],
        out_specs=pl.BlockSpec((bt, 1, HWp), lambda n, c: (n, 0, 0)),
        scratch_shapes=[pltpu.VMEM((2 * bt, HWp), jnp.float32)],
        compiler_params=pltpu.CompilerParams(
            dimension_semantics=("parallel", "arbitrary"),
            vmem_limit_bytes=int(vmem_budget),
        ),
    )(wf, col_idx, xf)

    return out[:, :, :HW].reshape(N, 1, H, W)


def _reference(x, weight):
    # Pure-JAX reference (mirrors the PyTorch forward) for validation.
    avg = jnp.mean(x, axis=1, keepdims=True)
    mx = jnp.max(x, axis=1, keepdims=True)
    cat = jnp.concatenate([avg, mx], axis=1)          # (N, 2, H, W)
    y = jax.lax.conv_general_dilated(
        cat, weight, window_strides=(1, 1),
        padding=[(PAD, PAD), (PAD, PAD)],
        dimension_numbers=("NCHW", "OIHW", "NCHW"))
    return jax.nn.sigmoid(y)


if __name__ == "__main__":
    key = jax.random.PRNGKey(0)
    kx, kw = jax.random.split(key)

    N, C, H, W = 2, 4, 16, 16
    x = jax.random.normal(kx, (N, C, H, W), dtype=jnp.float32)

    # Deterministic weight init (Kaiming-uniform-like scale), shape (1, 2, K, K).
    fan_in = 2 * KERNEL_SIZE * KERNEL_SIZE
    bound = (1.0 / fan_in) ** 0.5
    weight = jax.random.uniform(
        kw, (1, 2, KERNEL_SIZE, KERNEL_SIZE),
        minval=-bound, maxval=bound, dtype=jnp.float32)

    out = jax.block_until_ready(spatial_attention(x, weight))

    ref = _reference(x, weight)
    assert out.shape == (N, 1, H, W), out.shape
    assert jnp.allclose(out, ref, atol=2e-5, rtol=1e-5), (
        float(jnp.max(jnp.abs(out - ref))))

    print("KERNEL_OK")
</pallas_src>

<mosaic_0001>
module attributes {stable_mosaic.version = 11 : i64} {
  func.func @_spatial_attention_kernel(%arg0: i32, %arg1: i32, %arg2: memref<2x49xf32, #tpu.memory_space<smem>>, %arg3: memref<1x256xi32, #tpu.memory_space<vmem>>, %arg4: memref<2x4x256xf32, #tpu.memory_space<vmem>>, %arg5: memref<2x1x256xf32, #tpu.memory_space<vmem>>, %arg6: memref<4x256xf32, #tpu.memory_space<vmem>>) attributes {dimension_semantics = [#tpu.dimension_semantics<parallel>, #tpu.dimension_semantics<arbitrary>], iteration_bounds = array<i64: 1, 1>, scalar_prefetch = 0 : i64, scratch_operands = 1 : i64, tpu.core_type = #tpu.core_type<tc>, window_params = [{transform_indices = @transform_0, window_bounds = array<i64: 2, 49>}, {pipeline_mode = #tpu.pipeline_mode<synchronous>, transform_indices = @transform_1, window_bounds = array<i64: 1, 256>}, {transform_indices = @transform_2, window_bounds = array<i64: 2, 4, 256>}, {transform_indices = @transform_3, window_bounds = array<i64: 2, 1, 256>}]} {
    %c0_i32 = arith.constant 0 : i32
    %0 = arith.cmpi eq, %arg1, %c0_i32 : i32
    %1 = arith.extui %0 : i1 to i32
    %c0_i32_0 = arith.constant 0 : i32
    %2 = arith.cmpi ne, %1, %c0_i32_0 : i32
    scf.if %2 {
      %19 = tpu.iota {dimensions = array<i32: 1>} : vector<2x256xi32>
      %cst_15 = arith.constant 0.000000e+00 : f32
      %20 = vector.broadcast %cst_15 : f32 to vector<2x256xf32>
      %c0_16 = arith.constant 0 : index
      %c0_17 = arith.constant 0 : index
      %21 = vector.load %arg6[%c0_16, %c0_17] : memref<4x256xf32, #tpu.memory_space<vmem>>, vector<2x256xf32>
      tpu.vector_store %arg6[%c0_16, %c0_17], %20 {strides = array<i32>} : memref<4x256xf32, #tpu.memory_space<vmem>>, vector<2x256xf32>,
      %c256_i32 = arith.constant 256 : i32
      %22 = vector.broadcast %c256_i32 : i32 to vector<2x256xi32>
      %23 = arith.cmpi slt, %19, %22 : vector<2x256xi32>
      %cst_18 = arith.constant 0xFF800000 : f32
      %cst_19 = arith.constant 0.000000e+00 : f32
      %24 = vector.broadcast %cst_18 : f32 to vector<2x256xf32>
      %25 = vector.broadcast %cst_19 : f32 to vector<2x256xf32>
      %26 = arith.select %23, %24, %25 : vector<2x256xi1>, vector<2x256xf32>
      %c2_20 = arith.constant 2 : index
      %c0_21 = arith.constant 0 : index
      %27 = vector.load %arg6[%c2_20, %c0_21] : memref<4x256xf32, #tpu.memory_space<vmem>>, vector<2x256xf32>
      tpu.vector_store %arg6[%c2_20, %c0_21], %26 {strides = array<i32>} : memref<4x256xf32, #tpu.memory_space<vmem>>, vector<2x256xf32>,
    } else {
    }
    %cst = arith.constant 0.000000e+00 : f32
    %3 = vector.broadcast %cst : f32 to vector<2x256xf32>
    %cst_1 = arith.constant 0xFF800000 : f32
    %4 = vector.broadcast %cst_1 : f32 to vector<2x256xf32>
    %c0 = arith.constant 0 : index
    %c0_2 = arith.constant 0 : index
    %c0_3 = arith.constant 0 : index
    %5 = vector.load %arg4[%c0, %c0_2, %c0_3] : memref<2x4x256xf32, #tpu.memory_space<vmem>>, vector<2x4x256xf32>
    %cst_4 = arith.constant dense<0.000000e+00> : vector<2x256xf32>
    %6 = vector.multi_reduction <add>, %5, %cst_4 [1] : vector<2x4x256xf32> to vector<2x256xf32>
    %7 = arith.addf %3, %6 : vector<2x256xf32>
    %cst_5 = arith.constant dense<0xFF800000> : vector<2x256xf32>
    %8 = vector.multi_reduction <maximumf>, %5, %cst_5 [1] : vector<2x4x256xf32> to vector<2x256xf32>
    %9 = arith.maximumf %4, %8 : vector<2x256xf32>
    %c0_6 = arith.constant 0 : index
    %c0_7 = arith.constant 0 : index
    %10 = vector.load %arg6[%c0_6, %c0_7] : memref<4x256xf32, #tpu.memory_space<vmem>>, vector<2x256xf32>
    %11 = arith.addf %10, %7 : vector<2x256xf32>
    %c0_8 = arith.constant 0 : index
    %c0_9 = arith.constant 0 : index
    %12 = vector.load %arg6[%c0_8, %c0_9] : memref<4x256xf32, #tpu.memory_space<vmem>>, vector<2x256xf32>
    tpu.vector_store %arg6[%c0_8, %c0_9], %11 {strides = array<i32>} : memref<4x256xf32, #tpu.memory_space<vmem>>, vector<2x256xf32>,
    %c2 = arith.constant 2 : index
    %c0_10 = arith.constant 0 : index
    %13 = vector.load %arg6[%c2, %c0_10] : memref<4x256xf32, #tpu.memory_space<vmem>>, vector<2x256xf32>
    %14 = arith.maximumf %13, %9 : vector<2x256xf32>
    %c2_11 = arith.constant 2 : index
    %c0_12 = arith.constant 0 : index
    %15 = vector.load %arg6[%c2_11, %c0_12] : memref<4x256xf32, #tpu.memory_space<vmem>>, vector<2x256xf32>
    tpu.vector_store %arg6[%c2_11, %c0_12], %14 {strides = array<i32>} : memref<4x256xf32, #tpu.memory_space<vmem>>, vector<2x256xf32>,
    %c0_i32_13 = arith.constant 0 : i32
    %16 = arith.cmpi eq, %arg1, %c0_i32_13 : i32
    %17 = arith.extui %16 : i1 to i32
    %c0_i32_14 = arith.constant 0 : i32
    %18 = arith.cmpi ne, %17, %c0_i32_14 : i32
    scf.if %18 {
      %c0_15 = arith.constant 0 : index
      %c0_16 = arith.constant 0 : index
      %19 = vector.load %arg6[%c0_15, %c0_16] : memref<4x256xf32, #tpu.memory_space<vmem>>, vector<4x256xf32>
      %20 = tpu.iota {dimensions = array<i32: 1>} : vector<1x256xi32>
      %c0_17 = arith.constant 0 : index
      %c0_18 = arith.constant 0 : index
      %21 = vector.load %arg3[%c0_17, %c0_18] : memref<1x256xi32, #tpu.memory_space<vmem>>, vector<1x256xi32>
      %22 = tpu.iota {dimensions = array<i32: 0>} : vector<4x1xi32>
      %c2_i32 = arith.constant 2 : i32
      %23 = vector.broadcast %c2_i32 : i32 to vector<4x1xi32>
      %24 = arith.cmpi slt, %22, %23 : vector<4x1xi32>
      %cst_19 = arith.constant 0.000000e+00 : f32
      %25 = vector.broadcast %cst_19 : f32 to vector<4x256xf32>
      %cst_20 = arith.constant 0.000000e+00 : f32
      %26 = vector.broadcast %cst_20 : f32 to vector<4x256xf32>
      %c208_i32 = arith.constant 208 : i32
      %27 = vector.broadcast %c208_i32 : i32 to vector<1x256xi32>
      %28 = arith.cmpi slt, %20, %27 : vector<1x256xi32>
      %cst_21 = arith.constant 0.000000e+00 : f32
      %29 = vector.shape_cast %28 : vector<1x256xi1> to vector<1x256xi1>
      %30 = vector.broadcast %29 : vector<1x256xi1> to vector<4x256xi1>
      %31 = vector.broadcast %cst_21 : f32 to vector<4x256xf32>
      %32 = arith.select %30, %19, %31 : vector<4x256xi1>, vector<4x256xf32>
      %c51_i32 = arith.constant 51 : i32
      %33 = tpu.dynamic_rotate %32 by %c51_i32 dim 1 : vector<4x256xf32>, i32 -> vector<4x256xf32>
      %c3_i32 = arith.constant 3 : i32
      %34 = vector.broadcast %c3_i32 : i32 to vector<1x256xi32>
      %35 = arith.cmpi sge, %21, %34 : vector<1x256xi32>
      %cst_22 = arith.constant 0.000000e+00 : f32
      %36 = vector.shape_cast %35 : vector<1x256xi1> to vector<1x256xi1>
      %37 = vector.broadcast %36 : vector<1x256xi1> to vector<4x256xi1>
      %38 = vector.broadcast %cst_22 : f32 to vector<4x256xf32>
      %39 = arith.select %37, %33, %38 : vector<4x256xi1>, vector<4x256xf32>
      %c0_23 = arith.constant 0 : index
      %c0_24 = arith.constant 0 : index
      %40 = memref.load %arg2[%c0_23, %c0_24] : memref<2x49xf32, #tpu.memory_space<smem>>
      %c1 = arith.constant 1 : index
      %c0_25 = arith.constant 0 : index
      %41 = memref.load %arg2[%c1, %c0_25] : memref<2x49xf32, #tpu.memory_space<smem>>
      %42 = vector.broadcast %40 : f32 to vector<4x1xf32>
      %43 = vector.broadcast %41 : f32 to vector<4x1xf32>
      %44 = arith.select %24, %42, %43 : vector<4x1xi1>, vector<4x1xf32>
      %45 = vector.broadcast %44 : vector<4x1xf32> to vector<4x256xf32>
      %46 = arith.mulf %39, %45 : vector<4x256xf32>
      %47 = arith.addf %25, %46 : vector<4x256xf32>
      %c50_i32 = arith.constant 50 : i32
      %48 = tpu.dynamic_rotate %32 by %c50_i32 dim 1 : vector<4x256xf32>, i32 -> vector<4x256xf32>
      %c2_i32_26 = arith.constant 2 : i32
      %49 = vector.broadcast %c2_i32_26 : i32 to vector<1x256xi32>
      %50 = arith.cmpi sge, %21, %49 : vector<1x256xi32>
      %cst_27 = arith.constant 0.000000e+00 : f32
      %51 = vector.shape_cast %50 : vector<1x256xi1> to vector<1x256xi1>
      %52 = vector.broadcast %51 : vector<1x256xi1> to vector<4x256xi1>
      %53 = vector.broadcast %cst_27 : f32 to vector<4x256xf32>
      %54 = arith.select %52, %48, %53 : vector<4x256xi1>, vector<4x256xf32>
      %c0_28 = arith.constant 0 : index
      %c1_29 = arith.constant 1 : index
      %55 = memref.load %arg2[%c0_28, %c1_29] : memref<2x49xf32, #tpu.memory_space<smem>>
      %c1_30 = arith.constant 1 : index
      %c1_31 = arith.constant 1 : index
      %56 = memref.load %arg2[%c1_30, %c1_31] : memref<2x49xf32, #tpu.memory_space<smem>>
      %57 = vector.broadcast %55 : f32 to vector<4x1xf32>
      %58 = vector.broadcast %56 : f32 to vector<4x1xf32>
      %59 = arith.select %24, %57, %58 : vector<4x1xi1>, vector<4x1xf32>
      %60 = vector.broadcast %59 : vector<4x1xf32> to vector<4x256xf32>
      %61 = arith.mulf %54, %60 : vector<4x256xf32>
      %62 = arith.addf %26, %61 : vector<4x256xf32>
      %c49_i32 = arith.constant 49 : i32
      %63 = tpu.dynamic_rotate %32 by %c49_i32 dim 1 : vector<4x256xf32>, i32 -> vector<4x256xf32>
      %c1_i32 = arith.constant 1 : i32
      %64 = vector.broadcast %c1_i32 : i32 to vector<1x256xi32>
      %65 = arith.cmpi sge, %21, %64 : vector<1x256xi32>
      %cst_32 = arith.constant 0.000000e+00 : f32
      %66 = vector.shape_cast %65 : vector<1x256xi1> to vector<1x256xi1>
      %67 = vector.broadcast %66 : vector<1x256xi1> to vector<4x256xi1>
      %68 = vector.broadcast %cst_32 : f32 to vector<4x256xf32>
      %69 = arith.select %67, %63, %68 : vector<4x256xi1>, vector<4x256xf32>
      %c0_33 = arith.constant 0 : index
      %c2_34 = arith.constant 2 : index
      %70 = memref.load %arg2[%c0_33, %c2_34] : memref<2x49xf32, #tpu.memory_space<smem>>
      %c1_35 = arith.constant 1 : index
      %c2_36 = arith.constant 2 : index
      %71 = memref.load %arg2[%c1_35, %c2_36] : memref<2x49xf32, #tpu.memory_space<smem>>
      %72 = vector.broadcast %70 : f32 to vector<4x1xf32>
      %73 = vector.broadcast %71 : f32 to vector<4x1xf32>
      %74 = arith.select %24, %72, %73 : vector<4x1xi1>, vector<4x1xf32>
      %75 = vector.broadcast %74 : vector<4x1xf32> to vector<4x256xf32>
      %76 = arith.mulf %69, %75 : vector<4x256xf32>
      %77 = arith.addf %47, %76 : vector<4x256xf32>
      %c48_i32 = arith.constant 48 : i32
      %78 = tpu.dynamic_rotate %32 by %c48_i32 dim 1 : vector<4x256xf32>, i32 -> vector<4x256xf32>
      %c0_37 = arith.constant 0 : index
      %c3 = arith.constant 3 : index
      %79 = memref.load %arg2[%c0_37, %c3] : memref<2x49xf32, #tpu.memory_space<smem>>
      %c1_38 = arith.constant 1 : index
      %c3_39 = arith.constant 3 : index
      %80 = memref.load %arg2[%c1_38, %c3_39] : memref<2x49xf32, #tpu.memory_space<smem>>
      %81 = vector.broadcast %79 : f32 to vector<4x1xf32>
      %82 = vector.broadcast %80 : f32 to vector<4x1xf32>
      %83 = arith.select %24, %81, %82 : vector<4x1xi1>, vector<4x1xf32>
      %84 = vector.broadcast %83 : vector<4x1xf32> to vector<4x256xf32>
      %85 = arith.mulf %78, %84 : vector<4x256xf32>
      %86 = arith.addf %62, %85 : vector<4x256xf32>
      %c47_i32 = arith.constant 47 : i32
      %87 = tpu.dynamic_rotate %32 by %c47_i32 dim 1 : vector<4x256xf32>, i32 -> vector<4x256xf32>
      %c15_i32 = arith.constant 15 : i32
      %88 = vector.broadcast %c15_i32 : i32 to vector<1x256xi32>
      %89 = arith.cmpi slt, %21, %88 : vector<1x256xi32>
      %cst_40 = arith.constant 0.000000e+00 : f32
      %90 = vector.shape_cast %89 : vector<1x256xi1> to vector<1x256xi1>
      %91 = vector.broadcast %90 : vector<1x256xi1> to vector<4x256xi1>
      %92 = vector.broadcast %cst_40 : f32 to vector<4x256xf32>
      %93 = arith.select %91, %87, %92 : vector<4x256xi1>, vector<4x256xf32>
      %c0_41 = arith.constant 0 : index
      %c4 = arith.constant 4 : index
      %94 = memref.load %arg2[%c0_41, %c4] : memref<2x49xf32, #tpu.memory_space<smem>>
      %c1_42 = arith.constant 1 : index
      %c4_43 = arith.constant 4 : index
      %95 = memref.load %arg2[%c1_42, %c4_43] : memref<2x49xf32, #tpu.memory_space<smem>>
      %96 = vector.broadcast %94 : f32 to vector<4x1xf32>
      %97 = vector.broadcast %95 : f32 to vector<4x1xf32>
      %98 = arith.select %24, %96, %97 : vector<4x1xi1>, vector<4x1xf32>
      %99 = vector.broadcast %98 : vector<4x1xf32> to vector<4x256xf32>
      %100 = arith.mulf %93, %99 : vector<4x256xf32>
      %101 = arith.addf %77, %100 : vector<4x256xf32>
      %c46_i32 = arith.constant 46 : i32
      %102 = tpu.dynamic_rotate %32 by %c46_i32 dim 1 : vector<4x256xf32>, i32 -> vector<4x256xf32>
      %c14_i32 = arith.constant 14 : i32
      %103 = vector.broadcast %c14_i32 : i32 to vector<1x256xi32>
      %104 = arith.cmpi slt, %21, %103 : vector<1x256xi32>
      %cst_44 = arith.constant 0.000000e+00 : f32
      %105 = vector.shape_cast %104 : vector<1x256xi1> to vector<1x256xi1>
      %106 = vector.broadcast %105 : vector<1x256xi1> to vector<4x256xi1>
      %107 = vector.broadcast %cst_44 : f32 to vector<4x256xf32>
      %108 = arith.select %106, %102, %107 : vector<4x256xi1>, vector<4x256xf32>
      %c0_45 = arith.constant 0 : index
      %c5 = arith.constant 5 : index
      %109 = memref.load %arg2[%c0_45, %c5] : memref<2x49xf32, #tpu.memory_space<smem>>
      %c1_46 = arith.constant 1 : index
      %c5_47 = arith.constant 5 : index
      %110 = memref.load %arg2[%c1_46, %c5_47] : memref<2x49xf32, #tpu.memory_space<smem>>
      %111 = vector.broadcast %109 : f32 to vector<4x1xf32>
      %112 = vector.broadcast %110 : f32 to vector<4x1xf32>
      %113 = arith.select %24, %111, %112 : vector<4x1xi1>, vector<4x1xf32>
      %114 = vector.broadcast %113 : vector<4x1xf32> to vector<4x256xf32>
      %115 = arith.mulf %108, %114 : vector<4x256xf32>
      %116 = arith.addf %86, %115 : vector<4x256xf32>
      %c45_i32 = arith.constant 45 : i32
      %117 = tpu.dynamic_rotate %32 by %c45_i32 dim 1 : vector<4x256xf32>, i32 -> vector<4x256xf32>
      %c13_i32 = arith.constant 13 : i32
      %118 = vector.broadcast %c13_i32 : i32 to vector<1x256xi32>
      %119 = arith.cmpi slt, %21, %118 : vector<1x256xi32>
      %cst_48 = arith.constant 0.000000e+00 : f32
      %120 = vector.shape_cast %119 : vector<1x256xi1> to vector<1x256xi1>
      %121 = vector.broadcast %120 : vector<1x256xi1> to vector<4x256xi1>
      %122 = vector.broadcast %cst_48 : f32 to vector<4x256xf32>
      %123 = arith.select %121, %117, %122 : vector<4x256xi1>, vector<4x256xf32>
      %c0_49 = arith.constant 0 : index
      %c6 = arith.constant 6 : index
      %124 = memref.load %arg2[%c0_49, %c6] : memref<2x49xf32, #tpu.memory_space<smem>>
      %c1_50 = arith.constant 1 : index
      %c6_51 = arith.constant 6 : index
      %125 = memref.load %arg2[%c1_50, %c6_51] : memref<2x49xf32, #tpu.memory_space<smem>>
      %126 = vector.broadcast %124 : f32 to vector<4x1xf32>
      %127 = vector.broadcast %125 : f32 to vector<4x1xf32>
      %128 = arith.select %24, %126, %127 : vector<4x1xi1>, vector<4x1xf32>
      %129 = vector.broadcast %128 : vector<4x1xf32> to vector<4x256xf32>
      %130 = arith.mulf %123, %129 : vector<4x256xf32>
      %131 = arith.addf %101, %130 : vector<4x256xf32>
      %c224_i32 = arith.constant 224 : i32
      %132 = vector.broadcast %c224_i32 : i32 to vector<1x256xi32>
      %133 = arith.cmpi slt, %20, %132 : vector<1x256xi32>
      %cst_52 = arith.constant 0.000000e+00 : f32
      %134 = vector.shape_cast %133 : vector<1x256xi1> to vector<1x256xi1>
      %135 = vector.broadcast %134 : vector<1x256xi1> to vector<4x256xi1>
      %136 = vector.broadcast %cst_52 : f32 to vector<4x256xf32>
      %137 = arith.select %135, %19, %136 : vector<4x256xi1>, vector<4x256xf32>
      %c35_i32 = arith.constant 35 : i32
      %138 = tpu.dynamic_rotate %137 by %c35_i32 dim 1 : vector<4x256xf32>, i32 -> vector<4x256xf32>
      %c3_i32_53 = arith.constant 3 : i32
      %139 = vector.broadcast %c3_i32_53 : i32 to vector<1x256xi32>
      %140 = arith.cmpi sge, %21, %139 : vector<1x256xi32>
      %cst_54 = arith.constant 0.000000e+00 : f32
      %141 = vector.shape_cast %140 : vector<1x256xi1> to vector<1x256xi1>
      %142 = vector.broadcast %141 : vector<1x256xi1> to vector<4x256xi1>
      %143 = vector.broadcast %cst_54 : f32 to vector<4x256xf32>
      %144 = arith.select %142, %138, %143 : vector<4x256xi1>, vector<4x256xf32>
      %c0_55 = arith.constant 0 : index
      %c7 = arith.constant 7 : index
      %145 = memref.load %arg2[%c0_55, %c7] : memref<2x49xf32, #tpu.memory_space<smem>>
      %c1_56 = arith.constant 1 : index
      %c7_57 = arith.constant 7 : index
      %146 = memref.load %arg2[%c1_56, %c7_57] : memref<2x49xf32, #tpu.memory_space<smem>>
      %147 = vector.broadcast %145 : f32 to vector<4x1xf32>
      %148 = vector.broadcast %146 : f32 to vector<4x1xf32>
      %149 = arith.select %24, %147, %148 : vector<4x1xi1>, vector<4x1xf32>
      %150 = vector.broadcast %149 : vector<4x1xf32> to vector<4x256xf32>
      %151 = arith.mulf %144, %150 : vector<4x256xf32>
      %152 = arith.addf %116, %151 : vector<4x256xf32>
      %c34_i32 = arith.constant 34 : i32
      %153 = tpu.dynamic_rotate %137 by %c34_i32 dim 1 : vector<4x256xf32>, i32 -> vector<4x256xf32>
      %c2_i32_58 = arith.constant 2 : i32
      %154 = vector.broadcast %c2_i32_58 : i32 to vector<1x256xi32>
      %155 = arith.cmpi sge, %21, %154 : vector<1x256xi32>
      %cst_59 = arith.constant 0.000000e+00 : f32
      %156 = vector.shape_cast %155 : vector<1x256xi1> to vector<1x256xi1>
      %157 = vector.broadcast %156 : vector<1x256xi1> to vector<4x256xi1>
      %158 = vector.broadcast %cst_59 : f32 to vector<4x256xf32>
      %159 = arith.select %157, %153, %158 : vector<4x256xi1>, vector<4x256xf32>
      %c0_60 = arith.constant 0 : index
      %c8 = arith.constant 8 : index
      %160 = memref.load %arg2[%c0_60, %c8] : memref<2x49xf32, #tpu.memory_space<smem>>
      %c1_61 = arith.constant 1 : index
      %c8_62 = arith.constant 8 : index
      %161 = memref.load %arg2[%c1_61, %c8_62] : memref<2x49xf32, #tpu.memory_space<smem>>
      %162 = vector.broadcast %160 : f32 to vector<4x1xf32>
      %163 = vector.broadcast %161 : f32 to vector<4x1xf32>
      %164 = arith.select %24, %162, %163 : vector<4x1xi1>, vector<4x1xf32>
      %165 = vector.broadcast %164 : vector<4x1xf32> to vector<4x256xf32>
      %166 = arith.mulf %159, %165 : vector<4x256xf32>
      %167 = arith.addf %131, %166 : vector<4x256xf32>
      %c33_i32 = arith.constant 33 : i32
      %168 = tpu.dynamic_rotate %137 by %c33_i32 dim 1 : vector<4x256xf32>, i32 -> vector<4x256xf32>
      %c1_i32_63 = arith.constant 1 : i32
      %169 = vector.broadcast %c1_i32_63 : i32 to vector<1x256xi32>
      %170 = arith.cmpi sge, %21, %169 : vector<1x256xi32>
      %cst_64 = arith.constant 0.000000e+00 : f32
      %171 = vector.shape_cast %170 : vector<1x256xi1> to vector<1x256xi1>
      %172 = vector.broadcast %171 : vector<1x256xi1> to vector<4x256xi1>
      %173 = vector.broadcast %cst_64 : f32 to vector<4x256xf32>
      %174 = arith.select %172, %168, %173 : vector<4x256xi1>, vector<4x256xf32>
      %c0_65 = arith.constant 0 : index
      %c9 = arith.constant 9 : index
      %175 = memref.load %arg2[%c0_65, %c9] : memref<2x49xf32, #tpu.memory_space<smem>>
      %c1_66 = arith.constant 1 : index
      %c9_67 = arith.constant 9 : index
      %176 = memref.load %arg2[%c1_66, %c9_67] : memref<2x49xf32, #tpu.memory_space<smem>>
      %177 = vector.broadcast %175 : f32 to vector<4x1xf32>
      %178 = vector.broadcast %176 : f32 to vector<4x1xf32>
      %179 = arith.select %24, %177, %178 : vector<4x1xi1>, vector<4x1xf32>
      %180 = vector.broadcast %179 : vector<4x1xf32> to vector<4x256xf32>
      %181 = arith.mulf %174, %180 : vector<4x256xf32>
      %182 = arith.addf %152, %181 : vector<4x256xf32>
      %c32_i32 = arith.constant 32 : i32
      %183 = tpu.dynamic_rotate %137 by %c32_i32 dim 1 : vector<4x256xf32>, i32 -> vector<4x256xf32>
      %c0_68 = arith.constant 0 : index
      %c10 = arith.constant 10 : index
      %184 = memref.load %arg2[%c0_68, %c10] : memref<2x49xf32, #tpu.memory_space<smem>>
      %c1_69 = arith.constant 1 : index
      %c10_70 = arith.constant 10 : index
      %185 = memref.load %arg2[%c1_69, %c10_70] : memref<2x49xf32, #tpu.memory_space<smem>>
      %186 = vector.broadcast %184 : f32 to vector<4x1xf32>
      %187 = vector.broadcast %185 : f32 to vector<4x1xf32>
      %188 = arith.select %24, %186, %187 : vector<4x1xi1>, vector<4x1xf32>
      %189 = vector.broadcast %188 : vector<4x1xf32> to vector<4x256xf32>
      %190 = arith.mulf %183, %189 : vector<4x256xf32>
      %191 = arith.addf %167, %190 : vector<4x256xf32>
      %c31_i32 = arith.constant 31 : i32
      %192 = tpu.dynamic_rotate %137 by %c31_i32 dim 1 : vector<4x256xf32>, i32 -> vector<4x256xf32>
      %c15_i32_71 = arith.constant 15 : i32
      %193 = vector.broadcast %c15_i32_71 : i32 to vector<1x256xi32>
      %194 = arith.cmpi slt, %21, %193 : vector<1x256xi32>
      %cst_72 = arith.constant 0.000000e+00 : f32
      %195 = vector.shape_cast %194 : vector<1x256xi1> to vector<1x256xi1>
      %196 = vector.broadcast %195 : vector<1x256xi1> to vector<4x256xi1>
      %197 = vector.broadcast %cst_72 : f32 to vector<4x256xf32>
      %198 = arith.select %196, %192, %197 : vector<4x256xi1>, vector<4x256xf32>
      %c0_73 = arith.constant 0 : index
      %c11 = arith.constant 11 : index
      %199 = memref.load %arg2[%c0_73, %c11] : memref<2x49xf32, #tpu.memory_space<smem>>
      %c1_74 = arith.constant 1 : index
      %c11_75 = arith.constant 11 : index
      %200 = memref.load %arg2[%c1_74, %c11_75] : memref<2x49xf32, #tpu.memory_space<smem>>
      %201 = vector.broadcast %199 : f32 to vector<4x1xf32>
      %202 = vector.broadcast %200 : f32 to vector<4x1xf32>
      %203 = arith.select %24, %201, %202 : vector<4x1xi1>, vector<4x1xf32>
      %204 = vector.broadcast %203 : vector<4x1xf32> to vector<4x256xf32>
      %205 = arith.mulf %198, %204 : vector<4x256xf32>
      %206 = arith.addf %182, %205 : vector<4x256xf32>
      %c30_i32 = arith.constant 30 : i32
      %207 = tpu.dynamic_rotate %137 by %c30_i32 dim 1 : vector<4x256xf32>, i32 -> vector<4x256xf32>
      %c14_i32_76 = arith.constant 14 : i32
      %208 = vector.broadcast %c14_i32_76 : i32 to vector<1x256xi32>
      %209 = arith.cmpi slt, %21, %208 : vector<1x256xi32>
      %cst_77 = arith.constant 0.000000e+00 : f32
      %210 = vector.shape_cast %209 : vector<1x256xi1> to vector<1x256xi1>
      %211 = vector.broadcast %210 : vector<1x256xi1> to vector<4x256xi1>
      %212 = vector.broadcast %cst_77 : f32 to vector<4x256xf32>
      %213 = arith.select %211, %207, %212 : vector<4x256xi1>, vector<4x256xf32>
      %c0_78 = arith.constant 0 : index
      %c12 = arith.constant 12 : index
      %214 = memref.load %arg2[%c0_78, %c12] : memref<2x49xf32, #tpu.memory_space<smem>>
      %c1_79 = arith.constant 1 : index
      %c12_80 = arith.constant 12 : index
      %215 = memref.load %arg2[%c1_79, %c12_80] : memref<2x49xf32, #tpu.memory_space<smem>>
      %216 = vector.broadcast %214 : f32 to vector<4x1xf32>
      %217 = vector.broadcast %215 : f32 to vector<4x1xf32>
      %218 = arith.select %24, %216, %217 : vector<4x1xi1>, vector<4x1xf32>
      %219 = vector.broadcast %218 : vector<4x1xf32> to vector<4x256xf32>
      %220 = arith.mulf %213, %219 : vector<4x256xf32>
      %221 = arith.addf %191, %220 : vector<4x256xf32>
      %c29_i32 = arith.constant 29 : i32
      %222 = tpu.dynamic_rotate %137 by %c29_i32 dim 1 : vector<4x256xf32>, i32 -> vector<4x256xf32>
      %c13_i32_81 = arith.constant 13 : i32
      %223 = vector.broadcast %c13_i32_81 : i32 to vector<1x256xi32>
      %224 = arith.cmpi slt, %21, %223 : vector<1x256xi32>
      %cst_82 = arith.constant 0.000000e+00 : f32
      %225 = vector.shape_cast %224 : vector<1x256xi1> to vector<1x256xi1>
      %226 = vector.broadcast %225 : vector<1x256xi1> to vector<4x256xi1>
      %227 = vector.broadcast %cst_82 : f32 to vector<4x256xf32>
      %228 = arith.select %226, %222, %227 : vector<4x256xi1>, vector<4x256xf32>
      %c0_83 = arith.constant 0 : index
      %c13 = arith.constant 13 : index
      %229 = memref.load %arg2[%c0_83, %c13] : memref<2x49xf32, #tpu.memory_space<smem>>
      %c1_84 = arith.constant 1 : index
      %c13_85 = arith.constant 13 : index
      %230 = memref.load %arg2[%c1_84, %c13_85] : memref<2x49xf32, #tpu.memory_space<smem>>
      %231 = vector.broadcast %229 : f32 to vector<4x1xf32>
      %232 = vector.broadcast %230 : f32 to vector<4x1xf32>
      %233 = arith.select %24, %231, %232 : vector<4x1xi1>, vector<4x1xf32>
      %234 = vector.broadcast %233 : vector<4x1xf32> to vector<4x256xf32>
      %235 = arith.mulf %228, %234 : vector<4x256xf32>
      %236 = arith.addf %206, %235 : vector<4x256xf32>
      %c240_i32 = arith.constant 240 : i32
      %237 = vector.broadcast %c240_i32 : i32 to vector<1x256xi32>
      %238 = arith.cmpi slt, %20, %237 : vector<1x256xi32>
      %cst_86 = arith.constant 0.000000e+00 : f32
      %239 = vector.shape_cast %238 : vector<1x256xi1> to vector<1x256xi1>
      %240 = vector.broadcast %239 : vector<1x256xi1> to vector<4x256xi1>
      %241 = vector.broadcast %cst_86 : f32 to vector<4x256xf32>
      %242 = arith.select %240, %19, %241 : vector<4x256xi1>, vector<4x256xf32>
      %c19_i32 = arith.constant 19 : i32
      %243 = tpu.dynamic_rotate %242 by %c19_i32 dim 1 : vector<4x256xf32>, i32 -> vector<4x256xf32>
      %c3_i32_87 = arith.constant 3 : i32
      %244 = vector.broadcast %c3_i32_87 : i32 to vector<1x256xi32>
      %245 = arith.cmpi sge, %21, %244 : vector<1x256xi32>
      %cst_88 = arith.constant 0.000000e+00 : f32
      %246 = vector.shape_cast %245 : vector<1x256xi1> to vector<1x256xi1>
      %247 = vector.broadcast %246 : vector<1x256xi1> to vector<4x256xi1>
      %248 = vector.broadcast %cst_88 : f32 to vector<4x256xf32>
      %249 = arith.select %247, %243, %248 : vector<4x256xi1>, vector<4x256xf32>
      %c0_89 = arith.constant 0 : index
      %c14 = arith.constant 14 : index
      %250 = memref.load %arg2[%c0_89, %c14] : memref<2x49xf32, #tpu.memory_space<smem>>
      %c1_90 = arith.constant 1 : index
      %c14_91 = arith.constant 14 : index
      %251 = memref.load %arg2[%c1_90, %c14_91] : memref<2x49xf32, #tpu.memory_space<smem>>
      %252 = vector.broadcast %250 : f32 to vector<4x1xf32>
      %253 = vector.broadcast %251 : f32 to vector<4x1xf32>
      %254 = arith.select %24, %252, %253 : vector<4x1xi1>, vector<4x1xf32>
      %255 = vector.broadcast %254 : vector<4x1xf32> to vector<4x256xf32>
      %256 = arith.mulf %249, %255 : vector<4x256xf32>
      %257 = arith.addf %221, %256 : vector<4x256xf32>
      %c18_i32 = arith.constant 18 : i32
      %258 = tpu.dynamic_rotate %242 by %c18_i32 dim 1 : vector<4x256xf32>, i32 -> vector<4x256xf32>
      %c2_i32_92 = arith.constant 2 : i32
      %259 = vector.broadcast %c2_i32_92 : i32 to vector<1x256xi32>
      %260 = arith.cmpi sge, %21, %259 : vector<1x256xi32>
      %cst_93 = arith.constant 0.000000e+00 : f32
      %261 = vector.shape_cast %260 : vector<1x256xi1> to vector<1x256xi1>
      %262 = vector.broadcast %261 : vector<1x256xi1> to vector<4x256xi1>
      %263 = vector.broadcast %cst_93 : f32 to vector<4x256xf32>
      %264 = arith.select %262, %258, %263 : vector<4x256xi1>, vector<4x256xf32>
      %c0_94 = arith.constant 0 : index
      %c15 = arith.constant 15 : index
      %265 = memref.load %arg2[%c0_94, %c15] : memref<2x49xf32, #tpu.memory_space<smem>>
      %c1_95 = arith.constant 1 : index
      %c15_96 = arith.constant 15 : index
      %266 = memref.load %arg2[%c1_95, %c15_96] : memref<2x49xf32, #tpu.memory_space<smem>>
      %267 = vector.broadcast %265 : f32 to vector<4x1xf32>
      %268 = vector.broadcast %266 : f32 to vector<4x1xf32>
      %269 = arith.select %24, %267, %268 : vector<4x1xi1>, vector<4x1xf32>
      %270 = vector.broadcast %269 : vector<4x1xf32> to vector<4x256xf32>
      %271 = arith.mulf %264, %270 : vector<4x256xf32>
      %272 = arith.addf %236, %271 : vector<4x256xf32>
      %c17_i32 = arith.constant 17 : i32
      %273 = tpu.dynamic_rotate %242 by %c17_i32 dim 1 : vector<4x256xf32>, i32 -> vector<4x256xf32>
      %c1_i32_97 = arith.constant 1 : i32
      %274 = vector.broadcast %c1_i32_97 : i32 to vector<1x256xi32>
      %275 = arith.cmpi sge, %21, %274 : vector<1x256xi32>
      %cst_98 = arith.constant 0.000000e+00 : f32
      %276 = vector.shape_cast %275 : vector<1x256xi1> to vector<1x256xi1>
      %277 = vector.broadcast %276 : vector<1x256xi1> to vector<4x256xi1>
      %278 = vector.broadcast %cst_98 : f32 to vector<4x256xf32>
      %279 = arith.select %277, %273, %278 : vector<4x256xi1>, vector<4x256xf32>
      %c0_99 = arith.constant 0 : index
      %c16 = arith.constant 16 : index
      %280 = memref.load %arg2[%c0_99, %c16] : memref<2x49xf32, #tpu.memory_space<smem>>
      %c1_100 = arith.constant 1 : index
      %c16_101 = arith.constant 16 : index
      %281 = memref.load %arg2[%c1_100, %c16_101] : memref<2x49xf32, #tpu.memory_space<smem>>
      %282 = vector.broadcast %280 : f32 to vector<4x1xf32>
      %283 = vector.broadcast %281 : f32 to vector<4x1xf32>
      %284 = arith.select %24, %282, %283 : vector<4x1xi1>, vector<4x1xf32>
      %285 = vector.broadcast %284 : vector<4x1xf32> to vector<4x256xf32>
      %286 = arith.mulf %279, %285 : vector<4x256xf32>
      %287 = arith.addf %257, %286 : vector<4x256xf32>
      %c16_i32 = arith.constant 16 : i32
      %288 = tpu.dynamic_rotate %242 by %c16_i32 dim 1 : vector<4x256xf32>, i32 -> vector<4x256xf32>
      %c0_102 = arith.constant 0 : index
      %c17 = arith.constant 17 : index
      %289 = memref.load %arg2[%c0_102, %c17] : memref<2x49xf32, #tpu.memory_space<smem>>
      %c1_103 = arith.constant 1 : index
      %c17_104 = arith.constant 17 : index
      %290 = memref.load %arg2[%c1_103, %c17_104] : memref<2x49xf32, #tpu.memory_space<smem>>
      %291 = vector.broadcast %289 : f32 to vector<4x1xf32>
      %292 = vector.broadcast %290 : f32 to vector<4x1xf32>
      %293 = arith.select %24, %291, %292 : vector<4x1xi1>, vector<4x1xf32>
      %294 = vector.broadcast %293 : vector<4x1xf32> to vector<4x256xf32>
      %295 = arith.mulf %288, %294 : vector<4x256xf32>
      %296 = arith.addf %272, %295 : vector<4x256xf32>
      %c15_i32_105 = arith.constant 15 : i32
      %297 = tpu.dynamic_rotate %242 by %c15_i32_105 dim 1 : vector<4x256xf32>, i32 -> vector<4x256xf32>
      %c15_i32_106 = arith.constant 15 : i32
      %298 = vector.broadcast %c15_i32_106 : i32 to vector<1x256xi32>
      %299 = arith.cmpi slt, %21, %298 : vector<1x256xi32>
      %cst_107 = arith.constant 0.000000e+00 : f32
      %300 = vector.shape_cast %299 : vector<1x256xi1> to vector<1x256xi1>
      %301 = vector.broadcast %300 : vector<1x256xi1> to vector<4x256xi1>
      %302 = vector.broadcast %cst_107 : f32 to vector<4x256xf32>
      %303 = arith.select %301, %297, %302 : vector<4x256xi1>, vector<4x256xf32>
      %c0_108 = arith.constant 0 : index
      %c18 = arith.constant 18 : index
      %304 = memref.load %arg2[%c0_108, %c18] : memref<2x49xf32, #tpu.memory_space<smem>>
      %c1_109 = arith.constant 1 : index
      %c18_110 = arith.constant 18 : index
      %305 = memref.load %arg2[%c1_109, %c18_110] : memref<2x49xf32, #tpu.memory_space<smem>>
      %306 = vector.broadcast %304 : f32 to vector<4x1xf32>
      %307 = vector.broadcast %305 : f32 to vector<4x1xf32>
      %308 = arith.select %24, %306, %307 : vector<4x1xi1>, vector<4x1xf32>
      %309 = vector.broadcast %308 : vector<4x1xf32> to vector<4x256xf32>
      %310 = arith.mulf %303, %309 : vector<4x256xf32>
      %311 = arith.addf %287, %310 : vector<4x256xf32>
      %c14_i32_111 = arith.constant 14 : i32
      %312 = tpu.dynamic_rotate %242 by %c14_i32_111 dim 1 : vector<4x256xf32>, i32 -> vector<4x256xf32>
      %c14_i32_112 = arith.constant 14 : i32
      %313 = vector.broadcast %c14_i32_112 : i32 to vector<1x256xi32>
      %314 = arith.cmpi slt, %21, %313 : vector<1x256xi32>
      %cst_113 = arith.constant 0.000000e+00 : f32
      %315 = vector.shape_cast %314 : vector<1x256xi1> to vector<1x256xi1>
      %316 = vector.broadcast %315 : vector<1x256xi1> to vector<4x256xi1>
      %317 = vector.broadcast %cst_113 : f32 to vector<4x256xf32>
      %318 = arith.select %316, %312, %317 : vector<4x256xi1>, vector<4x256xf32>
      %c0_114 = arith.constant 0 : index
      %c19 = arith.constant 19 : index
      %319 = memref.load %arg2[%c0_114, %c19] : memref<2x49xf32, #tpu.memory_space<smem>>
      %c1_115 = arith.constant 1 : index
      %c19_116 = arith.constant 19 : index
      %320 = memref.load %arg2[%c1_115, %c19_116] : memref<2x49xf32, #tpu.memory_space<smem>>
      %321 = vector.broadcast %319 : f32 to vector<4x1xf32>
      %322 = vector.broadcast %320 : f32 to vector<4x1xf32>
      %323 = arith.select %24, %321, %322 : vector<4x1xi1>, vector<4x1xf32>
      %324 = vector.broadcast %323 : vector<4x1xf32> to vector<4x256xf32>
      %325 = arith.mulf %318, %324 : vector<4x256xf32>
      %326 = arith.addf %296, %325 : vector<4x256xf32>
      %c13_i32_117 = arith.constant 13 : i32
      %327 = tpu.dynamic_rotate %242 by %c13_i32_117 dim 1 : vector<4x256xf32>, i32 -> vector<4x256xf32>
      %c13_i32_118 = arith.constant 13 : i32
      %328 = vector.broadcast %c13_i32_118 : i32 to vector<1x256xi32>
      %329 = arith.cmpi slt, %21, %328 : vector<1x256xi32>
      %cst_119 = arith.constant 0.000000e+00 : f32
      %330 = vector.shape_cast %329 : vector<1x256xi1> to vector<1x256xi1>
      %331 = vector.broadcast %330 : vector<1x256xi1> to vector<4x256xi1>
      %332 = vector.broadcast %cst_119 : f32 to vector<4x256xf32>
      %333 = arith.select %331, %327, %332 : vector<4x256xi1>, vector<4x256xf32>
      %c0_120 = arith.constant 0 : index
      %c20 = arith.constant 20 : index
      %334 = memref.load %arg2[%c0_120, %c20] : memref<2x49xf32, #tpu.memory_space<smem>>
      %c1_121 = arith.constant 1 : index
      %c20_122 = arith.constant 20 : index
      %335 = memref.load %arg2[%c1_121, %c20_122] : memref<2x49xf32, #tpu.memory_space<smem>>
      %336 = vector.broadcast %334 : f32 to vector<4x1xf32>
      %337 = vector.broadcast %335 : f32 to vector<4x1xf32>
      %338 = arith.select %24, %336, %337 : vector<4x1xi1>, vector<4x1xf32>
      %339 = vector.broadcast %338 : vector<4x1xf32> to vector<4x256xf32>
      %340 = arith.mulf %333, %339 : vector<4x256xf32>
      %341 = arith.addf %311, %340 : vector<4x256xf32>
      %c3_i32_123 = arith.constant 3 : i32
      %342 = tpu.dynamic_rotate %19 by %c3_i32_123 dim 1 : vector<4x256xf32>, i32 -> vector<4x256xf32>
      %c3_i32_124 = arith.constant 3 : i32
      %343 = vector.broadcast %c3_i32_124 : i32 to vector<1x256xi32>
      %344 = arith.cmpi sge, %21, %343 : vector<1x256xi32>
      %cst_125 = arith.constant 0.000000e+00 : f32
      %345 = vector.shape_cast %344 : vector<1x256xi1> to vector<1x256xi1>
      %346 = vector.broadcast %345 : vector<1x256xi1> to vector<4x256xi1>
      %347 = vector.broadcast %cst_125 : f32 to vector<4x256xf32>
      %348 = arith.select %346, %342, %347 : vector<4x256xi1>, vector<4x256xf32>
      %c0_126 = arith.constant 0 : index
      %c21 = arith.constant 21 : index
      %349 = memref.load %arg2[%c0_126, %c21] : memref<2x49xf32, #tpu.memory_space<smem>>
      %c1_127 = arith.constant 1 : index
      %c21_128 = arith.constant 21 : index
      %350 = memref.load %arg2[%c1_127, %c21_128] : memref<2x49xf32, #tpu.memory_space<smem>>
      %351 = vector.broadcast %349 : f32 to vector<4x1xf32>
      %352 = vector.broadcast %350 : f32 to vector<4x1xf32>
      %353 = arith.select %24, %351, %352 : vector<4x1xi1>, vector<4x1xf32>
      %354 = vector.broadcast %353 : vector<4x1xf32> to vector<4x256xf32>
      %355 = arith.mulf %348, %354 : vector<4x256xf32>
      %356 = arith.addf %326, %355 : vector<4x256xf32>
      %c2_i32_129 = arith.constant 2 : i32
      %357 = tpu.dynamic_rotate %19 by %c2_i32_129 dim 1 : vector<4x256xf32>, i32 -> vector<4x256xf32>
      %c2_i32_130 = arith.constant 2 : i32
      %358 = vector.broadcast %c2_i32_130 : i32 to vector<1x256xi32>
      %359 = arith.cmpi sge, %21, %358 : vector<1x256xi32>
      %cst_131 = arith.constant 0.000000e+00 : f32
      %360 = vector.shape_cast %359 : vector<1x256xi1> to vector<1x256xi1>
      %361 = vector.broadcast %360 : vector<1x256xi1> to vector<4x256xi1>
      %362 = vector.broadcast %cst_131 : f32 to vector<4x256xf32>
      %363 = arith.select %361, %357, %362 : vector<4x256xi1>, vector<4x256xf32>
      %c0_132 = arith.constant 0 : index
      %c22 = arith.constant 22 : index
      %364 = memref.load %arg2[%c0_132, %c22] : memref<2x49xf32, #tpu.memory_space<smem>>
      %c1_133 = arith.constant 1 : index
      %c22_134 = arith.constant 22 : index
      %365 = memref.load %arg2[%c1_133, %c22_134] : memref<2x49xf32, #tpu.memory_space<smem>>
      %366 = vector.broadcast %364 : f32 to vector<4x1xf32>
      %367 = vector.broadcast %365 : f32 to vector<4x1xf32>
      %368 = arith.select %24, %366, %367 : vector<4x1xi1>, vector<4x1xf32>
      %369 = vector.broadcast %368 : vector<4x1xf32> to vector<4x256xf32>
      %370 = arith.mulf %363, %369 : vector<4x256xf32>
      %371 = arith.addf %341, %370 : vector<4x256xf32>
      %c1_i32_135 = arith.constant 1 : i32
      %372 = tpu.dynamic_rotate %19 by %c1_i32_135 dim 1 : vector<4x256xf32>, i32 -> vector<4x256xf32>
      %c1_i32_136 = arith.constant 1 : i32
      %373 = vector.broadcast %c1_i32_136 : i32 to vector<1x256xi32>
      %374 = arith.cmpi sge, %21, %373 : vector<1x256xi32>
      %cst_137 = arith.constant 0.000000e+00 : f32
      %375 = vector.shape_cast %374 : vector<1x256xi1> to vector<1x256xi1>
      %376 = vector.broadcast %375 : vector<1x256xi1> to vector<4x256xi1>
      %377 = vector.broadcast %cst_137 : f32 to vector<4x256xf32>
      %378 = arith.select %376, %372, %377 : vector<4x256xi1>, vector<4x256xf32>
      %c0_138 = arith.constant 0 : index
      %c23 = arith.constant 23 : index
      %379 = memref.load %arg2[%c0_138, %c23] : memref<2x49xf32, #tpu.memory_space<smem>>
      %c1_139 = arith.constant 1 : index
      %c23_140 = arith.constant 23 : index
      %380 = memref.load %arg2[%c1_139, %c23_140] : memref<2x49xf32, #tpu.memory_space<smem>>
      %381 = vector.broadcast %379 : f32 to vector<4x1xf32>
      %382 = vector.broadcast %380 : f32 to vector<4x1xf32>
      %383 = arith.select %24, %381, %382 : vector<4x1xi1>, vector<4x1xf32>
      %384 = vector.broadcast %383 : vector<4x1xf32> to vector<4x256xf32>
      %385 = arith.mulf %378, %384 : vector<4x256xf32>
      %386 = arith.addf %356, %385 : vector<4x256xf32>
      %c0_141 = arith.constant 0 : index
      %c24 = arith.constant 24 : index
      %387 = memref.load %arg2[%c0_141, %c24] : memref<2x49xf32, #tpu.memory_space<smem>>
      %c1_142 = arith.constant 1 : index
      %c24_143 = arith.constant 24 : index
      %388 = memref.load %arg2[%c1_142, %c24_143] : memref<2x49xf32, #tpu.memory_space<smem>>
      %389 = vector.broadcast %387 : f32 to vector<4x1xf32>
      %390 = vector.broadcast %388 : f32 to vector<4x1xf32>
      %391 = arith.select %24, %389, %390 : vector<4x1xi1>, vector<4x1xf32>
      %392 = vector.broadcast %391 : vector<4x1xf32> to vector<4x256xf32>
      %393 = arith.mulf %19, %392 : vector<4x256xf32>
      %394 = arith.addf %371, %393 : vector<4x256xf32>
      %c255_i32 = arith.constant 255 : i32
      %395 = tpu.dynamic_rotate %19 by %c255_i32 dim 1 : vector<4x256xf32>, i32 -> vector<4x256xf32>
      %c15_i32_144 = arith.constant 15 : i32
      %396 = vector.broadcast %c15_i32_144 : i32 to vector<1x256xi32>
      %397 = arith.cmpi slt, %21, %396 : vector<1x256xi32>
      %cst_145 = arith.constant 0.000000e+00 : f32
      %398 = vector.shape_cast %397 : vector<1x256xi1> to vector<1x256xi1>
      %399 = vector.broadcast %398 : vector<1x256xi1> to vector<4x256xi1>
      %400 = vector.broadcast %cst_145 : f32 to vector<4x256xf32>
      %401 = arith.select %399, %395, %400 : vector<4x256xi1>, vector<4x256xf32>
      %c0_146 = arith.constant 0 : index
      %c25 = arith.constant 25 : index
      %402 = memref.load %arg2[%c0_146, %c25] : memref<2x49xf32, #tpu.memory_space<smem>>
      %c1_147 = arith.constant 1 : index
      %c25_148 = arith.constant 25 : index
      %403 = memref.load %arg2[%c1_147, %c25_148] : memref<2x49xf32, #tpu.memory_space<smem>>
      %404 = vector.broadcast %402 : f32 to vector<4x1xf32>
      %405 = vector.broadcast %403 : f32 to vector<4x1xf32>
      %406 = arith.select %24, %404, %405 : vector<4x1xi1>, vector<4x1xf32>
      %407 = vector.broadcast %406 : vector<4x1xf32> to vector<4x256xf32>
      %408 = arith.mulf %401, %407 : vector<4x256xf32>
      %409 = arith.addf %386, %408 : vector<4x256xf32>
      %c254_i32 = arith.constant 254 : i32
      %410 = tpu.dynamic_rotate %19 by %c254_i32 dim 1 : vector<4x256xf32>, i32 -> vector<4x256xf32>
      %c14_i32_149 = arith.constant 14 : i32
      %411 = vector.broadcast %c14_i32_149 : i32 to vector<1x256xi32>
      %412 = arith.cmpi slt, %21, %411 : vector<1x256xi32>
      %cst_150 = arith.constant 0.000000e+00 : f32
      %413 = vector.shape_cast %412 : vector<1x256xi1> to vector<1x256xi1>
      %414 = vector.broadcast %413 : vector<1x256xi1> to vector<4x256xi1>
      %415 = vector.broadcast %cst_150 : f32 to vector<4x256xf32>
      %416 = arith.select %414, %410, %415 : vector<4x256xi1>, vector<4x256xf32>
      %c0_151 = arith.constant 0 : index
      %c26 = arith.constant 26 : index
      %417 = memref.load %arg2[%c0_151, %c26] : memref<2x49xf32, #tpu.memory_space<smem>>
      %c1_152 = arith.constant 1 : index
      %c26_153 = arith.constant 26 : index
      %418 = memref.load %arg2[%c1_152, %c26_153] : memref<2x49xf32, #tpu.memory_space<smem>>
      %419 = vector.broadcast %417 : f32 to vector<4x1xf32>
      %420 = vector.broadcast %418 : f32 to vector<4x1xf32>
      %421 = arith.select %24, %419, %420 : vector<4x1xi1>, vector<4x1xf32>
      %422 = vector.broadcast %421 : vector<4x1xf32> to vector<4x256xf32>
      %423 = arith.mulf %416, %422 : vector<4x256xf32>
      %424 = arith.addf %394, %423 : vector<4x256xf32>
      %c253_i32 = arith.constant 253 : i32
      %425 = tpu.dynamic_rotate %19 by %c253_i32 dim 1 : vector<4x256xf32>, i32 -> vector<4x256xf32>
      %c13_i32_154 = arith.constant 13 : i32
      %426 = vector.broadcast %c13_i32_154 : i32 to vector<1x256xi32>
      %427 = arith.cmpi slt, %21, %426 : vector<1x256xi32>
      %cst_155 = arith.constant 0.000000e+00 : f32
      %428 = vector.shape_cast %427 : vector<1x256xi1> to vector<1x256xi1>
      %429 = vector.broadcast %428 : vector<1x256xi1> to vector<4x256xi1>
      %430 = vector.broadcast %cst_155 : f32 to vector<4x256xf32>
      %431 = arith.select %429, %425, %430 : vector<4x256xi1>, vector<4x256xf32>
      %c0_156 = arith.constant 0 : index
      %c27 = arith.constant 27 : index
      %432 = memref.load %arg2[%c0_156, %c27] : memref<2x49xf32, #tpu.memory_space<smem>>
      %c1_157 = arith.constant 1 : index
      %c27_158 = arith.constant 27 : index
      %433 = memref.load %arg2[%c1_157, %c27_158] : memref<2x49xf32, #tpu.memory_space<smem>>
      %434 = vector.broadcast %432 : f32 to vector<4x1xf32>
      %435 = vector.broadcast %433 : f32 to vector<4x1xf32>
      %436 = arith.select %24, %434, %435 : vector<4x1xi1>, vector<4x1xf32>
      %437 = vector.broadcast %436 : vector<4x1xf32> to vector<4x256xf32>
      %438 = arith.mulf %431, %437 : vector<4x256xf32>
      %439 = arith.addf %409, %438 : vector<4x256xf32>
      %c16_i32_159 = arith.constant 16 : i32
      %440 = vector.broadcast %c16_i32_159 : i32 to vector<1x256xi32>
      %441 = arith.cmpi sge, %20, %440 : vector<1x256xi32>
      %cst_160 = arith.constant 0.000000e+00 : f32
      %442 = vector.shape_cast %441 : vector<1x256xi1> to vector<1x256xi1>
      %443 = vector.broadcast %442 : vector<1x256xi1> to vector<4x256xi1>
      %444 = vector.broadcast %cst_160 : f32 to vector<4x256xf32>
      %445 = arith.select %443, %19, %444 : vector<4x256xi1>, vector<4x256xf32>
      %c243_i32 = arith.constant 243 : i32
      %446 = tpu.dynamic_rotate %445 by %c243_i32 dim 1 : vector<4x256xf32>, i32 -> vector<4x256xf32>
      %c3_i32_161 = arith.constant 3 : i32
      %447 = vector.broadcast %c3_i32_161 : i32 to vector<1x256xi32>
      %448 = arith.cmpi sge, %21, %447 : vector<1x256xi32>
      %cst_162 = arith.constant 0.000000e+00 : f32
      %449 = vector.shape_cast %448 : vector<1x256xi1> to vector<1x256xi1>
      %450 = vector.broadcast %449 : vector<1x256xi1> to vector<4x256xi1>
      %451 = vector.broadcast %cst_162 : f32 to vector<4x256xf32>
      %452 = arith.select %450, %446, %451 : vector<4x256xi1>, vector<4x256xf32>
      %c0_163 = arith.constant 0 : index
      %c28 = arith.constant 28 : index
      %453 = memref.load %arg2[%c0_163, %c28] : memref<2x49xf32, #tpu.memory_space<smem>>
      %c1_164 = arith.constant 1 : index
      %c28_165 = arith.constant 28 : index
      %454 = memref.load %arg2[%c1_164, %c28_165] : memref<2x49xf32, #tpu.memory_space<smem>>
      %455 = vector.broadcast %453 : f32 to vector<4x1xf32>
      %456 = vector.broadcast %454 : f32 to vector<4x1xf32>
      %457 = arith.select %24, %455, %456 : vector<4x1xi1>, vector<4x1xf32>
      %458 = vector.broadcast %457 : vector<4x1xf32> to vector<4x256xf32>
      %459 = arith.mulf %452, %458 : vector<4x256xf32>
      %460 = arith.addf %424, %459 : vector<4x256xf32>
      %c242_i32 = arith.constant 242 : i32
      %461 = tpu.dynamic_rotate %445 by %c242_i32 dim 1 : vector<4x256xf32>, i32 -> vector<4x256xf32>
      %c2_i32_166 = arith.constant 2 : i32
      %462 = vector.broadcast %c2_i32_166 : i32 to vector<1x256xi32>
      %463 = arith.cmpi sge, %21, %462 : vector<1x256xi32>
      %cst_167 = arith.constant 0.000000e+00 : f32
      %464 = vector.shape_cast %463 : vector<1x256xi1> to vector<1x256xi1>
      %465 = vector.broadcast %464 : vector<1x256xi1> to vector<4x256xi1>
      %466 = vector.broadcast %cst_167 : f32 to vector<4x256xf32>
      %467 = arith.select %465, %461, %466 : vector<4x256xi1>, vector<4x256xf32>
      %c0_168 = arith.constant 0 : index
      %c29 = arith.constant 29 : index
      %468 = memref.load %arg2[%c0_168, %c29] : memref<2x49xf32, #tpu.memory_space<smem>>
      %c1_169 = arith.constant 1 : index
      %c29_170 = arith.constant 29 : index
      %469 = memref.load %arg2[%c1_169, %c29_170] : memref<2x49xf32, #tpu.memory_space<smem>>
      %470 = vector.broadcast %468 : f32 to vector<4x1xf32>
      %471 = vector.broadcast %469 : f32 to vector<4x1xf32>
      %472 = arith.select %24, %470, %471 : vector<4x1xi1>, vector<4x1xf32>
      %473 = vector.broadcast %472 : vector<4x1xf32> to vector<4x256xf32>
      %474 = arith.mulf %467, %473 : vector<4x256xf32>
      %475 = arith.addf %439, %474 : vector<4x256xf32>
      %c241_i32 = arith.constant 241 : i32
      %476 = tpu.dynamic_rotate %445 by %c241_i32 dim 1 : vector<4x256xf32>, i32 -> vector<4x256xf32>
      %c1_i32_171 = arith.constant 1 : i32
      %477 = vector.broadcast %c1_i32_171 : i32 to vector<1x256xi32>
      %478 = arith.cmpi sge, %21, %477 : vector<1x256xi32>
      %cst_172 = arith.constant 0.000000e+00 : f32
      %479 = vector.shape_cast %478 : vector<1x256xi1> to vector<1x256xi1>
      %480 = vector.broadcast %479 : vector<1x256xi1> to vector<4x256xi1>
      %481 = vector.broadcast %cst_172 : f32 to vector<4x256xf32>
      %482 = arith.select %480, %476, %481 : vector<4x256xi1>, vector<4x256xf32>
      %c0_173 = arith.constant 0 : index
      %c30 = arith.constant 30 : index
      %483 = memref.load %arg2[%c0_173, %c30] : memref<2x49xf32, #tpu.memory_space<smem>>
      %c1_174 = arith.constant 1 : index
      %c30_175 = arith.constant 30 : index
      %484 = memref.load %arg2[%c1_174, %c30_175] : memref<2x49xf32, #tpu.memory_space<smem>>
      %485 = vector.broadcast %483 : f32 to vector<4x1xf32>
      %486 = vector.broadcast %484 : f32 to vector<4x1xf32>
      %487 = arith.select %24, %485, %486 : vector<4x1xi1>, vector<4x1xf32>
      %488 = vector.broadcast %487 : vector<4x1xf32> to vector<4x256xf32>
      %489 = arith.mulf %482, %488 : vector<4x256xf32>
      %490 = arith.addf %460, %489 : vector<4x256xf32>
      %c240_i32_176 = arith.constant 240 : i32
      %491 = tpu.dynamic_rotate %445 by %c240_i32_176 dim 1 : vector<4x256xf32>, i32 -> vector<4x256xf32>
      %c0_177 = arith.constant 0 : index
      %c31 = arith.constant 31 : index
      %492 = memref.load %arg2[%c0_177, %c31] : memref<2x49xf32, #tpu.memory_space<smem>>
      %c1_178 = arith.constant 1 : index
      %c31_179 = arith.constant 31 : index
      %493 = memref.load %arg2[%c1_178, %c31_179] : memref<2x49xf32, #tpu.memory_space<smem>>
      %494 = vector.broadcast %492 : f32 to vector<4x1xf32>
      %495 = vector.broadcast %493 : f32 to vector<4x1xf32>
      %496 = arith.select %24, %494, %495 : vector<4x1xi1>, vector<4x1xf32>
      %497 = vector.broadcast %496 : vector<4x1xf32> to vector<4x256xf32>
      %498 = arith.mulf %491, %497 : vector<4x256xf32>
      %499 = arith.addf %475, %498 : vector<4x256xf32>
      %c239_i32 = arith.constant 239 : i32
      %500 = tpu.dynamic_rotate %445 by %c239_i32 dim 1 : vector<4x256xf32>, i32 -> vector<4x256xf32>
      %c15_i32_180 = arith.constant 15 : i32
      %501 = vector.broadcast %c15_i32_180 : i32 to vector<1x256xi32>
      %502 = arith.cmpi slt, %21, %501 : vector<1x256xi32>
      %cst_181 = arith.constant 0.000000e+00 : f32
      %503 = vector.shape_cast %502 : vector<1x256xi1> to vector<1x256xi1>
      %504 = vector.broadcast %503 : vector<1x256xi1> to vector<4x256xi1>
      %505 = vector.broadcast %cst_181 : f32 to vector<4x256xf32>
      %506 = arith.select %504, %500, %505 : vector<4x256xi1>, vector<4x256xf32>
      %c0_182 = arith.constant 0 : index
      %c32 = arith.constant 32 : index
      %507 = memref.load %arg2[%c0_182, %c32] : memref<2x49xf32, #tpu.memory_space<smem>>
      %c1_183 = arith.constant 1 : index
      %c32_184 = arith.constant 32 : index
      %508 = memref.load %arg2[%c1_183, %c32_184] : memref<2x49xf32, #tpu.memory_space<smem>>
      %509 = vector.broadcast %507 : f32 to vector<4x1xf32>
      %510 = vector.broadcast %508 : f32 to vector<4x1xf32>
      %511 = arith.select %24, %509, %510 : vector<4x1xi1>, vector<4x1xf32>
      %512 = vector.broadcast %511 : vector<4x1xf32> to vector<4x256xf32>
      %513 = arith.mulf %506, %512 : vector<4x256xf32>
      %514 = arith.addf %490, %513 : vector<4x256xf32>
      %c238_i32 = arith.constant 238 : i32
      %515 = tpu.dynamic_rotate %445 by %c238_i32 dim 1 : vector<4x256xf32>, i32 -> vector<4x256xf32>
      %c14_i32_185 = arith.constant 14 : i32
      %516 = vector.broadcast %c14_i32_185 : i32 to vector<1x256xi32>
      %517 = arith.cmpi slt, %21, %516 : vector<1x256xi32>
      %cst_186 = arith.constant 0.000000e+00 : f32
      %518 = vector.shape_cast %517 : vector<1x256xi1> to vector<1x256xi1>
      %519 = vector.broadcast %518 : vector<1x256xi1> to vector<4x256xi1>
      %520 = vector.broadcast %cst_186 : f32 to vector<4x256xf32>
      %521 = arith.select %519, %515, %520 : vector<4x256xi1>, vector<4x256xf32>
      %c0_187 = arith.constant 0 : index
      %c33 = arith.constant 33 : index
      %522 = memref.load %arg2[%c0_187, %c33] : memref<2x49xf32, #tpu.memory_space<smem>>
      %c1_188 = arith.constant 1 : index
      %c33_189 = arith.constant 33 : index
      %523 = memref.load %arg2[%c1_188, %c33_189] : memref<2x49xf32, #tpu.memory_space<smem>>
      %524 = vector.broadcast %522 : f32 to vector<4x1xf32>
      %525 = vector.broadcast %523 : f32 to vector<4x1xf32>
      %526 = arith.select %24, %524, %525 : vector<4x1xi1>, vector<4x1xf32>
      %527 = vector.broadcast %526 : vector<4x1xf32> to vector<4x256xf32>
      %528 = arith.mulf %521, %527 : vector<4x256xf32>
      %529 = arith.addf %499, %528 : vector<4x256xf32>
      %c237_i32 = arith.constant 237 : i32
      %530 = tpu.dynamic_rotate %445 by %c237_i32 dim 1 : vector<4x256xf32>, i32 -> vector<4x256xf32>
      %c13_i32_190 = arith.constant 13 : i32
      %531 = vector.broadcast %c13_i32_190 : i32 to vector<1x256xi32>
      %532 = arith.cmpi slt, %21, %531 : vector<1x256xi32>
      %cst_191 = arith.constant 0.000000e+00 : f32
      %533 = vector.shape_cast %532 : vector<1x256xi1> to vector<1x256xi1>
      %534 = vector.broadcast %533 : vector<1x256xi1> to vector<4x256xi1>
      %535 = vector.broadcast %cst_191 : f32 to vector<4x256xf32>
      %536 = arith.select %534, %530, %535 : vector<4x256xi1>, vector<4x256xf32>
      %c0_192 = arith.constant 0 : index
      %c34 = arith.constant 34 : index
      %537 = memref.load %arg2[%c0_192, %c34] : memref<2x49xf32, #tpu.memory_space<smem>>
      %c1_193 = arith.constant 1 : index
      %c34_194 = arith.constant 34 : index
      %538 = memref.load %arg2[%c1_193, %c34_194] : memref<2x49xf32, #tpu.memory_space<smem>>
      %539 = vector.broadcast %537 : f32 to vector<4x1xf32>
      %540 = vector.broadcast %538 : f32 to vector<4x1xf32>
      %541 = arith.select %24, %539, %540 : vector<4x1xi1>, vector<4x1xf32>
      %542 = vector.broadcast %541 : vector<4x1xf32> to vector<4x256xf32>
      %543 = arith.mulf %536, %542 : vector<4x256xf32>
      %544 = arith.addf %514, %543 : vector<4x256xf32>
      %c32_i32_195 = arith.constant 32 : i32
      %545 = vector.broadcast %c32_i32_195 : i32 to vector<1x256xi32>
      %546 = arith.cmpi sge, %20, %545 : vector<1x256xi32>
      %cst_196 = arith.constant 0.000000e+00 : f32
      %547 = vector.shape_cast %546 : vector<1x256xi1> to vector<1x256xi1>
      %548 = vector.broadcast %547 : vector<1x256xi1> to vector<4x256xi1>
      %549 = vector.broadcast %cst_196 : f32 to vector<4x256xf32>
      %550 = arith.select %548, %19, %549 : vector<4x256xi1>, vector<4x256xf32>
      %c227_i32 = arith.constant 227 : i32
      %551 = tpu.dynamic_rotate %550 by %c227_i32 dim 1 : vector<4x256xf32>, i32 -> vector<4x256xf32>
      %c3_i32_197 = arith.constant 3 : i32
      %552 = vector.broadcast %c3_i32_197 : i32 to vector<1x256xi32>
      %553 = arith.cmpi sge, %21, %552 : vector<1x256xi32>
      %cst_198 = arith.constant 0.000000e+00 : f32
      %554 = vector.shape_cast %553 : vector<1x256xi1> to vector<1x256xi1>
      %555 = vector.broadcast %554 : vector<1x256xi1> to vector<4x256xi1>
      %556 = vector.broadcast %cst_198 : f32 to vector<4x256xf32>
      %557 = arith.select %555, %551, %556 : vector<4x256xi1>, vector<4x256xf32>
      %c0_199 = arith.constant 0 : index
      %c35 = arith.constant 35 : index
      %558 = memref.load %arg2[%c0_199, %c35] : memref<2x49xf32, #tpu.memory_space<smem>>
      %c1_200 = arith.constant 1 : index
      %c35_201 = arith.constant 35 : index
      %559 = memref.load %arg2[%c1_200, %c35_201] : memref<2x49xf32, #tpu.memory_space<smem>>
      %560 = vector.broadcast %558 : f32 to vector<4x1xf32>
      %561 = vector.broadcast %559 : f32 to vector<4x1xf32>
      %562 = arith.select %24, %560, %561 : vector<4x1xi1>, vector<4x1xf32>
      %563 = vector.broadcast %562 : vector<4x1xf32> to vector<4x256xf32>
      %564 = arith.mulf %557, %563 : vector<4x256xf32>
      %565 = arith.addf %529, %564 : vector<4x256xf32>
      %c226_i32 = arith.constant 226 : i32
      %566 = tpu.dynamic_rotate %550 by %c226_i32 dim 1 : vector<4x256xf32>, i32 -> vector<4x256xf32>
      %c2_i32_202 = arith.constant 2 : i32
      %567 = vector.broadcast %c2_i32_202 : i32 to vector<1x256xi32>
      %568 = arith.cmpi sge, %21, %567 : vector<1x256xi32>
      %cst_203 = arith.constant 0.000000e+00 : f32
      %569 = vector.shape_cast %568 : vector<1x256xi1> to vector<1x256xi1>
      %570 = vector.broadcast %569 : vector<1x256xi1> to vector<4x256xi1>
      %571 = vector.broadcast %cst_203 : f32 to vector<4x256xf32>
      %572 = arith.select %570, %566, %571 : vector<4x256xi1>, vector<4x256xf32>
      %c0_204 = arith.constant 0 : index
      %c36 = arith.constant 36 : index
      %573 = memref.load %arg2[%c0_204, %c36] : memref<2x49xf32, #tpu.memory_space<smem>>
      %c1_205 = arith.constant 1 : index
      %c36_206 = arith.constant 36 : index
      %574 = memref.load %arg2[%c1_205, %c36_206] : memref<2x49xf32, #tpu.memory_space<smem>>
      %575 = vector.broadcast %573 : f32 to vector<4x1xf32>
      %576 = vector.broadcast %574 : f32 to vector<4x1xf32>
      %577 = arith.select %24, %575, %576 : vector<4x1xi1>, vector<4x1xf32>
      %578 = vector.broadcast %577 : vector<4x1xf32> to vector<4x256xf32>
      %579 = arith.mulf %572, %578 : vector<4x256xf32>
      %580 = arith.addf %544, %579 : vector<4x256xf32>
      %c225_i32 = arith.constant 225 : i32
      %581 = tpu.dynamic_rotate %550 by %c225_i32 dim 1 : vector<4x256xf32>, i32 -> vector<4x256xf32>
      %c1_i32_207 = arith.constant 1 : i32
      %582 = vector.broadcast %c1_i32_207 : i32 to vector<1x256xi32>
      %583 = arith.cmpi sge, %21, %582 : vector<1x256xi32>
      %cst_208 = arith.constant 0.000000e+00 : f32
      %584 = vector.shape_cast %583 : vector<1x256xi1> to vector<1x256xi1>
      %585 = vector.broadcast %584 : vector<1x256xi1> to vector<4x256xi1>
      %586 = vector.broadcast %cst_208 : f32 to vector<4x256xf32>
      %587 = arith.select %585, %581, %586 : vector<4x256xi1>, vector<4x256xf32>
      %c0_209 = arith.constant 0 : index
      %c37 = arith.constant 37 : index
      %588 = memref.load %arg2[%c0_209, %c37] : memref<2x49xf32, #tpu.memory_space<smem>>
      %c1_210 = arith.constant 1 : index
      %c37_211 = arith.constant 37 : index
      %589 = memref.load %arg2[%c1_210, %c37_211] : memref<2x49xf32, #tpu.memory_space<smem>>
      %590 = vector.broadcast %588 : f32 to vector<4x1xf32>
      %591 = vector.broadcast %589 : f32 to vector<4x1xf32>
      %592 = arith.select %24, %590, %591 : vector<4x1xi1>, vector<4x1xf32>
      %593 = vector.broadcast %592 : vector<4x1xf32> to vector<4x256xf32>
      %594 = arith.mulf %587, %593 : vector<4x256xf32>
      %595 = arith.addf %565, %594 : vector<4x256xf32>
      %c224_i32_212 = arith.constant 224 : i32
      %596 = tpu.dynamic_rotate %550 by %c224_i32_212 dim 1 : vector<4x256xf32>, i32 -> vector<4x256xf32>
      %c0_213 = arith.constant 0 : index
      %c38 = arith.constant 38 : index
      %597 = memref.load %arg2[%c0_213, %c38] : memref<2x49xf32, #tpu.memory_space<smem>>
      %c1_214 = arith.constant 1 : index
      %c38_215 = arith.constant 38 : index
      %598 = memref.load %arg2[%c1_214, %c38_215] : memref<2x49xf32, #tpu.memory_space<smem>>
      %599 = vector.broadcast %597 : f32 to vector<4x1xf32>
      %600 = vector.broadcast %598 : f32 to vector<4x1xf32>
      %601 = arith.select %24, %599, %600 : vector<4x1xi1>, vector<4x1xf32>
      %602 = vector.broadcast %601 : vector<4x1xf32> to vector<4x256xf32>
      %603 = arith.mulf %596, %602 : vector<4x256xf32>
      %604 = arith.addf %580, %603 : vector<4x256xf32>
      %c223_i32 = arith.constant 223 : i32
      %605 = tpu.dynamic_rotate %550 by %c223_i32 dim 1 : vector<4x256xf32>, i32 -> vector<4x256xf32>
      %c15_i32_216 = arith.constant 15 : i32
      %606 = vector.broadcast %c15_i32_216 : i32 to vector<1x256xi32>
      %607 = arith.cmpi slt, %21, %606 : vector<1x256xi32>
      %cst_217 = arith.constant 0.000000e+00 : f32
      %608 = vector.shape_cast %607 : vector<1x256xi1> to vector<1x256xi1>
      %609 = vector.broadcast %608 : vector<1x256xi1> to vector<4x256xi1>
      %610 = vector.broadcast %cst_217 : f32 to vector<4x256xf32>
      %611 = arith.select %609, %605, %610 : vector<4x256xi1>, vector<4x256xf32>
      %c0_218 = arith.constant 0 : index
      %c39 = arith.constant 39 : index
      %612 = memref.load %arg2[%c0_218, %c39] : memref<2x49xf32, #tpu.memory_space<smem>>
      %c1_219 = arith.constant 1 : index
      %c39_220 = arith.constant 39 : index
      %613 = memref.load %arg2[%c1_219, %c39_220] : memref<2x49xf32, #tpu.memory_space<smem>>
      %614 = vector.broadcast %612 : f32 to vector<4x1xf32>
      %615 = vector.broadcast %613 : f32 to vector<4x1xf32>
      %616 = arith.select %24, %614, %615 : vector<4x1xi1>, vector<4x1xf32>
      %617 = vector.broadcast %616 : vector<4x1xf32> to vector<4x256xf32>
      %618 = arith.mulf %611, %617 : vector<4x256xf32>
      %619 = arith.addf %595, %618 : vector<4x256xf32>
      %c222_i32 = arith.constant 222 : i32
      %620 = tpu.dynamic_rotate %550 by %c222_i32 dim 1 : vector<4x256xf32>, i32 -> vector<4x256xf32>
      %c14_i32_221 = arith.constant 14 : i32
      %621 = vector.broadcast %c14_i32_221 : i32 to vector<1x256xi32>
      %622 = arith.cmpi slt, %21, %621 : vector<1x256xi32>
      %cst_222 = arith.constant 0.000000e+00 : f32
      %623 = vector.shape_cast %622 : vector<1x256xi1> to vector<1x256xi1>
      %624 = vector.broadcast %623 : vector<1x256xi1> to vector<4x256xi1>
      %625 = vector.broadcast %cst_222 : f32 to vector<4x256xf32>
      %626 = arith.select %624, %620, %625 : vector<4x256xi1>, vector<4x256xf32>
      %c0_223 = arith.constant 0 : index
      %c40 = arith.constant 40 : index
      %627 = memref.load %arg2[%c0_223, %c40] : memref<2x49xf32, #tpu.memory_space<smem>>
      %c1_224 = arith.constant 1 : index
      %c40_225 = arith.constant 40 : index
      %628 = memref.load %arg2[%c1_224, %c40_225] : memref<2x49xf32, #tpu.memory_space<smem>>
      %629 = vector.broadcast %627 : f32 to vector<4x1xf32>
      %630 = vector.broadcast %628 : f32 to vector<4x1xf32>
      %631 = arith.select %24, %629, %630 : vector<4x1xi1>, vector<4x1xf32>
      %632 = vector.broadcast %631 : vector<4x1xf32> to vector<4x256xf32>
      %633 = arith.mulf %626, %632 : vector<4x256xf32>
      %634 = arith.addf %604, %633 : vector<4x256xf32>
      %c221_i32 = arith.constant 221 : i32
      %635 = tpu.dynamic_rotate %550 by %c221_i32 dim 1 : vector<4x256xf32>, i32 -> vector<4x256xf32>
      %c13_i32_226 = arith.constant 13 : i32
      %636 = vector.broadcast %c13_i32_226 : i32 to vector<1x256xi32>
      %637 = arith.cmpi slt, %21, %636 : vector<1x256xi32>
      %cst_227 = arith.constant 0.000000e+00 : f32
      %638 = vector.shape_cast %637 : vector<1x256xi1> to vector<1x256xi1>
      %639 = vector.broadcast %638 : vector<1x256xi1> to vector<4x256xi1>
      %640 = vector.broadcast %cst_227 : f32 to vector<4x256xf32>
      %641 = arith.select %639, %635, %640 : vector<4x256xi1>, vector<4x256xf32>
      %c0_228 = arith.constant 0 : index
      %c41 = arith.constant 41 : index
      %642 = memref.load %arg2[%c0_228, %c41] : memref<2x49xf32, #tpu.memory_space<smem>>
      %c1_229 = arith.constant 1 : index
      %c41_230 = arith.constant 41 : index
      %643 = memref.load %arg2[%c1_229, %c41_230] : memref<2x49xf32, #tpu.memory_space<smem>>
      %644 = vector.broadcast %642 : f32 to vector<4x1xf32>
      %645 = vector.broadcast %643 : f32 to vector<4x1xf32>
      %646 = arith.select %24, %644, %645 : vector<4x1xi1>, vector<4x1xf32>
      %647 = vector.broadcast %646 : vector<4x1xf32> to vector<4x256xf32>
      %648 = arith.mulf %641, %647 : vector<4x256xf32>
      %649 = arith.addf %619, %648 : vector<4x256xf32>
      %c48_i32_231 = arith.constant 48 : i32
      %650 = vector.broadcast %c48_i32_231 : i32 to vector<1x256xi32>
      %651 = arith.cmpi sge, %20, %650 : vector<1x256xi32>
      %cst_232 = arith.constant 0.000000e+00 : f32
      %652 = vector.shape_cast %651 : vector<1x256xi1> to vector<1x256xi1>
      %653 = vector.broadcast %652 : vector<1x256xi1> to vector<4x256xi1>
      %654 = vector.broadcast %cst_232 : f32 to vector<4x256xf32>
      %655 = arith.select %653, %19, %654 : vector<4x256xi1>, vector<4x256xf32>
      %c211_i32 = arith.constant 211 : i32
      %656 = tpu.dynamic_rotate %655 by %c211_i32 dim 1 : vector<4x256xf32>, i32 -> vector<4x256xf32>
      %c3_i32_233 = arith.constant 3 : i32
      %657 = vector.broadcast %c3_i32_233 : i32 to vector<1x256xi32>
      %658 = arith.cmpi sge, %21, %657 : vector<1x256xi32>
      %cst_234 = arith.constant 0.000000e+00 : f32
      %659 = vector.shape_cast %658 : vector<1x256xi1> to vector<1x256xi1>
      %660 = vector.broadcast %659 : vector<1x256xi1> to vector<4x256xi1>
      %661 = vector.broadcast %cst_234 : f32 to vector<4x256xf32>
      %662 = arith.select %660, %656, %661 : vector<4x256xi1>, vector<4x256xf32>
      %c0_235 = arith.constant 0 : index
      %c42 = arith.constant 42 : index
      %663 = memref.load %arg2[%c0_235, %c42] : memref<2x49xf32, #tpu.memory_space<smem>>
      %c1_236 = arith.constant 1 : index
      %c42_237 = arith.constant 42 : index
      %664 = memref.load %arg2[%c1_236, %c42_237] : memref<2x49xf32, #tpu.memory_space<smem>>
      %665 = vector.broadcast %663 : f32 to vector<4x1xf32>
      %666 = vector.broadcast %664 : f32 to vector<4x1xf32>
      %667 = arith.select %24, %665, %666 : vector<4x1xi1>, vector<4x1xf32>
      %668 = vector.broadcast %667 : vector<4x1xf32> to vector<4x256xf32>
      %669 = arith.mulf %662, %668 : vector<4x256xf32>
      %670 = arith.addf %634, %669 : vector<4x256xf32>
      %c210_i32 = arith.constant 210 : i32
      %671 = tpu.dynamic_rotate %655 by %c210_i32 dim 1 : vector<4x256xf32>, i32 -> vector<4x256xf32>
      %c2_i32_238 = arith.constant 2 : i32
      %672 = vector.broadcast %c2_i32_238 : i32 to vector<1x256xi32>
      %673 = arith.cmpi sge, %21, %672 : vector<1x256xi32>
      %cst_239 = arith.constant 0.000000e+00 : f32
      %674 = vector.shape_cast %673 : vector<1x256xi1> to vector<1x256xi1>
      %675 = vector.broadcast %674 : vector<1x256xi1> to vector<4x256xi1>
      %676 = vector.broadcast %cst_239 : f32 to vector<4x256xf32>
      %677 = arith.select %675, %671, %676 : vector<4x256xi1>, vector<4x256xf32>
      %c0_240 = arith.constant 0 : index
      %c43 = arith.constant 43 : index
      %678 = memref.load %arg2[%c0_240, %c43] : memref<2x49xf32, #tpu.memory_space<smem>>
      %c1_241 = arith.constant 1 : index
      %c43_242 = arith.constant 43 : index
      %679 = memref.load %arg2[%c1_241, %c43_242] : memref<2x49xf32, #tpu.memory_space<smem>>
      %680 = vector.broadcast %678 : f32 to vector<4x1xf32>
      %681 = vector.broadcast %679 : f32 to vector<4x1xf32>
      %682 = arith.select %24, %680, %681 : vector<4x1xi1>, vector<4x1xf32>
      %683 = vector.broadcast %682 : vector<4x1xf32> to vector<4x256xf32>
      %684 = arith.mulf %677, %683 : vector<4x256xf32>
      %685 = arith.addf %649, %684 : vector<4x256xf32>
      %c209_i32 = arith.constant 209 : i32
      %686 = tpu.dynamic_rotate %655 by %c209_i32 dim 1 : vector<4x256xf32>, i32 -> vector<4x256xf32>
      %c1_i32_243 = arith.constant 1 : i32
      %687 = vector.broadcast %c1_i32_243 : i32 to vector<1x256xi32>
      %688 = arith.cmpi sge, %21, %687 : vector<1x256xi32>
      %cst_244 = arith.constant 0.000000e+00 : f32
      %689 = vector.shape_cast %688 : vector<1x256xi1> to vector<1x256xi1>
      %690 = vector.broadcast %689 : vector<1x256xi1> to vector<4x256xi1>
      %691 = vector.broadcast %cst_244 : f32 to vector<4x256xf32>
      %692 = arith.select %690, %686, %691 : vector<4x256xi1>, vector<4x256xf32>
      %c0_245 = arith.constant 0 : index
      %c44 = arith.constant 44 : index
      %693 = memref.load %arg2[%c0_245, %c44] : memref<2x49xf32, #tpu.memory_space<smem>>
      %c1_246 = arith.constant 1 : index
      %c44_247 = arith.constant 44 : index
      %694 = memref.load %arg2[%c1_246, %c44_247] : memref<2x49xf32, #tpu.memory_space<smem>>
      %695 = vector.broadcast %693 : f32 to vector<4x1xf32>
      %696 = vector.broadcast %694 : f32 to vector<4x1xf32>
      %697 = arith.select %24, %695, %696 : vector<4x1xi1>, vector<4x1xf32>
      %698 = vector.broadcast %697 : vector<4x1xf32> to vector<4x256xf32>
      %699 = arith.mulf %692, %698 : vector<4x256xf32>
      %700 = arith.addf %670, %699 : vector<4x256xf32>
      %c208_i32_248 = arith.constant 208 : i32
      %701 = tpu.dynamic_rotate %655 by %c208_i32_248 dim 1 : vector<4x256xf32>, i32 -> vector<4x256xf32>
      %c0_249 = arith.constant 0 : index
      %c45 = arith.constant 45 : index
      %702 = memref.load %arg2[%c0_249, %c45] : memref<2x49xf32, #tpu.memory_space<smem>>
      %c1_250 = arith.constant 1 : index
      %c45_251 = arith.constant 45 : index
      %703 = memref.load %arg2[%c1_250, %c45_251] : memref<2x49xf32, #tpu.memory_space<smem>>
      %704 = vector.broadcast %702 : f32 to vector<4x1xf32>
      %705 = vector.broadcast %703 : f32 to vector<4x1xf32>
      %706 = arith.select %24, %704, %705 : vector<4x1xi1>, vector<4x1xf32>
      %707 = vector.broadcast %706 : vector<4x1xf32> to vector<4x256xf32>
      %708 = arith.mulf %701, %707 : vector<4x256xf32>
      %709 = arith.addf %685, %708 : vector<4x256xf32>
      %c207_i32 = arith.constant 207 : i32
      %710 = tpu.dynamic_rotate %655 by %c207_i32 dim 1 : vector<4x256xf32>, i32 -> vector<4x256xf32>
      %c15_i32_252 = arith.constant 15 : i32
      %711 = vector.broadcast %c15_i32_252 : i32 to vector<1x256xi32>
      %712 = arith.cmpi slt, %21, %711 : vector<1x256xi32>
      %cst_253 = arith.constant 0.000000e+00 : f32
      %713 = vector.shape_cast %712 : vector<1x256xi1> to vector<1x256xi1>
      %714 = vector.broadcast %713 : vector<1x256xi1> to vector<4x256xi1>
      %715 = vector.broadcast %cst_253 : f32 to vector<4x256xf32>
      %716 = arith.select %714, %710, %715 : vector<4x256xi1>, vector<4x256xf32>
      %c0_254 = arith.constant 0 : index
      %c46 = arith.constant 46 : index
      %717 = memref.load %arg2[%c0_254, %c46] : memref<2x49xf32, #tpu.memory_space<smem>>
      %c1_255 = arith.constant 1 : index
      %c46_256 = arith.constant 46 : index
      %718 = memref.load %arg2[%c1_255, %c46_256] : memref<2x49xf32, #tpu.memory_space<smem>>
      %719 = vector.broadcast %717 : f32 to vector<4x1xf32>
      %720 = vector.broadcast %718 : f32 to vector<4x1xf32>
      %721 = arith.select %24, %719, %720 : vector<4x1xi1>, vector<4x1xf32>
      %722 = vector.broadcast %721 : vector<4x1xf32> to vector<4x256xf32>
      %723 = arith.mulf %716, %722 : vector<4x256xf32>
      %724 = arith.addf %700, %723 : vector<4x256xf32>
      %c206_i32 = arith.constant 206 : i32
      %725 = tpu.dynamic_rotate %655 by %c206_i32 dim 1 : vector<4x256xf32>, i32 -> vector<4x256xf32>
      %c14_i32_257 = arith.constant 14 : i32
      %726 = vector.broadcast %c14_i32_257 : i32 to vector<1x256xi32>
      %727 = arith.cmpi slt, %21, %726 : vector<1x256xi32>
      %cst_258 = arith.constant 0.000000e+00 : f32
      %728 = vector.shape_cast %727 : vector<1x256xi1> to vector<1x256xi1>
      %729 = vector.broadcast %728 : vector<1x256xi1> to vector<4x256xi1>
      %730 = vector.broadcast %cst_258 : f32 to vector<4x256xf32>
      %731 = arith.select %729, %725, %730 : vector<4x256xi1>, vector<4x256xf32>
      %c0_259 = arith.constant 0 : index
      %c47 = arith.constant 47 : index
      %732 = memref.load %arg2[%c0_259, %c47] : memref<2x49xf32, #tpu.memory_space<smem>>
      %c1_260 = arith.constant 1 : index
      %c47_261 = arith.constant 47 : index
      %733 = memref.load %arg2[%c1_260, %c47_261] : memref<2x49xf32, #tpu.memory_space<smem>>
      %734 = vector.broadcast %732 : f32 to vector<4x1xf32>
      %735 = vector.broadcast %733 : f32 to vector<4x1xf32>
      %736 = arith.select %24, %734, %735 : vector<4x1xi1>, vector<4x1xf32>
      %737 = vector.broadcast %736 : vector<4x1xf32> to vector<4x256xf32>
      %738 = arith.mulf %731, %737 : vector<4x256xf32>
      %739 = arith.addf %709, %738 : vector<4x256xf32>
      %c205_i32 = arith.constant 205 : i32
      %740 = tpu.dynamic_rotate %655 by %c205_i32 dim 1 : vector<4x256xf32>, i32 -> vector<4x256xf32>
      %c13_i32_262 = arith.constant 13 : i32
      %741 = vector.broadcast %c13_i32_262 : i32 to vector<1x256xi32>
      %742 = arith.cmpi slt, %21, %741 : vector<1x256xi32>
      %cst_263 = arith.constant 0.000000e+00 : f32
      %743 = vector.shape_cast %742 : vector<1x256xi1> to vector<1x256xi1>
      %744 = vector.broadcast %743 : vector<1x256xi1> to vector<4x256xi1>
      %745 = vector.broadcast %cst_263 : f32 to vector<4x256xf32>
      %746 = arith.select %744, %740, %745 : vector<4x256xi1>, vector<4x256xf32>
      %c0_264 = arith.constant 0 : index
      %c48 = arith.constant 48 : index
      %747 = memref.load %arg2[%c0_264, %c48] : memref<2x49xf32, #tpu.memory_space<smem>>
      %c1_265 = arith.constant 1 : index
      %c48_266 = arith.constant 48 : index
      %748 = memref.load %arg2[%c1_265, %c48_266] : memref<2x49xf32, #tpu.memory_space<smem>>
      %749 = vector.broadcast %747 : f32 to vector<4x1xf32>
      %750 = vector.broadcast %748 : f32 to vector<4x1xf32>
      %751 = arith.select %24, %749, %750 : vector<4x1xi1>, vector<4x1xf32>
      %752 = vector.broadcast %751 : vector<4x1xf32> to vector<4x256xf32>
      %753 = arith.mulf %746, %752 : vector<4x256xf32>
      %754 = arith.addf %724, %753 : vector<4x256xf32>
      %755 = arith.addf %754, %739 : vector<4x256xf32>
      %756 = vector.extract_strided_slice %755 {offsets = [0, 0], sizes = [2, 256], strides = [1, 1]} : vector<4x256xf32> to vector<2x256xf32>
      %757 = vector.extract_strided_slice %755 {offsets = [2, 0], sizes = [2, 256], strides = [1, 1]} : vector<4x256xf32> to vector<2x256xf32>
      %758 = arith.addf %756, %757 : vector<2x256xf32>
      %759 = arith.negf %758 : vector<2x256xf32>
      %760 = math.exp %759 : vector<2x256xf32>
      %cst_267 = arith.constant 1.000000e+00 : f32
      %761 = vector.broadcast %cst_267 : f32 to vector<2x256xf32>
      %762 = arith.addf %761, %760 : vector<2x256xf32>
      %763 = arith.divf %761, %762 : vector<2x256xf32>
      %c0_268 = arith.constant 0 : index
      %c0_269 = arith.constant 0 : index
      %c0_270 = arith.constant 0 : index
      %764 = vector.load %arg5[%c0_268, %c0_269, %c0_270] : memref<2x1x256xf32, #tpu.memory_space<vmem>>, vector<2x1x256xf32>
      %765 = vector.shape_cast %764 : vector<2x1x256xf32> to vector<2x256xf32>
      %766 = vector.shape_cast %763 : vector<2x256xf32> to vector<2x1x256xf32>
      tpu.vector_store %arg5[%c0_268, %c0_269, %c0_270], %766 {strides = array<i32>} : memref<2x1x256xf32, #tpu.memory_space<vmem>>, vector<2x1x256xf32>,
    } else {
    }
    return
  }
  func.func @transform_0(%arg0: i32, %arg1: i32) -> (i32, i32) {
    %c0_i32 = arith.constant 0 : i32
    %c0_i32_0 = arith.constant 0 : i32
    %c0_i32_1 = arith.constant 0 : i32
    return %c0_i32, %c0_i32_0 : i32, i32
  }
  func.func @transform_1(%arg0: i32, %arg1: i32) -> (i32, i32) {
    %c0_i32 = arith.constant 0 : i32
    %c0_i32_0 = arith.constant 0 : i32
    %c0_i32_1 = arith.constant 0 : i32
    return %c0_i32, %c0_i32_0 : i32, i32
  }
  func.func @transform_2(%arg0: i32, %arg1: i32) -> (i32, i32, i32) {
    %c0_i32 = arith.constant 0 : i32
    %c0_i32_0 = arith.constant 0 : i32
    return %arg0, %arg1, %c0_i32 : i32, i32, i32
  }
  func.func @transform_3(%arg0: i32, %arg1: i32) -> (i32, i32, i32) {
    %c0_i32 = arith.constant 0 : i32
    %c0_i32_0 = arith.constant 0 : i32
    %c0_i32_1 = arith.constant 0 : i32
    return %arg0, %c0_i32, %c0_i32_0 : i32, i32, i32
  }
}

</mosaic_0001>

<bundles_post_ra>
// kernel: tpu_custom_call.1
= control target key start
LH: loop header
LB: loop body
LE: loop exit
PB: predicated region body
PF: predicated region fallthrough
CT: control target
= control target key end

     0   :  { %8 = vsyncpa [#allocation6], 0  ;;  %s2779_s0 = inlined_call_operand.hbm [shape: f32[2,49], index: 0, kind: input, shape index: {}]   ;;  %s2780_s1 = inlined_call_operand.vmem [shape: s32[1,256], index: 1, kind: input, shape index: {}]   ;;  %s2781_s2 = inlined_call_operand.hbm [shape: f32[2,4,256], index: 2, kind: input, shape index: {}]   ;;  %s2782_s3 = inlined_call_operand.hbm [shape: f32[2,1,256], index: 3, kind: output, shape index: {}]  }
   0x1   :  { %9 = vsyncpa [#allocation4], 0 }
   0x2   :  { %10 = vsyncpa [#allocation5], 0  ;;  %s1406_s14 = scalar_lea.hbm %s2779_s0, 32 }
   0x3   :  { %p1407_p0 = scmp.ne.s32.totalorder %s2779_s0, %s1406_s14  ;;  %p1410_p1 = scmp.lt.u32.totalorder %s1406_s14, %s2779_s0 }
   0x5   :  { %p1412_p2 = pnand %p1410_p1, %p1407_p0 }
   0x7   :  { %1415 = shalt.err (!%p1412_p2)
}
   0x8   :  { %s1466_s19 = smov [#allocation3]   ;;  %s1467_s22 = smov [#allocation7]  }
   0x9   :  { %18 = dma.hbm_to_smem %s2779_s0, 32, %s1466_s19, [#allocation6]  }
   0xa   :  { %s26_s23 = sshll.u32 %s1467_s22, 4  ;;  %s1416_s26 = scalar_lea.hbm %s2781_s2, 256  ;;  %s27_s23 = int_to_ptr.vmem [resolvable:$true] %s26_s23 }
   0xb   :  { %p1417_p3 = scmp.ne.s32.totalorder %s2781_s2, %s1416_s26  ;;  %p1420_p4 = scmp.lt.u32.totalorder %s1416_s26, %s2781_s2 }
   0xd   :  { %p1422_p5 = pnand %p1420_p4, %p1417_p3 }
   0xf   :  { %1425 = shalt.err (!%p1422_p5)
}
  0x10   :  { %s1426_s4 = scalar_lea.vmem %s27_s23, 256  ;;  %p1431_p7 = scmp.lt.s32.totalorder %s27_s23, %s27_s23 }
  0x11   :  { %p1427_p6 = scmp.ne.s32.totalorder %s27_s23, %s1426_s4  ;;  %p1432_p8 = scmp.lt.s32.totalorder %s1426_s4, %s1426_s4 }
  0x13   :  { %p1433_p9 = por %p1432_p8, %p1431_p7 }
  0x15   :  { %p1434_p10 = pnand %p1433_p9, %p1427_p6 }
  0x17   :  { %1437 = shalt.err (!%p1434_p10)
}
  0x18   :  { %s1468_s0 = smov 128   ;;  %s1469_s5 = smov 8  }
  0x19   :  { %32 = dma.hbm_to_vmem [thread:$0]  %s2781_s2, 256, %s27_s23, [#allocation4], %s1468_s0, %s1468_s0, %s1469_s5  }
  0x1a   :  { %1460 = dma.done.wait [#allocation6], 32  }
  0x1b   :  { %1461 = vsyncadd [#allocation6], 4294967264 }
  0x1c   :  { %1462 = dma.done.wait [#allocation4], 256  }
  0x1d   :  { %1463 = vsyncadd [#allocation4], 4294967040 }
  0x1e   :  { %39 = sfence }
  0x1f   :  { %v58_v0 = vld [vmem:[#allocation7] sm:$0xff]  ;;  %v59_v1 = vld [vmem:[#allocation7 + $0x8] sm:$0xff]  ;;  %vm66_vm0 = vcmask 1043456   ;;  %v1470_v2 = vmov 0.0   ;;  %v1471_v3 = vmov -inf   ;;  %vm135_vm1 = vcmask 1041409  }
  0x20   :  { %47 = vst [vmem:[#allocation2] sm:$0x33] %v1470_v2  ;;  %v54_v4 = vcombine.low %v1471_v3, %v1471_v3  ;;  %v62_v5 = vcombine.high %v58_v0, %v58_v0  ;;  %v63_v6 = vcombine.high %v59_v1, %v59_v1  ;;  %v67_v7 = vsel %vm66_vm0, %v58_v0, 0.0  ;;  %s1472_s2 = smov 50   ;;  %s1473_s8 = smov 51  }
  0x21   :  { %v68_v8 = vrot.slane %v67_v7, 4  ;;  %v81_v9 = vsel %vm66_vm0, %v59_v1, 0.0  ;;  %v99_v10 = vsel %vm66_vm0, %v58_v0, -inf  ;;  %v113_v11 = vsel %vm66_vm0, %v59_v1, -inf  ;;  %s1474_s9 = smov 49   ;;  %s1475_s10 = smov 48  }
  0x22   :  { %v55_v12 = vrot.slane %v54_v4, 6  ;;  %v74_v13 = vsel %vm66_vm0, %v62_v5, 0.0  ;;  %v82_v14 = vrot.slane %v81_v9, 4  ;;  %v88_v15 = vsel %vm66_vm0, %v63_v6, 0.0  ;;  %s1476_s11 = smov 47   ;;  %s1477_s12 = smov 46  }
  0x23   :  { %v69_v16 = vadd.f32 %v68_v8, %v67_v7  ;;  %v75_v17 = vrot.slane %v74_v13, 4  ;;  %v89_v18 = vrot.slane %v88_v15, 4  ;;  %v100_v19 = vrot.slane %v99_v10, 4  ;;  %s1478_s13 = smov 45   ;;  %s1479_s14 = smov 35  }
  0x24   :  { %57 = vst [vmem:[#allocation2] sm:$0xcc] %v55_v12  ;;  %v83_v20 = vadd.f32 %v82_v14, %v81_v9  ;;  %v106_v21 = vsel %vm66_vm0, %v62_v5, -inf  ;;  %v114_v22 = vrot.slane %v113_v11, 4  ;;  %v120_v23 = vsel %vm66_vm0, %v63_v6, -inf  ;;  %s1480_s15 = smov 34  }
  0x25   :  { %v70_v24 = vrot.slane %v69_v16, 2  ;;  %v76_v25 = vadd.f32 %v75_v17, %v74_v13  ;;  %v90_v26 = vadd.f32 %v89_v18, %v88_v15  ;;  %v101_v27 = vmax.f32 %v99_v10, %v100_v19  ;;  %s1481_s16 = smov 33   ;;  %s1482_s17 = smov 32  }
  0x26   :  { %v84_v28 = vrot.slane %v83_v20, 2  ;;  %v107_v29 = vrot.slane %v106_v21, 4  ;;  %v115_v30 = vmax.f32 %v113_v11, %v114_v22  ;;  %v121_v31 = vrot.slane %v120_v23, 4  ;;  %s1483_s18 = smov 31   ;;  %s1484_s19 = smov 30  }
  0x27   :  { %v71_v32 = vadd.f32 %v70_v24, %v69_v16  ;;  %v77_v33 = vrot.slane %v76_v25, 2  ;;  %v91_v34 = vrot.slane %v90_v26, 2  ;;  %v102_v35 = vrot.slane %v101_v27, 2  ;;  %v127_v3 = vld [vmem:[#allocation2] sm:$0x33]  ;;  %s1485_s20 = smov 29  }
  0x28   :  { %v85_v36 = vadd.f32 %v84_v28, %v83_v20  ;;  %v108_v37 = vmax.f32 %v106_v21, %v107_v29  ;;  %v116_v38 = vrot.slane %v115_v30, 2  ;;  %v122_v39 = vmax.f32 %v120_v23, %v121_v31  ;;  %s1486_s21 = smov 19   ;;  %s1487_s22 = smov 18   ;;  %v1635_v24 = vld [vmem:[%s2780_s1] sm:$0x3] }
  0x29   :  { %v72_v40 = vrot.slane %v71_v32, 1  ;;  %v78_v41 = vadd.f32 %v77_v33, %v76_v25  ;;  %v92_v42 = vadd.f32 %v91_v34, %v90_v26  ;;  %v103_v43 = vmax.f32 %v101_v27, %v102_v35  ;;  %s1488_s23 = smov 17   ;;  %s1489_s24 = smov 15  }
  0x2a   :  { %v86_v44 = vrot.slane %v85_v36, 1  ;;  %v109_v45 = vrot.slane %v108_v37, 2  ;;  %v117_v46 = vmax.f32 %v115_v30, %v116_v38  ;;  %v123_v47 = vrot.slane %v122_v39, 2  ;;  %s1490_s25 = smov 16   ;;  %s1491_s26 = smov 14  }
  0x2b   :  { %v73_v48 = vadd.f32 %v72_v40, %v71_v32  ;;  %v79_v49 = vrot.slane %v78_v41, 1  ;;  %v93_v50 = vrot.slane %v92_v42, 1  ;;  %v104_v51 = vrot.slane %v103_v43, 1  ;;  %v142_v11 = vld [vmem:[#allocation2] sm:$0xcc]  ;;  %s1492_s27 = smov 13  }
  0x2c   :  { %v87_v52 = vadd.f32 %v86_v44, %v85_v36  ;;  %v110_v53 = vmax.f32 %v108_v37, %v109_v45  ;;  %v118_v54 = vrot.slane %v117_v46, 1  ;;  %v124_v55 = vmax.f32 %v122_v39, %v123_v47  ;;  %s1493_s28 = smov 3   ;;  %s1494_s29 = smov 2  }
  0x2d   :  { %v80_v56 = vadd.f32 %v79_v49, %v78_v41  ;;  %v94_v57 = vadd.f32 %v93_v50, %v92_v42  ;;  %v105_v58 = vmax.f32 %v103_v43, %v104_v51  ;;  %vm137_vm2 = vcmask 1045509   ;;  %s1495_s30 = smov 1   ;;  %s1496_s4 = smov 127  }
  0x2e   :  { %v111_v59 = vrot.slane %v110_v53, 1  ;;  %v119_v60 = vmax.f32 %v117_v46, %v118_v54  ;;  %v125_v61 = vrot.slane %v124_v55, 1  ;;  %vm151_vm3 = vcmask 1043459   ;;  %s1497_s0 = smov 126   ;;  %s1498_s5 = smov 125  }
  0x2f   :  { %v132_v62 = vcombine.low %v73_v48, %v80_v56  ;;  %v133_v63 = vcombine.low %v87_v52, %v94_v57  ;;  %vm153_vm4 = vcmask 1047559   ;;  %v2786_v12 = vlaneseq  ;;  %s1499_s6 = smov 115   ;;  %s1656_s1 = sld [smem:[#allocation3 + $0x3]] }
  0x30   :  { %v112_v0 = vmax.f32 %v110_v53, %v111_v59  ;;  %v126_v1 = vmax.f32 %v124_v55, %v125_v61  ;;  %vm217_vm9 = vcmp.ge.s32.totalorder %v1635_v24, 2  ;;  %v1501_v30 = vmov 0   ;;  %s1820_s7 = sld [smem:[#allocation3 + $0xa]] }
  0x31   :  { %v134_v2 = vrot.slane %v133_v63, 7  ;;  %v1577_v16 = vand.u32 127, %v2786_v12  ;;  %v1638_v25 = vshrl.u32 %v2786_v12, 7  ;;  %v218_v31 = vsel %vm217_vm9, 1, %v1501_v30 }
  0x32   :  { %v147_v4 = vcombine.low %v105_v58, %v112_v0  ;;  %v148_v5 = vcombine.low %v119_v60, %v126_v1  ;;  %vm247_vm11 = vcmp.ge.s32.totalorder %v1635_v24, 1  ;;  %vm293_vm14 = vcmp.lt.s32.totalorder %v1635_v24, 15 }
  0x33   :  { %v136_v6 = vsel %vm135_vm1, %v134_v2, %v132_v62  ;;  %v164_v17 = vadd.s32 128, %v1577_v16  ;;  %vm768_vm8 = vcmp.ge.s32.totalorder %v1577_v16, 16  ;;  %v1646_v26 = vsub.s32 0, %v1638_v25 }
  0x34   :  { %v138_v7 = vsel %vm137_vm2, %v134_v2, %v136_v6  ;;  %v149_v8 = vrot.slane %v147_v4, 6  ;;  %v150_v9 = vrot.slane %v148_v5, 5  ;;  %v1653_v29 = vsub.s32 1, %v1638_v25 }
  0x35   :  { %v140_v10 = vadd.f32 %v138_v7, %v127_v3  ;;  %vm170_vm5 = vcmp.lt.s32.totalorder %v164_v17, 208  ;;  %vm377_vm6 = vcmp.lt.s32.totalorder %v164_v17, 224  ;;  %vm509_vm7 = vcmp.lt.s32.totalorder %v164_v17, 240 }
  0x36   :  { %v152_v13 = vsel %vm151_vm3, %v150_v9, %v149_v8  ;;  %vm214_vm10 = vcmp.lt.s32.totalorder %v1577_v16, 50  ;;  %v222_v32 = vrot.slane %v218_v31, %v1646_v26  ;;  %v226_v34 = vrot.slane %v218_v31, %v1653_v29 }
  0x37   :  { %141 = vst [vmem:[#allocation2] sm:$0x33] %v140_v10  ;;  %v154_v14 = vsel %vm153_vm4, %v150_v9, %v152_v13  ;;  %v1673_v38 = vsel %vm247_vm11, 1, %v1501_v30  ;;  %vm2783_vm12 = vcmp.lt.s32.totalorder %v1638_v25, 2  ;;  %vm244_vm13 = vcmp.lt.s32.totalorder %v1577_v16, 49 }
  0x38   :  { %v156_v15 = vmax.f32 %v142_v11, %v154_v14  ;;  %vm1680_vm15 = vcmp.eq.s32.totalorder %v222_v32, 1  ;;  %vm323_vm0 = vcmp.lt.s32.totalorder %v1635_v24, 14  ;;  %vm1689_vm1 = vcmp.eq.s32.totalorder %v226_v34, 1 }
  0x39   :  { %v252_v44 = vrot.slane %v1673_v38, %v1646_v26  ;;  %v279_v46 = vstv %s1656_s1  ;;  %vm274_vm2 = vcmp.lt.s32.totalorder %v1577_v16, 48  ;;  %v1707_v50 = vsel %vm293_vm14, 1, %v1501_v30  ;;  %s1886_s1 = sld [smem:[#allocation3 + $0x8b]] }
  0x3a   :  { %157 = vst [vmem:[#allocation2] sm:$0xcc] %v156_v15  ;;  %v256_v53 = vrot.slane %v1673_v38, %v1653_v29  ;;  %v324_v54 = vsel %vm323_vm0, 1, %v1501_v30  ;;  %vm290_vm3 = vcmp.lt.s32.totalorder %v1577_v16, 47  ;;  %v298_v61 = vrot.slane %v1707_v50, %v1646_v26 }
  0x3b   :  { %v302_v62 = vrot.slane %v1707_v50, %v1653_v29  ;;  %v328_v3 = vrot.slane %v324_v54, %v1646_v26  ;;  %vm353_vm4 = vcmp.lt.s32.totalorder %v1635_v24, 13  ;;  %v332_v8 = vrot.slane %v324_v54, %v1653_v29 }
  0x3c   :  { %vm1808_vm11 = vcmp.eq.s32.totalorder %v256_v53, 1  ;;  %vm350_vm0 = vcmp.lt.s32.totalorder %v1577_v16, 45 }
  0x3d   :  { %vm1782_vm9 = vcmp.eq.s32.totalorder %v328_v3, 1  ;;  %vm1828_vm14 = vcmp.eq.s32.totalorder %v302_v62, 1 }
  0x41   :  { %v1580_v18 = vld [vmem:[#allocation2] sm:$0xff] }
  0x42   :  { %210 = vrot.lane.b32.xlu1 %v1580_v18, %s1472_s2  ;;  %180 = vrot.lane.b32.xlu0 %v1580_v18, %s1473_s8  ;;  %v1586_v19 = vcombine.high %v1580_v18, %v1580_v18  ;;  %v1628_v23 = vsel %vm768_vm8, %v1580_v18, 0.0  ;;  %vm1776_vm8 = vcmp.eq.s32.totalorder %v252_v44, 1 }
  0x44   :  { %v179_v20 = vsel %vm170_vm5, %v1586_v19, 0.0  ;;  %v383_v21 = vsel %vm377_vm6, %v1586_v19, 0.0  ;;  %v515_v22 = vsel %vm509_vm7, %v1586_v19, 0.0  ;;  %vm320_vm5 = vcmp.lt.s32.totalorder %v1577_v16, 46 }
  0x45   :  { %vm900_vm6 = vcmp.ge.s32.totalorder %v1577_v16, 32  ;;  %vm187_vm7 = vcmp.ge.s32.totalorder %v1635_v24, 3 }
  0x46   :  { %240 = vrot.lane.b32.xlu0 %v1580_v18, %s1474_s9  ;;  %212 = vrot.lane.b32.xlu1 %v179_v20, %s1472_s2  ;;  %v1789_v31 = vsel %vm900_vm6, %v1580_v18, 0.0  ;;  %s1822_s2 = sld [smem:[#allocation3 + $0x8a]]  ;;  %vm388_vm6 = vcmp.lt.s32.totalorder %v1577_v16, 35 }
  0x4a   :  { %270 = vrot.lane.b32.xlu0 %v1580_v18, %s1475_s10  ;;  %242 = vrot.lane.b32.xlu1 %v179_v20, %s1474_s9  ;;  %s1643_s9 = sld [smem:[#allocation3 + $0x1]] }
  0x4e   :  { %286 = vrot.lane.b32.xlu0 %v1580_v18, %s1476_s11  ;;  %272 = vrot.lane.b32.xlu1 %v179_v20, %s1475_s10  ;;  %s1648_s10 = sld [smem:[#allocation3 + $0x81]] }
  0x50   :  { %v233_v40 = vstv %s1643_s9  ;;  %s1855_s9 = sld [smem:[#allocation3 + $0xb]] }
  0x52   :  { %316 = vrot.lane.b32.xlu0 %v1580_v18, %s1477_s12  ;;  %288 = vrot.lane.b32.xlu1 %v179_v20, %s1476_s11  ;;  %s1658_s11 = sld [smem:[#allocation3 + $0x83]] }
  0x54   :  { %v234_v41 = vstv %s1648_s10  ;;  %s1508_s10 = smov 98  }
  0x55   :  { %v235_v51 = vsel %vm2783_vm12, %v233_v40, %v234_v41 }
  0x56   :  { %346 = vrot.lane.b32.xlu0 %v1580_v18, %s1478_s13  ;;  %318 = vrot.lane.b32.xlu1 %v179_v20, %s1477_s12  ;;  %s1502_s12 = smov 113  }
  0x58   :  { %v280_v47 = vstv %s1658_s11  ;;  %s1509_s11 = smov 97  }
  0x59   :  { %v281_v58 = vsel %vm2783_vm12, %v279_v46, %v280_v47 }
  0x5a   :  { %384 = vrot.lane.b32.xlu0 %v1580_v18, %s1479_s14  ;;  %348 = vrot.lane.b32.xlu1 %v179_v20, %s1478_s13  ;;  %s1664_s13 = sld [smem:[#allocation3 + $0x2]] }
  0x5e   :  { %402 = vrot.lane.b32.xlu0 %v1580_v18, %s1480_s15  ;;  %386 = vrot.lane.b32.xlu1 %v383_v21, %s1479_s14  ;;  %s1667_s14 = sld [smem:[#allocation3 + $0x82]] }
  0x60   :  { %v263_v56 = vstv %s1664_s13  ;;  %s1961_s13 = sld [smem:[#allocation3 + $0xc]] }
  0x62   :  { %404 = vrot.lane.b32.xlu1 %v383_v21, %s1480_s15  ;;  %182 = vrot.lane.b32.xlu0 %v179_v20, %s1473_s8  ;;  %s1500_s8 = smov 114   ;;  %s1670_s15 = sld [smem:[#allocation3 + $0x4]] }
  0x64   :  { %v264_v57 = vstv %s1667_s14  ;;  %s1963_s14 = sld [smem:[#allocation3 + $0x8c]] }
  0x65   :  { %v1795_v34 = vsel %vm2783_vm12, %v263_v56, %v264_v57 }
  0x66   :  { %422 = vrot.lane.b32.xlu1 %v383_v21, %s1481_s16  ;;  %420 = vrot.lane.b32.xlu0 %v1580_v18, %s1481_s16  ;;  %s1503_s16 = smov 111  }
  0x68   :  { %v309_v63 = vstv %s1670_s15  ;;  %s1511_s15 = smov 95  }
  0x6a   :  { %440 = vrot.lane.b32.xlu1 %v383_v21, %s1482_s17  ;;  %438 = vrot.lane.b32.xlu0 %v1580_v18, %s1482_s17 }
  0x6e   :  { %456 = vrot.lane.b32.xlu1 %v383_v21, %s1483_s18  ;;  %454 = vrot.lane.b32.xlu0 %v1580_v18, %s1483_s18  ;;  %s1686_s18 = sld [smem:[#allocation3 + $0x84]] }
  0x72   :  { %474 = vrot.lane.b32.xlu1 %v383_v21, %s1484_s19  ;;  %472 = vrot.lane.b32.xlu0 %v1580_v18, %s1484_s19  ;;  %s1697_s19 = sld [smem:[#allocation3 + $0x5]] }
  0x74   :  { %v310_v7 = vstv %s1686_s18  ;;  %s1977_s18 = sld [smem:[#allocation3 + $0x8d]] }
  0x76   :  { %492 = vrot.lane.b32.xlu1 %v383_v21, %s1485_s20  ;;  %490 = vrot.lane.b32.xlu0 %v1580_v18, %s1485_s20  ;;  %s1709_s20 = sld [smem:[#allocation3 + $0x85]]  ;;  %v354_v21 = vsel %vm353_vm4, 1, %v1501_v30 }
  0x77   :  { %v358_v24 = vrot.slane %v354_v21, %v1646_v26 }
  0x78   :  { %v339_v14 = vstv %s1697_s19  ;;  %s1512_s19 = smov 94  }
  0x7a   :  { %518 = vrot.lane.b32.xlu1 %v515_v22, %s1486_s21  ;;  %516 = vrot.lane.b32.xlu0 %v1580_v18, %s1486_s21  ;;  %s1504_s21 = smov 112  }
  0x7c   :  { %v340_v20 = vstv %s1709_s20  ;;  %s1989_s20 = sld [smem:[#allocation3 + $0xe]] }
  0x7d   :  { %v341_v40 = vsel %vm2783_vm12, %v339_v14, %v340_v20  ;;  %v447_v14 = vstv %s1820_s7  ;;  %v448_v20 = vstv %s1822_s2  ;;  %s1517_s7 = smov 79   ;;  %s2078_s2 = sld [smem:[#allocation3 + $0x13]] }
  0x7e   :  { %536 = vrot.lane.b32.xlu1 %v515_v22, %s1487_s22  ;;  %534 = vrot.lane.b32.xlu0 %v1580_v18, %s1487_s22  ;;  %s1722_s22 = sld [smem:[#allocation3 + $0x6]] }
  0x82   :  { %554 = vrot.lane.b32.xlu1 %v515_v22, %s1488_s23  ;;  %552 = vrot.lane.b32.xlu0 %v1580_v18, %s1488_s23  ;;  %s1724_s23 = sld [smem:[#allocation3 + $0x86]] }
  0x84   :  { %v369_v32 = vstv %s1722_s22  ;;  %s1513_s22 = smov 93  }
  0x86   :  { %588 = vrot.lane.b32.xlu1 %v515_v22, %s1489_s24  ;;  %586 = vrot.lane.b32.xlu0 %v1580_v18, %s1489_s24  ;;  %s1505_s24 = smov 110  }
  0x8a   :  { %572 = vrot.lane.b32.xlu1 %v515_v22, %s1490_s25  ;;  %570 = vrot.lane.b32.xlu0 %v1580_v18, %s1490_s25  ;;  %s1746_s25 = sld [smem:[#allocation3 + $0x7]] }
  0x8e   :  { %606 = vrot.lane.b32.xlu1 %v515_v22, %s1491_s26  ;;  %604 = vrot.lane.b32.xlu0 %v1580_v18, %s1491_s26  ;;  %s1748_s26 = sld [smem:[#allocation3 + $0x87]] }
  0x90   :  { %v395_v56 = vstv %s1746_s25  ;;  %s1514_s25 = smov 83  }
  0x92   :  { %624 = vrot.lane.b32.xlu1 %v515_v22, %s1492_s27  ;;  %622 = vrot.lane.b32.xlu0 %v1580_v18, %s1492_s27  ;;  %s1754_s27 = sld [smem:[#allocation3 + $0x8]] }
  0x94   :  { %v396_v57 = vstv %s1748_s26  ;;  %s2033_s26 = sld [smem:[#allocation3 + $0x10]] }
  0x96   :  { %642 = vrot.lane.b32.xlu1 %v1586_v19, %s1493_s28  ;;  %640 = vrot.lane.b32.xlu0 %v1580_v18, %s1493_s28  ;;  %s1756_s28 = sld [smem:[#allocation3 + $0x88]] }
  0x9a   :  { %660 = vrot.lane.b32.xlu1 %v1586_v19, %s1494_s29  ;;  %658 = vrot.lane.b32.xlu0 %v1580_v18, %s1494_s29 }
  0x9e   :  { %678 = vrot.lane.b32.xlu1 %v1586_v19, %s1495_s30  ;;  %676 = vrot.lane.b32.xlu0 %v1580_v18, %s1495_s30  ;;  %s1760_s30 = sld [smem:[#allocation3]] }
  0xa2   :  { %716 = vrot.lane.b32.xlu1 %v1586_v19, %s1496_s4  ;;  %714 = vrot.lane.b32.xlu0 %v1580_v18, %s1496_s4  ;;  %s1762_s4 = sld [smem:[#allocation3 + $0x80]] }
  0xa4   :  { %v203_v62 = vstv %s1760_s30  ;;  %s2048_s30 = sld [smem:[#allocation3 + $0x12]] }
  0xa6   :  { %734 = vrot.lane.b32.xlu1 %v1586_v19, %s1497_s0  ;;  %732 = vrot.lane.b32.xlu0 %v1580_v18, %s1497_s0  ;;  %s1506_s0 = smov 109  }
  0xaa   :  { %752 = vrot.lane.b32.xlu1 %v1586_v19, %s1498_s5  ;;  %750 = vrot.lane.b32.xlu0 %v1580_v18, %s1498_s5  ;;  %s1804_s5 = sld [smem:[#allocation3 + $0x9]] }
  0xae   :  { %778 = vrot.lane.b32.xlu1 %v1586_v19, %s1499_s6  ;;  %776 = vrot.lane.b32.xlu0 %v1628_v23, %s1499_s6  ;;  %s1806_s6 = sld [smem:[#allocation3 + $0x89]] }
  0xb2   :  { %796 = vrot.lane.b32.xlu1 %v1586_v19, %s1500_s8  ;;  %794 = vrot.lane.b32.xlu0 %v1628_v23, %s1500_s8  ;;  %s1507_s8 = smov 99  }
  0xb4   :  { %v211_v27 = vpop.permute.xlu1 %210  ;;  %v1650_v28 = vpop.permute.xlu0 %180 }
  0xb6   :  { %814 = vrot.lane.b32.xlu1 %v1586_v19, %s1502_s12  ;;  %812 = vrot.lane.b32.xlu0 %v1628_v23, %s1502_s12  ;;  %s1510_s12 = smov 96  }
  0xb8   :  { %v241_v33 = vpop.permute.xlu0 %240  ;;  %v213_v35 = vpop.permute.xlu1 %212 }
  0xb9   :  { %v215_v36 = vsel %vm214_vm10, %v211_v27, %v213_v35  ;;  %v216_v37 = vsel %vm214_vm10, %v213_v35, %v211_v27  ;;  %vm1797_vm10 = vcmp.eq.s32.totalorder %v332_v8, 1  ;;  %v432_v8 = vstv %s1806_s6  ;;  %s2065_s6 = sld [smem:[#allocation3 + $0x91]] }
  0xba   :  { %848 = vrot.lane.b32.xlu1 %v1586_v19, %s1503_s16  ;;  %846 = vrot.lane.b32.xlu0 %v1628_v23, %s1503_s16  ;;  %v229_v52 = vsel %vm1680_vm15, %v216_v37, 0.0  ;;  %v230_v55 = vsel %vm1689_vm1, %v215_v36, 0.0  ;;  %v2810_v36 = vmov 0  ;;  %v1814_v37 = vsel %vm2783_vm12, %v309_v63, %v310_v7  ;;  %s1975_s16 = sld [smem:[#allocation3 + $0xd]] }
  0xbb   :  { %v236_v0 = vmul.f32 %v235_v51, %v229_v52  ;;  %v237_v4 = vmul.f32 %v235_v51, %v230_v55  ;;  %v2811_v36 = vsel %vm1808_vm11, 4294967295, %v2810_v36  ;;  %v204_v63 = vstv %s1762_s4  ;;  %s2050_s4 = sld [smem:[#allocation3 + $0x92]] }
  0xbc   :  { %v271_v43 = vpop.permute.xlu0 %270  ;;  %v243_v45 = vpop.permute.xlu1 %242  ;;  %v431_v7 = vstv %s1804_s5  ;;  %s2063_s5 = sld [smem:[#allocation3 + $0x11]] }
  0xbd   :  { %v1699_v48 = vsel %vm244_vm13, %v241_v33, %v243_v45  ;;  %v1701_v49 = vsel %vm244_vm13, %v243_v45, %v241_v33  ;;  %v370_v33 = vstv %s1724_s23  ;;  %vm1824_vm13 = vcmp.eq.s32.totalorder %v298_v61, 1  ;;  %s2014_s23 = sld [smem:[#allocation3 + $0xf]] }
  0xbe   :  { %832 = vrot.lane.b32.xlu1 %v1586_v19, %s1504_s21  ;;  %830 = vrot.lane.b32.xlu0 %v1628_v23, %s1504_s21  ;;  %v1839_v47 = vsel %vm2783_vm12, %v369_v32, %v370_v33  ;;  %v414_v61 = vstv %s1756_s28  ;;  %s1991_s21 = sld [smem:[#allocation3 + $0x8e]]  ;;  %s1515_s28 = smov 82  }
  0xc0   :  { %v287_v59 = vpop.permute.xlu0 %286  ;;  %v273_v60 = vpop.permute.xlu1 %272 }
  0xc1   :  { %v275_v1 = vsel %vm274_vm2, %v271_v43, %v273_v60  ;;  %v276_v2 = vsel %vm274_vm2, %v273_v60, %v271_v43  ;;  %v413_v60 = vstv %s1754_s27  ;;  %vm1857_vm2 = vcmp.eq.s32.totalorder %v358_v24, 1  ;;  %s2035_s27 = sld [smem:[#allocation3 + $0x90]] }
  0xc2   :  { %v282_v5 = vmul.f32 %v281_v58, %v276_v2  ;;  %v283_v6 = vmul.f32 %v281_v58, %v275_v1  ;;  %866 = vrot.lane.b32.xlu1 %v1586_v19, %s1505_s24  ;;  %864 = vrot.lane.b32.xlu0 %v1628_v23, %s1505_s24  ;;  %s2016_s24 = sld [smem:[#allocation3 + $0x8f]] }
  0xc4   :  { %v284_v9 = vadd.f32 %v282_v5, %v236_v0  ;;  %v285_v10 = vadd.f32 %v283_v6, %v237_v4  ;;  %v317_v11 = vpop.permute.xlu0 %316  ;;  %v289_v13 = vpop.permute.xlu1 %288  ;;  %v397_v6 = vsel %vm2783_vm12, %v395_v56, %v396_v57 }
  0xc5   :  { %v1766_v15 = vsel %vm290_vm3, %v287_v59, %v289_v13  ;;  %v1770_v17 = vsel %vm290_vm3, %v289_v13, %v287_v59  ;;  %v205_v13 = vsel %vm2783_vm12, %v203_v62, %v204_v63 }
  0xc6   :  { %884 = vrot.lane.b32.xlu1 %v1586_v19, %s1506_s0  ;;  %882 = vrot.lane.b32.xlu0 %v1628_v23, %s1506_s0  ;;  %v188_v23 = vsel %vm187_vm7, 1, %v1501_v30  ;;  %v362_v30 = vrot.slane %v354_v21, %v1653_v29  ;;  %v259_v21 = vsel %vm1776_vm8, %v1701_v49, 0.0  ;;  %v260_v49 = vsel %vm1808_vm11, %v1699_v48, 0.0  ;;  %s1516_s0 = smov 81  }
  0xc7   :  { %v192_v52 = vrot.slane %v188_v23, %v1646_v26  ;;  %v196_v53 = vrot.slane %v188_v23, %v1653_v29  ;;  %v2816_v26 = vmov 0  ;;  %v2818_v29 = vmov 0 }
  0xc8   :  { %v347_v38 = vpop.permute.xlu0 %346  ;;  %v319_v41 = vpop.permute.xlu1 %318  ;;  %v2817_v26 = vsel %vm1857_vm2, 4294967295, %v2816_v26  ;;  %vm1861_vm3 = vcmp.eq.s32.totalorder %v362_v30, 1  ;;  %v449_v30 = vsel %vm2783_vm12, %v447_v14, %v448_v20  ;;  %v267_v57 = vmul.f32 %v1795_v34, %v260_v49 }
  0xc9   :  { %v321_v45 = vsel %vm320_vm5, %v317_v11, %v319_v41  ;;  %v322_v46 = vsel %vm320_vm5, %v319_v41, %v317_v11  ;;  %v2819_v29 = vsel %vm1861_vm3, 4294967295, %v2818_v29  ;;  %vm1875_vm4 = vcmp.eq.s32.totalorder %v192_v52, 1 }
  0xca   :  { %v335_v50 = vsel %vm1782_vm9, %v322_v46, 0.0  ;;  %v336_v51 = vsel %vm1797_vm10, %v321_v45, 0.0  ;;  %910 = vrot.lane.b32.xlu1 %v1586_v19, %s1507_s8  ;;  %908 = vrot.lane.b32.xlu0 %v1789_v31, %s1507_s8  ;;  %vm1879_vm5 = vcmp.eq.s32.totalorder %v196_v53, 1  ;;  %v1894_v11 = vsel %vm2783_vm12, %v413_v60, %v414_v61  ;;  %s2080_s8 = sld [smem:[#allocation3 + $0x93]] }
  0xcb   :  { %v342_v54 = vmul.f32 %v341_v40, %v335_v50  ;;  %v343_v55 = vmul.f32 %v341_v40, %v336_v51  ;;  %v433_v40 = vsel %vm2783_vm12, %v431_v7, %v432_v8  ;;  %v266_v45 = vmul.f32 %v1795_v34, %v259_v21 }
  0xcc   :  { %v385_v58 = vpop.permute.xlu0 %384  ;;  %v349_v59 = vpop.permute.xlu1 %348  ;;  %v305_v46 = vsel %vm1824_vm13, %v1770_v17, 0.0  ;;  %v306_v50 = vsel %vm1828_vm14, %v1766_v15, 0.0  ;;  %v465_v53 = vstv %s1855_s9  ;;  %vm2826_vm7 = vcmp.lt.s32.totalorder %v1577_v16, 51  ;;  %s1518_s9 = smov 80  }
  0xcd   :  { %v344_v0 = vadd.f32 %v342_v54, %v284_v9  ;;  %v345_v1 = vadd.f32 %v343_v55, %v285_v10  ;;  %v1867_v2 = vsel %vm350_vm0, %v347_v38, %v349_v59  ;;  %v1871_v3 = vsel %vm350_vm0, %v349_v59, %v347_v38  ;;  %vm2827_vm0 = vmmov %vm2826_vm7 }
  0xce   :  { %928 = vrot.lane.b32.xlu1 %v1586_v19, %s1508_s10  ;;  %926 = vrot.lane.b32.xlu0 %v1789_v31, %s1508_s10  ;;  %v312_v59 = vmul.f32 %v1814_v37, %v305_v46  ;;  %v313_v34 = vmul.f32 %v1814_v37, %v306_v50  ;;  %v366_v62 = vsel %vm1861_vm3, %v1867_v2, 0.0  ;;  %s2093_s10 = sld [smem:[#allocation3 + $0x14]] }
  0xcf   :  { %v373_v20 = vmul.f32 %v1839_v47, %v366_v62 }
  0xd0   :  { %v403_v9 = vpop.permute.xlu0 %402  ;;  %v387_v10 = vpop.permute.xlu1 %386 }
  0xd1   :  { %v389_v32 = vsel %vm388_vm6, %v385_v58, %v387_v10  ;;  %v390_v33 = vsel %vm388_vm6, %v387_v10, %v385_v58  ;;  %vm2824_vm6 = vcmp.lt.s32.totalorder %v1577_v16, 34  ;;  %v466_v58 = vstv %s1886_s1  ;;  %s2095_s1 = sld [smem:[#allocation3 + $0x94]] }
  0xd2   :  { %v391_v23 = vsel %vm1875_vm4, %v390_v33, 0.0  ;;  %v392_v38 = vsel %vm1879_vm5, %v389_v32, 0.0  ;;  %946 = vrot.lane.b32.xlu1 %v1586_v19, %s1509_s11  ;;  %944 = vrot.lane.b32.xlu0 %v1789_v31, %s1509_s11  ;;  %vm2825_vm12 = vmmov %vm2824_vm6  ;;  %s1519_s11 = smov 78  }
  0xd3   :  { %v398_v41 = vmul.f32 %v397_v6, %v391_v23  ;;  %v399_v24 = vmul.f32 %v397_v6, %v392_v38 }
  0xd4   :  { %v405_v51 = vpop.permute.xlu1 %404  ;;  %v183_v52 = vpop.permute.xlu0 %182 }
  0xd5   :  { %v400_v48 = vadd.f32 %v398_v41, %v344_v0  ;;  %v401_v54 = vadd.f32 %v399_v24, %v345_v1  ;;  %v407_v55 = vsel %vm2824_vm6, %v403_v9, %v405_v51  ;;  %v408_v56 = vsel %vm2825_vm12, %v405_v51, %v403_v9 }
  0xd6   :  { %v185_v17 = vsel %vm2826_vm7, %v1650_v28, %v183_v52  ;;  %v186_v15 = vsel %vm2827_vm0, %v183_v52, %v1650_v28  ;;  %964 = vrot.lane.b32.xlu1 %v1586_v19, %s1510_s12  ;;  %962 = vrot.lane.b32.xlu0 %v1789_v31, %s1510_s12  ;;  %vm458_vm6 = vcmp.lt.s32.totalorder %v1577_v16, 31  ;;  %v365_v28 = vsel %vm1857_vm2, %v1871_v3, 0.0  ;;  %s2108_s12 = sld [smem:[#allocation3 + $0x15]] }
  0xd7   :  { %v199_v60 = vsel %vm1875_vm4, %v186_v15, 0.0  ;;  %v200_v61 = vsel %vm1879_vm5, %v185_v17, 0.0  ;;  %v409_v37 = vsel %vm1680_vm15, %v408_v56, 0.0  ;;  %v410_v7 = vsel %vm1689_vm1, %v407_v55, 0.0 }
  0xd8   :  { %v206_v63 = vmul.f32 %v205_v13, %v199_v60  ;;  %v207_v0 = vmul.f32 %v205_v13, %v200_v61  ;;  %v423_v1 = vpop.permute.xlu1 %422  ;;  %v421_v6 = vpop.permute.xlu0 %420  ;;  %vm2828_vm12 = vcmp.lt.s32.totalorder %v1577_v16, 33  ;;  %v372_v14 = vmul.f32 %v1839_v47, %v365_v28 }
  0xd9   :  { %v425_v8 = vsel %vm2828_vm12, %v421_v6, %v423_v1  ;;  %vm2829_vm7 = vmmov %vm2828_vm12  ;;  %v416_v33 = vmul.f32 %v1894_v11, %v409_v37  ;;  %v417_v23 = vmul.f32 %v1894_v11, %v410_v7  ;;  %vm2830_vm0 = vcmp.lt.s32.totalorder %v1577_v16, 32 }
  0xda   :  { %v426_v3 = vsel %vm2829_vm7, %v423_v1, %v421_v6  ;;  %v268_v2 = vadd.f32 %v266_v45, %v206_v63  ;;  %v269_v9 = vadd.f32 %v267_v57, %v207_v0  ;;  %v428_v13 = vsel %vm1808_vm11, %v425_v8, 0.0  ;;  %980 = vrot.lane.b32.xlu1 %v1586_v19, %s1511_s15  ;;  %978 = vrot.lane.b32.xlu0 %v1789_v31, %s1511_s15  ;;  %vm2831_vm12 = vmmov %vm2830_vm0  ;;  %s2115_s15 = sld [smem:[#allocation3 + $0x18]] }
  0xdb   :  { %v427_v10 = vsel %vm1776_vm8, %v426_v3, 0.0  ;;  %v435_v32 = vmul.f32 %v433_v40, %v428_v13  ;;  %vm2832_vm7 = vcmp.lt.s32.totalorder %v1638_v25, 2  ;;  %v484_v15 = vstv %s1963_s14  ;;  %s1520_s14 = smov 77  }
  0xdc   :  { %v434_v21 = vmul.f32 %v433_v40, %v427_v10  ;;  %v314_v38 = vadd.f32 %v312_v59, %v268_v2  ;;  %v315_v49 = vadd.f32 %v313_v34, %v269_v9  ;;  %v441_v41 = vpop.permute.xlu1 %440  ;;  %v439_v24 = vpop.permute.xlu0 %438  ;;  %v501_v6 = vstv %s1975_s16  ;;  %s2117_s16 = sld [smem:[#allocation3 + $0x98]] }
  0xdd   :  { %v437_v46 = vadd.f32 %v435_v32, %v401_v54  ;;  %v443_v50 = vsel %vm2830_vm0, %v439_v24, %v441_v41  ;;  %v444_v47 = vsel %vm2831_vm12, %v441_v41, %v439_v24  ;;  %vm476_vm0 = vcmp.lt.s32.totalorder %v1577_v16, 30 }
  0xde   :  { %v436_v45 = vadd.f32 %v434_v21, %v400_v48  ;;  %v374_v40 = vadd.f32 %v372_v14, %v314_v38  ;;  %v375_v51 = vadd.f32 %v373_v20, %v315_v49  ;;  %v450_v52 = vmul.f32 %v449_v30, %v444_v47  ;;  %998 = vrot.lane.b32.xlu1 %v1586_v19, %s1512_s19 }
  0xdf   :  { %v451_v11 = vmul.f32 %v449_v30, %v443_v50  ;;  %996 = vrot.lane.b32.xlu0 %v1789_v31, %s1512_s19  ;;  %v467_v48 = vsel %vm2832_vm7, %v465_v53, %v466_v58  ;;  %vm1032_vm12 = vcmp.ge.s32.totalorder %v1577_v16, 48  ;;  %v483_v53 = vstv %s1961_s13  ;;  %s2110_s13 = sld [smem:[#allocation3 + $0x95]]  ;;  %s2123_s19 = sld [smem:[#allocation3 + $0x96]] }
  0xe0   :  { %v418_v54 = vadd.f32 %v416_v33, %v374_v40  ;;  %v419_v55 = vadd.f32 %v417_v23, %v375_v51  ;;  %v457_v56 = vpop.permute.xlu1 %456  ;;  %v455_v57 = vpop.permute.xlu0 %454  ;;  %v2010_v1 = vsel %vm1032_vm12, %v1580_v18, 0.0  ;;  %v502_v37 = vstv %s1977_s18  ;;  %s2121_s18 = sld [smem:[#allocation3 + $0x16]] }
  0xe1   :  { %v459_v30 = vsel %vm458_vm6, %v455_v57, %v457_v56  ;;  %v460_v17 = vsel %vm458_vm6, %v457_v56, %v455_v57  ;;  %vm2833_vm6 = vmmov %vm2832_vm7  ;;  %vm494_vm7 = vcmp.lt.s32.totalorder %v1577_v16, 29  ;;  %v527_v21 = vstv %s1989_s20  ;;  %s2136_s20 = sld [smem:[#allocation3 + $0x17]] }
  0xe2   :  { %v452_v58 = vadd.f32 %v450_v52, %v418_v54  ;;  %v453_v59 = vadd.f32 %v451_v11, %v419_v55  ;;  %v461_v34 = vsel %vm1824_vm13, %v460_v17, 0.0  ;;  %v462_v60 = vsel %vm1828_vm14, %v459_v30, 0.0  ;;  %1016 = vrot.lane.b32.xlu1 %v1586_v19, %s1513_s22  ;;  %vm2834_vm12 = vmmov %vm2833_vm6 }
  0xe3   :  { %v468_v61 = vmul.f32 %v467_v48, %v461_v34  ;;  %v469_v28 = vmul.f32 %v467_v48, %v462_v60  ;;  %1014 = vrot.lane.b32.xlu0 %v1789_v31, %s1513_s22  ;;  %v485_v63 = vsel %vm2833_vm6, %v483_v53, %v484_v15  ;;  %v503_v14 = vsel %vm2834_vm12, %v501_v6, %v502_v37  ;;  %vm2835_vm12 = vmmov %vm2833_vm6  ;;  %s2149_s22 = sld [smem:[#allocation3 + $0x19]] }
  0xe4   :  { %v475_v62 = vpop.permute.xlu1 %474  ;;  %v473_v0 = vpop.permute.xlu0 %472  ;;  %v528_v32 = vstv %s1991_s21  ;;  %v545_v51 = vstv %s2014_s23  ;;  %v546_v52 = vstv %s2016_s24  ;;  %v564_v34 = vstv %s2035_s27  ;;  %s2138_s21 = sld [smem:[#allocation3 + $0x97]]  ;;  %s2151_s23 = sld [smem:[#allocation3 + $0x99]] }
  0xe5   :  { %v470_v7 = vadd.f32 %v468_v61, %v436_v45  ;;  %v471_v31 = vadd.f32 %v469_v28, %v437_v46  ;;  %v477_v8 = vsel %vm476_vm0, %v473_v0, %v475_v62  ;;  %v478_v3 = vsel %vm476_vm0, %v475_v62, %v473_v0  ;;  %s2171_s24 = sld [smem:[#allocation3 + $0x1a]]  ;;  %s2186_s27 = sld [smem:[#allocation3 + $0x9b]] }
  0xe6   :  { %v479_v18 = vsel %vm1782_vm9, %v478_v3, 0.0  ;;  %v480_v2 = vsel %vm1797_vm10, %v477_v8, 0.0  ;;  %1042 = vrot.lane.b32.xlu1 %v1586_v19, %s1514_s25  ;;  %vm520_vm0 = vcmp.lt.s32.totalorder %v1577_v16, 19  ;;  %v529_v47 = vsel %vm2833_vm6, %v527_v21, %v528_v32 }
  0xe7   :  { %v486_v9 = vmul.f32 %v485_v63, %v479_v18  ;;  %v487_v10 = vmul.f32 %v485_v63, %v480_v2  ;;  %1040 = vrot.lane.b32.xlu0 %v2010_v1, %s1514_s25  ;;  %v547_v15 = vsel %vm2835_vm12, %v545_v51, %v546_v52  ;;  %v597_v3 = vstv %s2048_s30  ;;  %vm2836_vm12 = vmmov %vm2833_vm6  ;;  %s2173_s25 = sld [smem:[#allocation3 + $0x9a]]  ;;  %s2243_s30 = sld [smem:[#allocation3 + $0x9c]] }
  0xe8   :  { %v493_v13 = vpop.permute.xlu1 %492  ;;  %v491_v20 = vpop.permute.xlu0 %490  ;;  %v598_v18 = vstv %s2050_s4  ;;  %s2249_s4 = sld [smem:[#allocation3 + $0x1d]] }
  0xe9   :  { %v488_v33 = vadd.f32 %v486_v9, %v452_v58  ;;  %v489_v23 = vadd.f32 %v487_v10, %v453_v59  ;;  %v495_v38 = vsel %vm494_vm7, %v491_v20, %v493_v13  ;;  %v496_v49 = vsel %vm494_vm7, %v493_v13, %v491_v20 }
  0xea   :  { %v497_v41 = vsel %vm1857_vm2, %v496_v49, 0.0  ;;  %v498_v24 = vsel %vm1861_vm3, %v495_v38, 0.0  ;;  %1060 = vrot.lane.b32.xlu1 %v1586_v19, %s1515_s28  ;;  %vm538_vm7 = vcmp.lt.s32.totalorder %v1577_v16, 18  ;;  %v563_v59 = vstv %s2033_s26  ;;  %s2184_s26 = sld [smem:[#allocation3 + $0x1b]] }
  0xeb   :  { %v504_v45 = vmul.f32 %v503_v14, %v497_v41  ;;  %v505_v46 = vmul.f32 %v503_v14, %v498_v24  ;;  %1058 = vrot.lane.b32.xlu0 %v2010_v1, %s1515_s28  ;;  %v579_v49 = vstv %s2063_s5  ;;  %v580_v41 = vstv %s2065_s6  ;;  %s2241_s28 = sld [smem:[#allocation3 + $0x1c]]  ;;  %s2253_s5 = sld [smem:[#allocation3 + $0x1e]] }
  0xec   :  { %v519_v50 = vpop.permute.xlu1 %518  ;;  %v517_v40 = vpop.permute.xlu0 %516  ;;  %s2255_s6 = sld [smem:[#allocation3 + $0x9e]] }
  0xed   :  { %v506_v11 = vadd.f32 %v504_v45, %v470_v7  ;;  %v507_v48 = vadd.f32 %v505_v46, %v471_v31  ;;  %v521_v54 = vsel %vm520_vm0, %v517_v40, %v519_v50  ;;  %v522_v55 = vsel %vm520_vm0, %v519_v50, %v517_v40 }
  0xee   :  { %v523_v56 = vsel %vm1875_vm4, %v522_v55, 0.0  ;;  %v524_v57 = vsel %vm1879_vm5, %v521_v54, 0.0  ;;  %1078 = vrot.lane.b32.xlu1 %v1586_v19, %s1516_s0  ;;  %vm556_vm0 = vcmp.lt.s32.totalorder %v1577_v16, 17  ;;  %v565_v31 = vsel %vm2833_vm6, %v563_v59, %v564_v34 }
  0xef   :  { %v530_v30 = vmul.f32 %v529_v47, %v523_v56  ;;  %v531_v17 = vmul.f32 %v529_v47, %v524_v57  ;;  %1076 = vrot.lane.b32.xlu0 %v2010_v1, %s1516_s0  ;;  %v615_v55 = vstv %s2078_s2  ;;  %v616_v56 = vstv %s2080_s8  ;;  %s2251_s0 = sld [smem:[#allocation3 + $0x9d]]  ;;  %s2259_s2 = sld [smem:[#allocation3 + $0xa0]] }
  0xf0   :  { %v537_v53 = vpop.permute.xlu1 %536  ;;  %v535_v58 = vpop.permute.xlu0 %534  ;;  %s2261_s8 = sld [smem:[#allocation3 + $0x1f]] }
  0xf1   :  { %v532_v60 = vadd.f32 %v530_v30, %v488_v33  ;;  %v533_v61 = vadd.f32 %v531_v17, %v489_v23  ;;  %v539_v28 = vsel %vm538_vm7, %v535_v58, %v537_v53  ;;  %v540_v62 = vsel %vm538_vm7, %v537_v53, %v535_v58 }
  0xf2   :  { %v541_v63 = vsel %vm1680_vm15, %v540_v62, 0.0  ;;  %v542_v0 = vsel %vm1689_vm1, %v539_v28, 0.0  ;;  %1112 = vrot.lane.b32.xlu1 %v1586_v19, %s1517_s7  ;;  %vm590_vm7 = vcmp.lt.s32.totalorder %v1577_v16, 15  ;;  %v599_v23 = vsel %vm2836_vm12, %v597_v3, %v598_v18  ;;  %vm2837_vm12 = vmmov %vm2833_vm6 }
  0xf3   :  { %v548_v6 = vmul.f32 %v547_v15, %v541_v63  ;;  %v549_v37 = vmul.f32 %v547_v15, %v542_v0  ;;  %1110 = vrot.lane.b32.xlu0 %v2010_v1, %s1517_s7  ;;  %v634_v63 = vstv %s2095_s1  ;;  %s2257_s7 = sld [smem:[#allocation3 + $0x20]]  ;;  %s2271_s1 = sld [smem:[#allocation3 + $0xa1]] }
  0xf4   :  { %v555_v7 = vpop.permute.xlu1 %554  ;;  %v553_v8 = vpop.permute.xlu0 %552 }
  0xf5   :  { %v550_v2 = vadd.f32 %v548_v6, %v506_v11  ;;  %v551_v9 = vadd.f32 %v549_v37, %v507_v48  ;;  %v557_v10 = vsel %vm556_vm0, %v553_v8, %v555_v7  ;;  %v558_v13 = vsel %vm556_vm0, %v555_v7, %v553_v8 }
  0xf6   :  { %v559_v14 = vsel %vm1776_vm8, %v558_v13, 0.0  ;;  %v560_v20 = vsel %vm1808_vm11, %v557_v10, 0.0  ;;  %1096 = vrot.lane.b32.xlu1 %v1586_v19, %s1518_s9  ;;  %vm574_vm0 = vcmp.lt.s32.totalorder %v1577_v16, 16  ;;  %v581_v11 = vsel %vm2833_vm6, %v579_v49, %v580_v41 }
  0xf7   :  { %v566_v21 = vmul.f32 %v565_v31, %v559_v14  ;;  %v567_v32 = vmul.f32 %v565_v31, %v560_v20  ;;  %1094 = vrot.lane.b32.xlu0 %v2010_v1, %s1518_s9  ;;  %v1521_v31 = vmov 839922192   ;;  %v652_v10 = vstv %s2110_s13  ;;  %s2263_s9 = sld [smem:[#allocation3 + $0x9f]]  ;;  %s2277_s13 = sld [smem:[#allocation3 + $0x23]] }
  0xf8   :  { %v589_v33 = vpop.permute.xlu1 %588  ;;  %v587_v38 = vpop.permute.xlu0 %586  ;;  %v701_v8 = vunpack.c.l.s4 %v1521_v31 }
  0xf9   :  { %v568_v24 = vadd.f32 %v566_v21, %v532_v60  ;;  %v569_v45 = vadd.f32 %v567_v32, %v533_v61  ;;  %v591_v46 = vsel %vm590_vm7, %v587_v38, %v589_v33  ;;  %v592_v50 = vsel %vm590_vm7, %v589_v33, %v587_v38 }
  0xfa   :  { %v593_v47 = vsel %vm1824_vm13, %v592_v50, 0.0  ;;  %v594_v40 = vsel %vm1828_vm14, %v591_v46, 0.0  ;;  %1130 = vrot.lane.b32.xlu1 %v1586_v19, %s1519_s11  ;;  %vm608_vm7 = vcmp.lt.s32.totalorder %v1577_v16, 14  ;;  %v617_v61 = vsel %vm2837_vm12, %v615_v55, %v616_v56  ;;  %vm2838_vm12 = vmmov %vm2833_vm6 }
  0xfb   :  { %v600_v51 = vmul.f32 %v599_v23, %v593_v47  ;;  %v601_v52 = vmul.f32 %v599_v23, %v594_v40  ;;  %1128 = vrot.lane.b32.xlu0 %v2010_v1, %s1519_s11  ;;  %v702_v41 = vunpack.c.0.s8 %v701_v8  ;;  %v669_v46 = vstv %s2121_s18  ;;  %s2273_s11 = sld [smem:[#allocation3 + $0x22]]  ;;  %s2289_s18 = sld [smem:[#allocation3 + $0x25]] }
  0xfc   :  { %v573_v48 = vpop.permute.xlu1 %572  ;;  %v571_v54 = vpop.permute.xlu0 %570  ;;  %v670_v50 = vstv %s2123_s19  ;;  %v696_v47 = vstv %s2115_s15  ;;  %v697_v40 = vstv %s2117_s16  ;;  %v725_v8 = vstv %s2149_s22  ;;  %s2285_s15 = sld [smem:[#allocation3 + $0x24]]  ;;  %s2291_s19 = sld [smem:[#allocation3 + $0xa5]] }
  0xfd   :  { %v602_v57 = vadd.f32 %v600_v51, %v568_v24  ;;  %v603_v30 = vadd.f32 %v601_v52, %v569_v45  ;;  %v575_v17 = vsel %vm574_vm0, %v571_v54, %v573_v48  ;;  %v576_v53 = vsel %vm574_vm0, %v573_v48, %v571_v54  ;;  %s2287_s16 = sld [smem:[#allocation3 + $0xa4]]  ;;  %s2297_s22 = sld [smem:[#allocation3 + $0x27]] }
  0xfe   :  { %v582_v15 = vmul.f32 %v581_v11, %v576_v53  ;;  %v583_v58 = vmul.f32 %v581_v11, %v575_v17  ;;  %1148 = vrot.lane.b32.xlu1 %v1586_v19, %s1520_s14  ;;  %vm626_vm0 = vcmp.lt.s32.totalorder %v1577_v16, 13  ;;  %v705_v53 = vsub.s32 %v702_v41, %v1638_v25 }
  0xff   :  { %1146 = vrot.lane.b32.xlu0 %v2010_v1, %s1520_s14  ;;  %v633_v1 = vstv %s2093_s10  ;;  %v743_v41 = vstv %s2171_s24  ;;  %s2269_s10 = sld [smem:[#allocation3 + $0x21]]  ;;  %s2279_s14 = sld [smem:[#allocation3 + $0xa3]] }
 0x100   :  { %v584_v59 = vadd.f32 %v582_v15, %v550_v2  ;;  %v585_v34 = vadd.f32 %v583_v58, %v551_v9  ;;  %v607_v60 = vpop.permute.xlu1 %606  ;;  %v605_v28 = vpop.permute.xlu0 %604  ;;  %v635_v18 = vsel %vm2833_vm6, %v633_v1, %v634_v63  ;;  %v651_v9 = vstv %s2108_s12  ;;  %s2275_s12 = sld [smem:[#allocation3 + $0xa2]]  ;;  %s2309_s24 = sld [smem:[#allocation3 + $0x28]] }
 0x101   :  { %v609_v19 = vsel %vm608_vm7, %v605_v28, %v607_v60  ;;  %v610_v62 = vsel %vm608_vm7, %v607_v60, %v605_v28  ;;  %vm644_vm7 = vcmp.lt.s32.totalorder %v1577_v16, 3  ;;  %v653_v49 = vsel %vm2838_vm12, %v651_v9, %v652_v10 }
 0x102   :  { %v611_v0 = vsel %vm1782_vm9, %v610_v62, 0.0  ;;  %v612_v6 = vsel %vm1797_vm10, %v609_v19, 0.0  ;;  %v687_v58 = vstv %s2136_s20  ;;  %vm680_vm12 = vcmp.lt.s32.totalorder %v1577_v16, 1  ;;  %s2293_s20 = sld [smem:[#allocation3 + $0x26]] }
 0x103   :  { %v618_v37 = vmul.f32 %v617_v61, %v611_v0  ;;  %v619_v7 = vmul.f32 %v617_v61, %v612_v6 }
 0x104   :  { %v625_v3 = vpop.permute.xlu1 %624  ;;  %v623_v2 = vpop.permute.xlu0 %622 }
 0x105   :  { %v620_v13 = vadd.f32 %v618_v37, %v584_v59  ;;  %v621_v14 = vadd.f32 %v619_v7, %v585_v34  ;;  %v627_v20 = vsel %vm626_vm0, %v623_v2, %v625_v3  ;;  %v628_v21 = vsel %vm626_vm0, %v625_v3, %v623_v2 }
 0x106   :  { %v629_v32 = vsel %vm1857_vm2, %v628_v21, 0.0  ;;  %v630_v33 = vsel %vm1861_vm3, %v627_v20, 0.0  ;;  %vm662_vm0 = vcmp.lt.s32.totalorder %v1577_v16, 2  ;;  %v688_v59 = vstv %s2138_s21  ;;  %s2295_s21 = sld [smem:[#allocation3 + $0xa6]] }
 0x107   :  { %v636_v23 = vmul.f32 %v635_v18, %v629_v32  ;;  %v637_v38 = vmul.f32 %v635_v18, %v630_v33  ;;  %v689_v7 = vsel %vm2833_vm6, %v687_v58, %v688_v59  ;;  %v726_v3 = vstv %s2151_s23  ;;  %v1405_v32 = vld [vmem:[#allocation2] sm:$0xff]  ;;  %s2299_s23 = sld [smem:[#allocation3 + $0xa7]] }
 0x108   :  { %v643_v24 = vpop.permute.xlu1 %642  ;;  %v641_v45 = vpop.permute.xlu0 %640 }
 0x109   :  { %v638_v51 = vadd.f32 %v636_v23, %v602_v57  ;;  %v639_v52 = vadd.f32 %v637_v38, %v603_v30  ;;  %v645_v11 = vsel %vm644_vm7, %v641_v45, %v643_v24  ;;  %v646_v48 = vsel %vm644_vm7, %v643_v24, %v641_v45  ;;  %vm2839_vm7 = vmmov %vm2833_vm6 }
 0x10a   :  { %v647_v54 = vsel %vm1875_vm4, %v646_v48, 0.0  ;;  %v648_v55 = vsel %vm1879_vm5, %v645_v11, 0.0  ;;  %v671_v30 = vsel %vm2833_vm6, %v669_v46, %v670_v50  ;;  %v698_v34 = vsel %vm2839_vm7, %v696_v47, %v697_v40  ;;  %vm2840_vm7 = vmmov %vm2833_vm6 }
 0x10b   :  { %v654_v56 = vmul.f32 %v653_v49, %v647_v54  ;;  %v655_v17 = vmul.f32 %v653_v49, %v648_v55  ;;  %v706_v6 = vrot.slane %v698_v34, %v705_v53  ;;  %v727_v38 = vsel %vm2840_vm7, %v725_v8, %v726_v3  ;;  %vm2841_vm7 = vmmov %vm2833_vm6 }
 0x10c   :  { %v661_v57 = vpop.permute.xlu1 %660  ;;  %v659_v15 = vpop.permute.xlu0 %658  ;;  %v744_v24 = vstv %s2173_s25  ;;  %v762_v53 = vstv %s2186_s27  ;;  %s2311_s25 = sld [smem:[#allocation3 + $0xa8]]  ;;  %s2319_s27 = sld [smem:[#allocation3 + $0xa9]] }
 0x10d   :  { %v656_v60 = vadd.f32 %v654_v56, %v620_v13  ;;  %v657_v61 = vadd.f32 %v655_v17, %v621_v14  ;;  %v663_v28 = vsel %vm662_vm0, %v659_v15, %v661_v57  ;;  %v664_v19 = vsel %vm662_vm0, %v661_v57, %v659_v15 }
 0x10e   :  { %v665_v62 = vsel %vm1680_vm15, %v664_v19, 0.0  ;;  %v666_v1 = vsel %vm1689_vm1, %v663_v28, 0.0  ;;  %vm718_vm0 = vcmp.lt.s32.totalorder %v1577_v16, 127  ;;  %v708_v33 = vmul.f32 %v1405_v32, %v706_v6 }
 0x10f   :  { %v672_v63 = vmul.f32 %v671_v30, %v665_v62  ;;  %v673_v0 = vmul.f32 %v671_v30, %v666_v1  ;;  %v745_v55 = vsel %vm2833_vm6, %v743_v41, %v744_v24  ;;  %v761_v17 = vstv %s2184_s26  ;;  %s2317_s26 = sld [smem:[#allocation3 + $0x29]] }
 0x110   :  { %v679_v37 = vpop.permute.xlu1 %678  ;;  %v677_v31 = vpop.permute.xlu0 %676  ;;  %v710_v48 = vcombine.high %v708_v33, %v708_v33  ;;  %v763_v1 = vsel %vm2841_vm7, %v761_v17, %v762_v53  ;;  %v839_v17 = vstv %s2261_s8  ;;  %v840_v53 = vstv %s2263_s9  ;;  %vm2842_vm7 = vmmov %vm2833_vm6  ;;  %s2381_s8 = sld [smem:[#allocation3 + $0x2d]] }
 0x111   :  { %v674_v18 = vadd.f32 %v672_v63, %v638_v51  ;;  %v675_v2 = vadd.f32 %v673_v0, %v639_v52  ;;  %v681_v9 = vsel %vm680_vm12, %v677_v31, %v679_v37  ;;  %v682_v10 = vsel %vm680_vm12, %v679_v37, %v677_v31  ;;  %s2383_s9 = sld [smem:[#allocation3 + $0xad]] }
 0x112   :  { %v683_v13 = vsel %vm1776_vm8, %v682_v10, 0.0  ;;  %v684_v14 = vsel %vm1808_vm11, %v681_v9, 0.0  ;;  %vm736_vm12 = vcmp.lt.s32.totalorder %v1577_v16, 126 }
 0x113   :  { %v690_v20 = vmul.f32 %v689_v7, %v683_v13  ;;  %v691_v21 = vmul.f32 %v689_v7, %v684_v14 }
 0x114   :  { %v717_v23 = vpop.permute.xlu1 %716  ;;  %v715_v49 = vpop.permute.xlu0 %714 }
 0x115   :  { %v692_v45 = vadd.f32 %v690_v20, %v656_v60  ;;  %v693_v46 = vadd.f32 %v691_v21, %v657_v61  ;;  %v719_v50 = vsel %vm718_vm0, %v715_v49, %v717_v23  ;;  %v720_v47 = vsel %vm718_vm0, %v717_v23, %v715_v49 }
 0x116   :  { %v721_v40 = vsel %vm1824_vm13, %v719_v50, 0.0  ;;  %v722_v51 = vsel %vm1828_vm14, %v720_v47, 0.0  ;;  %vm754_vm0 = vcmp.lt.s32.totalorder %v1577_v16, 125  ;;  %v712_v60 = vadd.f32 %v708_v33, %v674_v18 }
 0x117   :  { %v728_v52 = vmul.f32 %v727_v38, %v721_v40  ;;  %v729_v11 = vmul.f32 %v727_v38, %v722_v51  ;;  %v713_v61 = vadd.f32 %v710_v48, %v675_v2  ;;  %v787_v50 = vstv %s2241_s28  ;;  %s2325_s28 = sld [smem:[#allocation3 + $0x2a]] }
 0x118   :  { %v735_v54 = vpop.permute.xlu1 %734  ;;  %v733_v56 = vpop.permute.xlu0 %732  ;;  %v788_v47 = vstv %s2243_s30  ;;  %v805_v40 = vstv %s2249_s4  ;;  %v806_v51 = vstv %s2251_s0  ;;  %v823_v48 = vstv %s2253_s5  ;;  %s2327_s30 = sld [smem:[#allocation3 + $0xaa]]  ;;  %s2343_s4 = sld [smem:[#allocation3 + $0x2b]] }
 0x119   :  { %v730_v57 = vadd.f32 %v728_v52, %v692_v45  ;;  %v731_v30 = vadd.f32 %v729_v11, %v693_v46  ;;  %v737_v15 = vsel %vm736_vm12, %v733_v56, %v735_v54  ;;  %v738_v58 = vsel %vm736_vm12, %v735_v54, %v733_v56  ;;  %s2345_s0 = sld [smem:[#allocation3 + $0xab]]  ;;  %vm2843_vm12 = vmmov %vm2833_vm6  ;;  %s2364_s5 = sld [smem:[#allocation3 + $0x2c]] }
 0x11a   :  { %v739_v59 = vsel %vm1782_vm9, %v737_v15, 0.0  ;;  %v740_v34 = vsel %vm1797_vm10, %v738_v58, 0.0  ;;  %v824_v54 = vstv %s2255_s6  ;;  %v858_v56 = vstv %s2259_s2  ;;  %s2366_s6 = sld [smem:[#allocation3 + $0xac]]  ;;  %s2374_s2 = sld [smem:[#allocation3 + $0xae]] }
 0x11b   :  { %v746_v28 = vmul.f32 %v745_v55, %v739_v59  ;;  %v747_v19 = vmul.f32 %v745_v55, %v740_v34  ;;  %v857_v55 = vstv %s2257_s7  ;;  %v2332_v15 = vsel %vm2833_vm6, %v787_v50, %v788_v47  ;;  %s2372_s7 = sld [smem:[#allocation3 + $0x2e]] }
 0x11c   :  { %v753_v62 = vpop.permute.xlu1 %752  ;;  %v751_v63 = vpop.permute.xlu0 %750  ;;  %v2337_v58 = vsel %vm2842_vm7, %v805_v40, %v806_v51  ;;  %vm2844_vm7 = vmmov %vm2833_vm6  ;;  %v971_v47 = vstv %s2293_s20  ;;  %v972_v40 = vstv %s2295_s21  ;;  %v989_v51 = vstv %s2297_s22 }
 0x11d   :  { %v2213_v0 = vadd.f32 %v746_v28, %v712_v60  ;;  %v2215_v6 = vadd.f32 %v747_v19, %v713_v61  ;;  %v755_v37 = vsel %vm754_vm0, %v751_v63, %v753_v62  ;;  %v756_v7 = vsel %vm754_vm0, %v753_v62, %v751_v63  ;;  %vm2845_vm0 = vmmov %vm2833_vm6 }
 0x11e   :  { %v757_v31 = vsel %vm1857_vm2, %v755_v37, 0.0  ;;  %v758_v8 = vsel %vm1861_vm3, %v756_v7, 0.0  ;;  %v2350_v60 = vsel %vm2843_vm12, %v823_v48, %v824_v54  ;;  %v2354_v61 = vsel %vm2844_vm7, %v857_v55, %v858_v56  ;;  %vm2846_vm3 = vmmov %vm2845_vm0 }
 0x11f   :  { %v764_v3 = vmul.f32 %v763_v1, %v757_v31  ;;  %v765_v18 = vmul.f32 %v763_v1, %v758_v8  ;;  %v2358_v28 = vsel %vm2845_vm0, %v839_v17, %v840_v53  ;;  %v893_v62 = vstv %s2273_s11  ;;  %vm2849_vm12 = vmmov %vm2845_vm0  ;;  %s2573_s11 = sld [smem:[#allocation3 + $0x30]] }
 0x120   :  { %v2221_v2 = vpop.permute.xlu1 %778  ;;  %v2223_v9 = vpop.permute.xlu0 %776  ;;  %v894_v1 = vstv %s2275_s12  ;;  %v919_v63 = vstv %s2277_s13  ;;  %v920_v37 = vstv %s2279_s14  ;;  %v937_v7 = vstv %s2285_s15  ;;  %vm2850_vm7 = vmmov %vm2845_vm0  ;;  %s2575_s12 = sld [smem:[#allocation3 + $0xb0]]  ;;  %s1523_s13 = smov [#allocation8]  }
 0x121   :  { %v2225_v10 = vadd.f32 %v764_v3, %v730_v57  ;;  %v2227_v13 = vadd.f32 %v765_v18, %v731_v30  ;;  %v875_v57 = vstv %s2269_s10  ;;  %v876_v30 = vstv %s2271_s1  ;;  %s2393_s10 = sld [smem:[#allocation3 + $0x2f]]  ;;  %s1224_s14 = sshll.u32 %s1523_s13, 4  ;;  %s1225_s14 = int_to_ptr.vmem [resolvable:$true] %s1224_s14 }
 0x122   :  { %v2362_v19 = vsel %vm2846_vm3, %v875_v57, %v876_v30  ;;  %v938_v31 = vstv %s2287_s16  ;;  %v955_v8 = vstv %s2289_s18  ;;  %v956_v3 = vstv %s2291_s19  ;;  %s2395_s1 = sld [smem:[#allocation3 + $0xaf]]  ;;  %vm2852_vm3 = vmmov %vm2845_vm0  ;;  %s1438_s15 = scalar_lea.vmem %s1225_s14, 64 }
 0x123   :  { %v990_v48 = vstv %s2299_s23  ;;  %v1007_v54 = vstv %s2309_s24  ;;  %v1008_v55 = vstv %s2311_s25  ;;  %v1025_v56 = vstv %s2317_s26  ;;  %vm2856_vm6 = vmmov %vm2852_vm3  ;;  %p1439_p11 = scmp.ne.s32.totalorder %s1225_s14, %s1438_s15  ;;  %p1443_p12 = scmp.lt.s32.totalorder %s1225_s14, %s1225_s14 }
 0x124   :  { %v2229_v14 = vpop.permute.xlu1 %796  ;;  %v2231_v20 = vpop.permute.xlu0 %794  ;;  %v1026_v17 = vstv %s2319_s27  ;;  %v2403_v53 = vsel %vm2849_vm12, %v893_v62, %v894_v1  ;;  %v2407_v57 = vsel %vm2845_vm0, %v919_v63, %v920_v37  ;;  %v2411_v30 = vsel %vm2850_vm7, %v937_v7, %v938_v31  ;;  %p1444_p13 = scmp.lt.s32.totalorder %s1438_s15, %s1438_s15 }
 0x125   :  { %2851 = vst [vmem:[#allocation14_spill] sm:$0xff] %v2411_v30  ;;  %v2415_v12 = vsel %vm2852_vm3, %v955_v8, %v956_v3  ;;  %vm2854_vm12 = vcmp.lt.s32.totalorder %v1577_v16, 115  ;;  %vm868_vm7 = vcmp.lt.s32.totalorder %v1577_v16, 110  ;;  %v2428_v63 = vsel %vm2856_vm6, %v971_v47, %v972_v40 }
 0x126   :  { %2853 = vst [vmem:[#allocation15_spill] sm:$0xff] %v2415_v12  ;;  %v781_v62 = vsel %vm2854_vm12, %v2223_v9, %v2221_v2  ;;  %vm2855_vm0 = vmmov %vm2854_vm12  ;;  %v2432_v37 = vsel %vm2852_vm3, %v989_v51, %v990_v48  ;;  %v1051_v8 = vstv %s2325_s28  ;;  %v1052_v3 = vstv %s2327_s30  ;;  %p1445_p0 = por %p1444_p13, %p1443_p12 }
 0x127   :  { %v782_v1 = vsel %vm2855_vm0, %v2221_v2, %v2223_v9  ;;  %2857 = vst [vmem:[#allocation16_spill] sm:$0xff] %v2428_v63  ;;  %2858 = vst [vmem:[#allocation17_spill] sm:$0xff] %v2432_v37  ;;  %v1069_v47 = vstv %s2343_s4  ;;  %v1070_v40 = vstv %s2345_s0  ;;  %v1087_v51 = vstv %s2364_s5 }
 0x128   :  { %v2233_v21 = vpop.permute.xlu1 %814  ;;  %v2235_v32 = vpop.permute.xlu0 %812  ;;  %vm2861_vm0 = vmmov %vm2852_vm3  ;;  %v1088_v48 = vstv %s2366_s6  ;;  %v783_v37 = vsel %vm1875_vm4, %v781_v62, 0.0  ;;  %vm2865_vm3 = vcmp.lt.s32.totalorder %v1577_v16, 114  ;;  %v1104_v63 = vstv %s2383_s9  ;;  %p1446_p1 = pnand %p1445_p0, %p1439_p11 }
 0x129   :  { %v2442_v2 = vsel %vm2861_vm0, %v1007_v54, %v1008_v55  ;;  %vm2863_vm6 = vmmov %vm2861_vm0  ;;  %v784_v54 = vsel %vm1879_vm5, %v782_v1, 0.0  ;;  %v799_v55 = vsel %vm2865_vm3, %v2231_v20, %v2229_v14  ;;  %vm2867_vm12 = vcmp.lt.s32.totalorder %v1577_v16, 113 }
 0x12a   :  { %2862 = vst [vmem:[#allocation20_spill] sm:$0xff] %v2442_v2  ;;  %v2446_v9 = vsel %vm2863_vm6, %v1025_v56, %v1026_v17  ;;  %vm2866_vm0 = vmmov %vm2865_vm3  ;;  %v1121_v17 = vstv %s2372_s7  ;;  %v1103_v2 = vstv %s2381_s8  ;;  %v817_v62 = vsel %vm2867_vm12, %v2235_v32, %v2233_v21 }
 0x12b   :  { %2864 = vst [vmem:[#allocation21_spill] sm:$0xff] %v2446_v9  ;;  %v800_v56 = vsel %vm2866_vm0, %v2229_v14, %v2231_v20  ;;  %v1122_v9 = vstv %s2374_s2  ;;  %vm2868_vm3 = vmmov %vm2867_vm12  ;;  %v1139_v20 = vstv %s2393_s10  ;;  %v791_v30 = vmul.f32 %v2332_v15, %v784_v54 }
 0x12c   :  { %v2237_v33 = vpop.permute.xlu1 %848  ;;  %v2239_v23 = vpop.permute.xlu0 %846  ;;  %v818_v1 = vsel %vm2868_vm3, %v2233_v21, %v2235_v32  ;;  %vm2869_vm12 = vcmp.lt.s32.totalorder %v1577_v16, 111  ;;  %vm2871_vm3 = vmmov %vm2863_vm6  ;;  %v819_v54 = vsel %vm1776_vm8, %v817_v62, 0.0 }
 0x12d   :  { %v851_v21 = vsel %vm2869_vm12, %v2239_v23, %v2237_v33  ;;  %vm2870_vm0 = vmmov %vm2869_vm12 }
 0x12e   :  { %v852_v32 = vsel %vm2870_vm0, %v2237_v33, %v2239_v23  ;;  %vm2872_vm2 = vmmov %vm2871_vm3 }
 0x12f   :  { %vm2873_vm12 = vmmov %vm2872_vm2 }
 0x130   :  { %v2245_v38 = vpop.permute.xlu1 %832  ;;  %v2247_v49 = vpop.permute.xlu0 %830  ;;  %vm2874_vm0 = vmmov %vm2872_vm2 }
 0x131   :  { %v2518_v33 = vsel %vm2874_vm0, %v1121_v17, %v1122_v9  ;;  %vm2876_vm6 = vmmov %vm2874_vm0  ;;  %v793_v9 = vadd.f32 %v791_v30, %v2215_v6 }
 0x134   :  { %v2265_v41 = vpop.permute.xlu1 %866  ;;  %v2267_v24 = vpop.permute.xlu0 %864 }
 0x138   :  { %v2281_v45 = vpop.permute.xlu1 %884  ;;  %v2283_v46 = vpop.permute.xlu0 %882 }
 0x13c   :  { %v2305_v52 = vpop.permute.xlu1 %910  ;;  %v2307_v11 = vpop.permute.xlu0 %908 }
 0x140   :  { %v2339_v59 = vpop.permute.xlu1 %928  ;;  %v2341_v34 = vpop.permute.xlu0 %926 }
 0x144   :  { %v2385_v18 = vpop.permute.xlu1 %946  ;;  %v2387_v50 = vpop.permute.xlu0 %944 }
 0x145   :  { %2847 = vst [vmem:[#allocation12_spill] sm:$0xff] %v2385_v18  ;;  %2848 = vst [vmem:[#allocation13_spill] sm:$0xff] %v2387_v50  ;;  %v801_v50 = vsel %vm1680_vm15, %v799_v55, 0.0  ;;  %v802_v18 = vsel %vm1689_vm1, %v800_v56, 0.0  ;;  %v820_v55 = vsel %vm1808_vm11, %v818_v1, 0.0  ;;  %v2514_v56 = vsel %vm2873_vm12, %v1087_v51, %v1088_v48 }
 0x146   :  { %v808_v23 = vmul.f32 %v2337_v58, %v801_v50  ;;  %v853_v50 = vsel %vm1824_vm13, %v851_v21, 0.0  ;;  %v826_v48 = vmul.f32 %v2350_v60, %v819_v54 }
 0x148   :  { %v2436_v7 = vpop.permute.xlu1 %964  ;;  %v2438_v31 = vpop.permute.xlu0 %962 }
 0x149   :  { %2859 = vst [vmem:[#allocation18_spill] sm:$0xff] %v2436_v7  ;;  %2860 = vst [vmem:[#allocation19_spill] sm:$0xff] %v2438_v31  ;;  %v1140_v31 = vstv %s2395_s1  ;;  %v790_v7 = vmul.f32 %v2332_v15, %v783_v37  ;;  %v2502_v37 = vsel %vm2871_vm3, %v1051_v8, %v1052_v3  ;;  %v2506_v15 = vsel %vm2872_vm2, %v1069_v47, %v1070_v40 }
 0x14a   :  { %v809_v8 = vmul.f32 %v2337_v58, %v802_v18  ;;  %vm2875_vm3 = vmmov %vm2874_vm0  ;;  %v2531_v40 = vsel %vm2876_vm6, %v1139_v20, %v1140_v31  ;;  %v854_v58 = vsel %vm1828_vm14, %v852_v32, 0.0  ;;  %v869_v31 = vsel %vm868_vm7, %v2267_v24, %v2265_v41 }
 0x14b   :  { %v2527_v47 = vsel %vm2875_vm3, %v1103_v2, %v1104_v63  ;;  %v792_v51 = vadd.f32 %v790_v7, %v2213_v0  ;;  %v827_v63 = vmul.f32 %v2350_v60, %v820_v55  ;;  %v870_v0 = vsel %vm868_vm7, %v2265_v41, %v2267_v24 }
 0x14c   :  { %v2480_v12 = vpop.permute.xlu1 %980  ;;  %v2482_v14 = vpop.permute.xlu0 %978  ;;  %vm2877_vm6 = vcmp.lt.s32.totalorder %v1577_v16, 112  ;;  %vm2879_vm0 = vcmp.lt.s32.totalorder %v1577_v16, 109  ;;  %v810_v24 = vadd.f32 %v808_v23, %v2225_v10  ;;  %v811_v7 = vadd.f32 %v809_v8, %v2227_v13 }
 0x14d   :  { %v835_v6 = vsel %vm2877_vm6, %v2247_v49, %v2245_v38  ;;  %vm2878_vm12 = vmmov %vm2877_vm6  ;;  %v887_v30 = vsel %vm2879_vm0, %v2283_v46, %v2281_v45  ;;  %v860_v2 = vmul.f32 %v2354_v61, %v853_v50  ;;  %vm2883_vm7 = vnez %v2817_v26 }
 0x14e   :  { %v836_v60 = vsel %vm2878_vm12, %v2245_v38, %v2247_v49  ;;  %vm2880_vm3 = vmmov %vm2879_vm0  ;;  %v861_v38 = vmul.f32 %v2354_v61, %v854_v58  ;;  %vm2881_vm12 = vcmp.lt.s32.totalorder %v1577_v16, 99  ;;  %v842_v17 = vmul.f32 %v2358_v28, %v835_v6  ;;  %v2887_v6 = vld [vmem:[#allocation12_spill] sm:$0xff] }
 0x14f   :  { %v888_v41 = vsel %vm2880_vm3, %v2281_v45, %v2283_v46  ;;  %v871_v45 = vsel %vm1782_vm9, %v869_v31, 0.0  ;;  %v872_v46 = vsel %vm1797_vm10, %v870_v0, 0.0  ;;  %v913_v10 = vsel %vm2881_vm12, %v2307_v11, %v2305_v52  ;;  %vm2882_vm0 = vmmov %vm2881_vm12 }
 0x150   :  { %v2523_v3 = vpop.permute.xlu1 %998  ;;  %v914_v13 = vsel %vm2882_vm0, %v2305_v52, %v2307_v11  ;;  %v843_v62 = vmul.f32 %v2358_v28, %v836_v60  ;;  %v889_v1 = vsel %vm2883_vm7, %v887_v30, 0.0  ;;  %vm2884_vm2 = vnez %v2819_v29  ;;  %v2888_v60 = vld [vmem:[#allocation13_spill] sm:$0xff] }
 0x151   :  { %v2539_v18 = vpop.permute.xlu0 %996  ;;  %v890_v20 = vsel %vm2884_vm2, %v888_v41, 0.0  ;;  %v828_v21 = vadd.f32 %v826_v48, %v792_v51  ;;  %v829_v32 = vadd.f32 %v827_v63, %v793_v9  ;;  %vm2885_vm12 = vcmp.lt.s32.totalorder %v1577_v16, 98 }
 0x152   :  { %v931_v52 = vsel %vm2885_vm12, %v2341_v34, %v2339_v59  ;;  %vm2886_vm0 = vmmov %vm2885_vm12  ;;  %v878_v28 = vmul.f32 %v2362_v19, %v871_v45  ;;  %v879_v54 = vmul.f32 %v2362_v19, %v872_v46  ;;  %v915_v55 = vsel %vm1875_vm4, %v913_v10, 0.0  ;;  %v2891_v46 = vld [vmem:[#allocation14_spill] sm:$0xff] }
 0x153   :  { %v932_v11 = vsel %vm2886_vm0, %v2339_v59, %v2341_v34  ;;  %v916_v23 = vsel %vm1879_vm5, %v914_v13, 0.0  ;;  %v862_v51 = vadd.f32 %v860_v2, %v828_v21  ;;  %v863_v9 = vadd.f32 %v861_v38, %v829_v32 }
 0x154   :  { %v1017_v49 = vpop.permute.xlu1 %1016  ;;  %v896_v50 = vmul.f32 %v2403_v53, %v889_v1  ;;  %v897_v58 = vmul.f32 %v2403_v53, %v890_v20  ;;  %v844_v34 = vadd.f32 %v842_v17, %v810_v24  ;;  %v845_v19 = vadd.f32 %v843_v62, %v811_v7 }
 0x155   :  { %v1015_v61 = vpop.permute.xlu0 %1014  ;;  %v933_v48 = vsel %vm1680_vm15, %v931_v52, 0.0  ;;  %v934_v63 = vsel %vm1689_vm1, %v932_v11, 0.0  ;;  %v922_v31 = vmul.f32 %v2407_v57, %v915_v55  ;;  %v923_v0 = vmul.f32 %v2407_v57, %v916_v23  ;;  %v2897_v55 = vld [vmem:[#allocation19_spill] sm:$0xff] }
 0x156   :  { %vm2889_vm0 = vcmp.lt.s32.totalorder %v1577_v16, 97  ;;  %v880_v41 = vadd.f32 %v878_v28, %v844_v34  ;;  %v881_v24 = vadd.f32 %v879_v54, %v845_v19  ;;  %v1157_v2 = vstv %s2573_s11  ;;  %v2896_v54 = vld [vmem:[#allocation18_spill] sm:$0xff] }
 0x157   :  { %v949_v53 = vsel %vm2889_vm0, %v2888_v60, %v2887_v6  ;;  %vm2890_vm12 = vmmov %vm2889_vm0  ;;  %v1158_v38 = vstv %s2575_s12  ;;  %v898_v57 = vadd.f32 %v896_v50, %v862_v51  ;;  %v899_v45 = vadd.f32 %v897_v58, %v863_v9  ;;  %v2902_v50 = vld [vmem:[#allocation15_spill] sm:$0xff] }
 0x158   :  { %v1043_v8 = vpop.permute.xlu1 %1042  ;;  %v950_v30 = vsel %vm2890_vm12, %v2887_v6, %v2888_v60  ;;  %v940_v10 = vmul.f32 %v2891_v46, %v933_v48  ;;  %v941_v13 = vmul.f32 %v2891_v46, %v934_v63  ;;  %v951_v62 = vsel %vm1776_vm8, %v949_v53, 0.0 }
 0x159   :  { %v1041_v59 = vpop.permute.xlu0 %1040  ;;  %v952_v1 = vsel %vm1808_vm11, %v950_v30, 0.0  ;;  %vm2892_vm12 = vcmp.lt.s32.totalorder %v1577_v16, 95  ;;  %v924_v32 = vadd.f32 %v922_v31, %v880_v41  ;;  %v925_v52 = vadd.f32 %v923_v0, %v881_v24  ;;  %v2904_v30 = vld [vmem:[#allocation17_spill] sm:$0xff] }
 0x15a   :  { %v983_v20 = vsel %vm2892_vm12, %v2482_v14, %v2480_v12  ;;  %vm2893_vm0 = vmmov %vm2892_vm12  ;;  %vm2894_vm6 = vcmp.lt.s32.totalorder %v1577_v16, 94  ;;  %vm2898_vm12 = vcmp.lt.s32.totalorder %v1577_v16, 96  ;;  %vm2900_vm3 = vcmp.lt.s32.totalorder %v1577_v16, 93 }
 0x15b   :  { %v984_v21 = vsel %vm2893_vm0, %v2480_v12, %v2482_v14  ;;  %v1001_v11 = vsel %vm2894_vm6, %v2539_v18, %v2523_v3  ;;  %vm2895_vm11 = vmmov %vm2894_vm6  ;;  %v967_v23 = vsel %vm2898_vm12, %v2897_v55, %v2896_v54  ;;  %v1019_v14 = vsel %vm2900_vm3, %v1015_v61, %v1017_v49 }
 0x15c   :  { %v1061_v7 = vpop.permute.xlu1 %1060  ;;  %v1002_v28 = vsel %vm2895_vm11, %v2523_v3, %v2539_v18  ;;  %vm2899_vm0 = vmmov %vm2898_vm12  ;;  %v958_v58 = vmul.f32 %v2902_v50, %v951_v62  ;;  %v959_v3 = vmul.f32 %v2902_v50, %v952_v1  ;;  %v985_v18 = vsel %vm1824_vm13, %v983_v20, 0.0  ;;  %v2907_v62 = vld [vmem:[#allocation20_spill] sm:$0xff] }
 0x15d   :  { %v1059_v17 = vpop.permute.xlu0 %1058  ;;  %v968_v12 = vsel %vm2899_vm0, %v2896_v54, %v2897_v55  ;;  %vm2901_vm6 = vmmov %vm2900_vm3  ;;  %v986_v34 = vsel %vm1828_vm14, %v984_v21, 0.0  ;;  %v942_v48 = vadd.f32 %v940_v10, %v898_v57  ;;  %v943_v63 = vadd.f32 %v941_v13, %v899_v45 }
 0x15e   :  { %v1020_v51 = vsel %vm2901_vm6, %v1017_v49, %v1015_v61  ;;  %v1003_v31 = vsel %vm1782_vm9, %v1001_v11, 0.0  ;;  %v1004_v49 = vsel %vm1797_vm10, %v1002_v28, 0.0  ;;  %v2903_v61 = vld [vmem:[#allocation16_spill] sm:$0xff]  ;;  %v1021_v60 = vsel %vm2883_vm7, %v1019_v14, 0.0  ;;  %v2908_v11 = vld [vmem:[#allocation21_spill] sm:$0xff] }
 0x15f   :  { %v974_v0 = vmul.f32 %v2903_v61, %v967_v23  ;;  %v975_v6 = vmul.f32 %v2903_v61, %v968_v12  ;;  %v1022_v53 = vsel %vm2884_vm2, %v1020_v51, 0.0  ;;  %v992_v41 = vmul.f32 %v2904_v30, %v985_v18 }
 0x160   :  { %v1079_v9 = vpop.permute.xlu1 %1078  ;;  %v993_v24 = vmul.f32 %v2904_v30, %v986_v34  ;;  %vm2905_vm12 = vcmp.lt.s32.totalorder %v1577_v16, 83  ;;  %v960_v10 = vadd.f32 %v958_v58, %v924_v32  ;;  %v961_v13 = vadd.f32 %v959_v3, %v925_v52 }
 0x161   :  { %v1077_v19 = vpop.permute.xlu0 %1076  ;;  %v1045_v57 = vsel %vm2905_vm12, %v1041_v59, %v1043_v8  ;;  %vm2906_vm0 = vmmov %vm2905_vm12  ;;  %v1010_v1 = vmul.f32 %v2907_v62, %v1003_v31  ;;  %v1011_v20 = vmul.f32 %v2907_v62, %v1004_v49  ;;  %v1028_v28 = vmul.f32 %v2908_v11, %v1021_v60 }
 0x162   :  { %v1046_v45 = vsel %vm2906_vm0, %v1043_v8, %v1041_v59  ;;  %v1029_v54 = vmul.f32 %v2908_v11, %v1022_v53  ;;  %vm2909_vm6 = vcmp.lt.s32.totalorder %v1577_v16, 82  ;;  %v1047_v8 = vsel %vm1875_vm4, %v1045_v57, 0.0 }
 0x163   :  { %v1063_v55 = vsel %vm2909_vm6, %v1059_v17, %v1061_v7  ;;  %vm2910_vm12 = vmmov %vm2909_vm6  ;;  %v1048_v59 = vsel %vm1879_vm5, %v1046_v45, 0.0  ;;  %vm2911_vm0 = vcmp.lt.s32.totalorder %v1577_v16, 81  ;;  %vm1150_vm11 = vcmp.lt.s32.totalorder %v1577_v16, 77 }
 0x164   :  { %v1113_v46 = vpop.permute.xlu1 %1112  ;;  %v1064_v23 = vsel %vm2910_vm12, %v1061_v7, %v1059_v17  ;;  %v1081_v32 = vsel %vm2911_vm0, %v1077_v19, %v1079_v9  ;;  %vm2912_vm3 = vmmov %vm2911_vm0  ;;  %v976_v12 = vadd.f32 %v974_v0, %v942_v48  ;;  %v977_v14 = vadd.f32 %v975_v6, %v943_v63 }
 0x165   :  { %v1111_v21 = vpop.permute.xlu0 %1110  ;;  %v1082_v52 = vsel %vm2912_vm3, %v1079_v9, %v1077_v19  ;;  %v994_v51 = vadd.f32 %v992_v41, %v960_v10  ;;  %v995_v50 = vadd.f32 %v993_v24, %v961_v13  ;;  %v1065_v4 = vsel %vm1680_vm15, %v1063_v55, 0.0 }
 0x166   :  { %v1066_v5 = vsel %vm1689_vm1, %v1064_v23, 0.0  ;;  %vm2913_vm4 = vcmp.lt.s32.totalorder %v1577_v16, 79  ;;  %v1054_v3 = vmul.f32 %v2502_v37, %v1047_v8  ;;  %v1055_v18 = vmul.f32 %v2502_v37, %v1048_v59 }
 0x167   :  { %v1115_v7 = vsel %vm2913_vm4, %v1111_v21, %v1113_v46  ;;  %vm2914_vm5 = vmmov %vm2913_vm4  ;;  %v1083_v34 = vsel %vm1776_vm8, %v1081_v32, 0.0  ;;  %vm2915_vm3 = vnez %v2811_v36  ;;  %v1012_v19 = vadd.f32 %v1010_v1, %v976_v12 }
 0x168   :  { %v1097_v58 = vpop.permute.xlu1 %1096  ;;  %v1116_v17 = vsel %vm2914_vm5, %v1113_v46, %v1111_v21  ;;  %v1084_v39 = vsel %vm2915_vm3, %v1082_v52, 0.0  ;;  %v1013_v42 = vadd.f32 %v1011_v20, %v977_v14  ;;  %v1030_v48 = vadd.f32 %v1028_v28, %v994_v51 }
 0x169   :  { %v1095_v9 = vpop.permute.xlu0 %1094  ;;  %v1031_v63 = vadd.f32 %v1029_v54, %v995_v50  ;;  %v1072_v31 = vmul.f32 %v2506_v15, %v1065_v4  ;;  %v1073_v49 = vmul.f32 %v2506_v15, %v1066_v5  ;;  %v1117_v61 = vsel %vm1824_vm13, %v1115_v7, 0.0 }
 0x16a   :  { %v1118_v37 = vsel %vm1828_vm14, %v1116_v17, 0.0  ;;  %v1090_v22 = vmul.f32 %v2514_v56, %v1083_v34  ;;  %v1091_v36 = vmul.f32 %v2514_v56, %v1084_v39  ;;  %vm2916_vm15 = vcmp.lt.s32.totalorder %v1577_v16, 80 }
 0x16b   :  { %v1099_v6 = vsel %vm2916_vm15, %v1095_v9, %v1097_v58  ;;  %vm2917_vm1 = vmmov %vm2916_vm15  ;;  %v1056_v53 = vadd.f32 %v1054_v3, %v1012_v19  ;;  %v1057_v43 = vadd.f32 %v1055_v18, %v1013_v42  ;;  %vm2918_vm8 = vcmp.lt.s32.totalorder %v1577_v16, 78 }
 0x16c   :  { %v1131_v0 = vpop.permute.xlu1 %1130  ;;  %v1100_v60 = vsel %vm2917_vm1, %v1097_v58, %v1095_v9  ;;  %vm2919_vm13 = vmmov %vm2918_vm8  ;;  %v1124_v41 = vmul.f32 %v2518_v33, %v1117_v61  ;;  %v1125_v24 = vmul.f32 %v2518_v33, %v1118_v37  ;;  %v1106_v45 = vmul.f32 %v2527_v47, %v1099_v6 }
 0x16d   :  { %v1129_v15 = vpop.permute.xlu0 %1128  ;;  %v1107_v46 = vmul.f32 %v2527_v47, %v1100_v60  ;;  %vm2920_vm14 = vcmp.lt.s32.totalorder %v1638_v25, 2  ;;  %v1074_v62 = vadd.f32 %v1072_v31, %v1030_v48  ;;  %v1075_v1 = vadd.f32 %v1073_v49, %v1031_v63 }
 0x16e   :  { %v1133_v44 = vsel %vm2918_vm8, %v1129_v15, %v1131_v0  ;;  %v1134_v30 = vsel %vm2919_vm13, %v1131_v0, %v1129_v15  ;;  %v1159_v13 = vsel %vm2920_vm14, %v1157_v2, %v1158_v38  ;;  %v1092_v20 = vadd.f32 %v1090_v22, %v1056_v53 }
 0x16f   :  { %v1135_v56 = vsel %vm1782_vm9, %v1133_v44, 0.0  ;;  %v1136_v57 = vsel %vm1797_vm10, %v1134_v30, 0.0  ;;  %v1093_v33 = vadd.f32 %v1091_v36, %v1057_v43  ;;  %v1108_v55 = vadd.f32 %v1106_v45, %v1074_v62 }
 0x170   :  { %v1149_v10 = vpop.permute.xlu1 %1148  ;;  %v1142_v27 = vmul.f32 %v2531_v40, %v1135_v56  ;;  %v1143_v35 = vmul.f32 %v2531_v40, %v1136_v57  ;;  %v1126_v28 = vadd.f32 %v1124_v41, %v1092_v20  ;;  %v1109_v23 = vadd.f32 %v1107_v46, %v1075_v1 }
 0x171   :  { %v1147_v21 = vpop.permute.xlu0 %1146  ;;  %v1127_v54 = vadd.f32 %v1125_v24, %v1093_v33  ;;  %v1522_v3 = vmov 1966171168   ;;  %v2921_v31 = vlaneseq }
 0x172   :  { %v1151_v11 = vsel %vm1150_vm11, %v1147_v21, %v1149_v10  ;;  %v1152_v47 = vsel %vm1150_vm11, %v1149_v10, %v1147_v21  ;;  %v1144_v32 = vadd.f32 %v1142_v27, %v1108_v55  ;;  %v1145_v40 = vadd.f32 %v1143_v35, %v1109_v23 }
 0x173   :  { %v1153_v2 = vsel %vm2883_vm7, %v1151_v11, 0.0  ;;  %v1154_v38 = vsel %vm2884_vm2, %v1152_v47, 0.0  ;;  %v1190_v18 = vunpack.c.l.s4 %v1522_v3  ;;  %vm1215_vm9 = vcmp.lt.s32.totalorder %v2921_v31, 256 }
 0x174   :  { %v1160_v8 = vmul.f32 %v1159_v13, %v1153_v2  ;;  %v1161_v59 = vmul.f32 %v1159_v13, %v1154_v38 }
 0x175   :  { %v1191_v34 = vunpack.c.0.s8 %v1190_v18 }
 0x176   :  { %v1162_v52 = vadd.f32 %v1160_v8, %v1126_v28  ;;  %v1163_v12 = vadd.f32 %v1161_v59, %v1127_v54 }
 0x177   :  { %v1194_v19 = vsub.s32 %v1191_v34, %v1638_v25 }
 0x178   :  { %v1164_v14 = vadd.f32 %v1162_v52, %v1144_v32  ;;  %v1165_v51 = vadd.f32 %v1163_v12, %v1145_v40 }
 0x17a   :  { %v1168_v16 = vrot.slane %v1164_v14, 2  ;;  %v1169_v50 = vrot.slane %v1165_v51, 2 }
 0x17c   :  { %v1172_v58 = vadd.f32 %v1168_v16, %v1164_v14  ;;  %v1173_v4 = vadd.f32 %v1169_v50, %v1165_v51 }
 0x17e   :  { %v1334_v5 = vmul.f32 -1.442695, %v1172_v58  ;;  %v1335_v26 = vmul.f32 -1.442695, %v1173_v4 }
 0x180   :  { %1397 = vpow2.f32 %v1334_v5 }
 0x181   :  { %1399 = vpow2.f32 %v1335_v26 }
 0x18a   :  { %v1398_v29 = vpop.eup %1397 }
 0x18b   :  { %v1400_v7 = vpop.eup %1399  ;;  %v1180_v17 = vadd.f32 1.0, %v1398_v29 }
 0x18c   :  { %v1181_v9 = vadd.f32 1.0, %v1400_v7 }
 0x18d   :  { %1401 = vrcp.f32 %v1180_v17 }
 0x18e   :  { %1403 = vrcp.f32 %v1181_v9 }
 0x197   :  { %v1402_v39 = vpop.eup %1401 }
 0x198   :  { %v1404_v42 = vpop.eup %1403 }
 0x199   :  { %v1188_v48 = vcombine.low %v1402_v39, %v1404_v42 }
 0x19b   :  { %v1195_v63 = vrot.slane %v1188_v48, %v1194_v19 }
 0x19d   :  { %v1196_v49 = vcombine.high %v1195_v63, %v1195_v63  ;;  %v1203_v61 = vrot.slane %v1195_v63, %v1194_v19 }
 0x19f   :  { %v1210_v37 = vrot.slane %v1196_v49, %v1194_v19  ;;  %1217 = vst.msk [vmem:[#allocation8] sm:$0x3] %vm1215_vm9, %v1203_v61 }
 0x1a1   :  { %1218 = vst.msk [vmem:[#allocation8 + $0x2] sm:$0x3] %vm1215_vm9, %v1210_v37 }
 0x1a2   :  { %1449 = shalt.err (!%p1446_p1)
}
 0x1a3   :  { %s1450_s19 = scalar_lea.hbm %s2782_s3, 64 }
 0x1a4   :  { %p1451_p2 = scmp.ne.s32.totalorder %s2782_s3, %s1450_s19  ;;  %p1454_p3 = scmp.lt.u32.totalorder %s1450_s19, %s2782_s3 }
 0x1a6   :  { %p1456_p4 = pnand %p1454_p3, %p1451_p2 }
 0x1a8   :  { %1459 = shalt.err (!%p1456_p4)
}
 0x1a9   :  { %1230 = dma.vmem_to_hbm [thread:$0]  %s1225_s14, 64, %s2782_s3, [#allocation5], %s1482_s17, %s1482_s17, %s1494_s29  }
 0x1aa   :  { %1464 = dma.done.wait [#allocation5], 64  }
 0x1ab   :  { %1465 = vsyncadd [#allocation5], 4294967232 }
 0x1ac   :  { %1234 = vsyncpa [#allocation4], 1 }
 0x1ad   :  { %1235 = vsyncpa [#allocation5], 1 }
 0x1ae   :  { %1236 = vsyncpa [#allocation6], 1 }

</bundles_post_ra>
